<compile_context>
chip_gen: v6e
topology: v6e:2x2x1
jax: 0.10.0
libtpu: 0.0.40
codegen_flags: <defaults>
</compile_context>

<pallas_src>
import jax
import jax.numpy as jnp
import numpy as np
from jax import lax
from jax.experimental import pallas as pl
from jax.experimental.pallas import tpu as pltpu

FRAME_HIST = 4       # frame_hist (input channels)
ACT_DIM = 6          # act_dim
ATOMS = 4            # atoms
N_HID = 128          # n_hid
IMG = 80             # 80x80 -> conv1 16x16 -> conv2 3x3
CONV_OUT_DIM = 576   # 64 * 3 * 3
K1_PAD = 128         # conv1 contraction dim (C*25 = 100) zero-padded to a lane multiple
AT = ACT_DIM * ATOMS          # 24 head outputs
AT_PAD = 128                  # lane-dense head output width (sliced back to 24 outside)
CONV1_TM_TARGET = 2048        # conv1 row-tile target (HBM-bound: bigger tiles -> roofline)
HEAD_TB_TARGET = 256          # kernel-2 batch-tile target (bounded VMEM on every gen)
VMEM_LIMIT = 32 * 1024 * 1024  # explicit scoped-VMEM limit (raises v5e's 16 MiB default)


def _pick_tile(total, target, min_grid=2):
    """Largest power-of-two tile (>= 8) dividing `total`, <= `target`, leaving at
    least `min_grid` grid steps (so v7x's two TCs both get work).  Falls back to
    a single-step grid / the full extent when `total` is tiny or indivisible —
    never silently drops tail rows."""
    for want_grid in (min_grid, 1):
        best = None
        t = 8
        while t <= min(target, total):
            if total % t == 0 and total // t >= want_grid:
                best = t
            t *= 2
        if best is not None:
            return best
    return total


# ---------------------------------------------------------------------------
# Kernel 1: conv1 as a tiled patch matmul (+ bias + ReLU)
# ---------------------------------------------------------------------------
def _conv1_kernel(x_ref, w_ref, b_ref, o_ref):
    y = jnp.dot(x_ref[...], w_ref[...], preferred_element_type=jnp.float32)
    o_ref[...] = jnp.maximum(y + b_ref[...], 0.0).astype(o_ref.dtype)


def _conv1_matmul(p1, w1, b1):
    """relu(p1 @ w1 + b1) with p1:[B*256, 128] bf16, w1:[128, 32] bf16."""
    M = p1.shape[0]
    tm = _pick_tile(M, CONV1_TM_TARGET, min_grid=2)
    assert M % tm == 0
    return pl.pallas_call(
        _conv1_kernel,
        out_shape=jax.ShapeDtypeStruct((M, 32), jnp.bfloat16),
        grid=(M // tm,),
        in_specs=[
            pl.BlockSpec((tm, K1_PAD), lambda i: (i, 0)),
            pl.BlockSpec((K1_PAD, 32), lambda i: (0, 0)),   # weights stay resident
            pl.BlockSpec((1, 32), lambda i: (0, 0)),
        ],
        out_specs=pl.BlockSpec((tm, 32), lambda i: (i, 0)),
        compiler_params=pltpu.CompilerParams(
            dimension_semantics=("parallel",),
            vmem_limit_bytes=VMEM_LIMIT),
    )(p1, w1, b1)


# ---------------------------------------------------------------------------
# Kernel 2: conv2 + fc1 + dueling head, fused and batch-tiled
# ---------------------------------------------------------------------------
def _conv2_fc_head_kernel(p2_ref, w2_ref, b2_ref, wfc1_ref, bfc1_ref,
                          w1c_ref, b1c_ref, w2s_ref, b2o_ref, o_ref, acc_ref):
    # Fresh fc1 accumulator per grid step (the grid axis is batch-parallel).
    acc_ref[...] = jnp.zeros_like(acc_ref)
    w2 = w2_ref[...]
    b2 = b2_ref[...]

    # conv2 (k=s=5, valid -> 3x3 positions) fused with fc1: for each of the 9
    # spatial positions do one patch matmul + ReLU and immediately contract it
    # into the fc1 hidden accumulator (VMEM scratch).  The 576-wide conv
    # feature and the 64-wide conv2 activation never materialize in HBM.
    def fc1_step(p, carry):
        h2p = jnp.dot(p2_ref[p], w2, preferred_element_type=jnp.float32)   # [TB, 64]
        h2p = jnp.maximum(h2p + b2, 0.0).astype(jnp.bfloat16)
        acc_ref[...] += jnp.dot(h2p, wfc1_ref[p],
                                preferred_element_type=jnp.float32)        # [TB, 128]
        return carry

    # Unroll only for small batch tiles (keeps vreg live ranges bounded at large TB).
    lax.fori_loop(0, 9, fc1_step, None, unroll=(acc_ref.shape[0] <= 64))

    hid = jnp.maximum(acc_ref[...] + bfc1_ref[...], 0.0).astype(jnp.bfloat16)  # [TB, 128]

    # Dueling head collapsed to 2 matmuls:
    #   hcat = relu(hid @ [Wv1 | Wa1] + [bv1 | ba1])                [TB, 256]
    #   out  = hcat @ [Wv2_tiled ; Wa2_centered] + b                [TB, 128] (cols 24: pad)
    # where "tiled" broadcasts the value over actions and "centered" has the
    # per-action mean-over-atoms folded in via (I - meanP).
    hcat = jnp.dot(hid, w1c_ref[...], preferred_element_type=jnp.float32)
    hcat = jnp.maximum(hcat + b1c_ref[...], 0.0).astype(jnp.bfloat16)          # [TB, 256]
    out = jnp.dot(hcat, w2s_ref[...], preferred_element_type=jnp.float32)      # [TB, 128]
    o_ref[...] = out + b2o_ref[...]


def _conv2_fc_head(p2, packed, batch):
    tb = _pick_tile(batch, HEAD_TB_TARGET, min_grid=2)
    assert batch % tb == 0
    const2 = lambda shape: pl.BlockSpec(shape, lambda i: (0, 0))
    const3 = lambda shape: pl.BlockSpec(shape, lambda i: (0, 0, 0))
    return pl.pallas_call(
        _conv2_fc_head_kernel,
        out_shape=jax.ShapeDtypeStruct((batch, AT_PAD), jnp.float32),
        grid=(batch // tb,),
        in_specs=[
            pl.BlockSpec((9, tb, 800), lambda i: (0, i, 0)),   # conv2 patches, batch-tiled
            const2((800, 64)), const2((1, 64)),                # conv2 weight / bias (resident)
            const3((9, 64, N_HID)), const2((1, N_HID)),        # fc1 (rows permuted to HWC)
            const2((N_HID, 2 * N_HID)), const2((1, 2 * N_HID)),  # head layer 1 (value|adv)
            const2((2 * N_HID, AT_PAD)), const2((1, AT_PAD)),  # head layer 2 (stacked, padded)
        ],
        out_specs=pl.BlockSpec((tb, AT_PAD), lambda i: (i, 0)),
        scratch_shapes=[pltpu.VMEM((tb, N_HID), jnp.float32)],
        compiler_params=pltpu.CompilerParams(
            dimension_semantics=("parallel",),
            vmem_limit_bytes=VMEM_LIMIT),
    )(p2, packed["w2"], packed["b2"], packed["wfc1"], packed["bfc1"],
      packed["w1cat"], packed["b1cat"], packed["w2stk"], packed["b2out"])


# ---------------------------------------------------------------------------
# One-time parameter packing (outside the jitted forward)
# ---------------------------------------------------------------------------
def pack_params(params):
    hp = jax.lax.Precision.HIGHEST
    C = params["w_conv1"].shape[1]

    # conv1 as patch matmul: columns of p1 are (c, kh, kw); pad K 100 -> 128.
    w1 = params["w_conv1"].reshape(32, C * 25).T                       # [100, 32]
    w1 = jnp.pad(w1, ((0, K1_PAD - C * 25), (0, 0))).astype(jnp.bfloat16)

    # conv2 as patch matmul: rows ordered (kh, kw, c_in) to match the patches.
    w2 = (params["w_conv2"].transpose(2, 3, 1, 0)
          .reshape(25 * 32, 64).astype(jnp.bfloat16))                  # [800, 64]

    # fc1: PyTorch .view(-1, 576) flattens NCHW, i.e. rows of w_fc1 are ordered
    # (c, h, w).  Permute them to (h, w, c) once so the kernel can consume the
    # conv2 output per spatial position directly (no transpose in the forward).
    wfc1 = (params["w_fc1"].reshape(64, 3, 3, N_HID)
            .transpose(1, 2, 0, 3).reshape(9, 64, N_HID).astype(jnp.bfloat16))

    # Dueling head folding:
    #   tile_t broadcasts the value's ATOMS over actions,
    #   center = I - meanP subtracts the per-action mean over atoms.
    tile_t = jnp.tile(jnp.eye(ATOMS, dtype=jnp.float32), (1, ACT_DIM))          # [4, 24]
    center = jnp.eye(AT, dtype=jnp.float32) - jnp.kron(
        jnp.eye(ACT_DIM, dtype=jnp.float32),
        jnp.ones((ATOMS, ATOMS), jnp.float32) / ATOMS)                           # [24, 24]
    wv2t = jnp.dot(params["w_v2"], tile_t, precision=hp)                         # [128, 24]
    bv2t = jnp.dot(params["b_v2"], tile_t, precision=hp)                         # [24]
    wa2c = jnp.dot(params["w_a2"], center, precision=hp)                         # [128, 24]
    ba2c = jnp.dot(params["b_a2"], center, precision=hp)                         # [24]

    w1cat = jnp.concatenate([params["w_v1"], params["w_a1"]], axis=1)            # [128, 256]
    b1cat = jnp.concatenate([params["b_v1"], params["b_a1"]])                    # [256]
    w2stk = jnp.concatenate([wv2t, wa2c], axis=0)                                # [256, 24]
    b2out = bv2t + ba2c                                                          # [24]
    # Lane-dense head output: pad N 24 -> 128 with zero columns so the final
    # store is full-width vst; the extra columns are sliced off outside.
    w2stk = jnp.pad(w2stk, ((0, 0), (0, AT_PAD - AT)))                           # [256, 128]
    b2out = jnp.pad(b2out, (0, AT_PAD - AT))                                     # [128]

    f32 = jnp.float32
    return {
        "w1": w1, "b1": params["b_conv1"].reshape(1, 32).astype(f32),
        "w2": w2, "b2": params["b_conv2"].reshape(1, 64).astype(f32),
        "wfc1": wfc1, "bfc1": params["b_fc1"].reshape(1, N_HID).astype(f32),
        "w1cat": w1cat.astype(jnp.bfloat16), "b1cat": b1cat.reshape(1, 2 * N_HID).astype(f32),
        "w2stk": w2stk.astype(jnp.bfloat16), "b2out": b2out.reshape(1, AT_PAD).astype(f32),
    }


# ---------------------------------------------------------------------------
# Forward pass (patch-extraction glue in XLA, hot path in 2 Pallas calls)
# ---------------------------------------------------------------------------
def dueling_network_forward(x, packed):
    B, C = x.shape[0], x.shape[1]

    # conv1 (k=5, s=5, valid) as non-overlapping patch matmul: 80x80 -> 16x16.
    p1 = (x.reshape(B, C, 16, 5, 16, 5)
            .transpose(0, 2, 4, 1, 3, 5)
            .reshape(B * 256, C * 25))
    p1 = jnp.pad(p1, ((0, 0), (0, K1_PAD - C * 25))).astype(jnp.bfloat16)
    h1 = _conv1_matmul(p1, packed["w1"], packed["b1"])            # [B*256, 32] bf16
    h1 = h1.reshape(B, 16, 16, 32)                                # NHWC

    # conv2 patches (k=5, s=5, valid: 16x16 -> 3x3, rows/cols 0..14 only),
    # position-major so kernel 2 can fuse conv2 -> fc1 -> head without reshapes.
    p2 = (h1[:, :15, :15, :]
            .reshape(B, 3, 5, 3, 5, 32)
            .transpose(1, 3, 0, 2, 4, 5)                          # (h', w', B, kh, kw, c)
            .reshape(9, B, 5 * 5 * 32))                           # [9, B, 800] bf16

    out = _conv2_fc_head(p2, packed, B)                           # [B, 128] f32 (lane-dense)
    return out[:, :AT].reshape(B, ACT_DIM, ATOMS)


# ---------------------------------------------------------------------------
# Deterministic synthetic parameters + pure-JAX f32 reference for verification
# ---------------------------------------------------------------------------
def init_params(key):
    ks = jax.random.split(key, 14)

    def w(k, shape, fan_in):
        return (jax.random.normal(k, shape, jnp.float32) / np.sqrt(fan_in)).astype(jnp.float32)

    return {
        "w_conv1": w(ks[0], (32, FRAME_HIST, 5, 5), FRAME_HIST * 25),   # OIHW
        "b_conv1": w(ks[1], (32,), FRAME_HIST * 25),
        "w_conv2": w(ks[2], (64, 32, 5, 5), 32 * 25),                   # OIHW
        "b_conv2": w(ks[3], (64,), 32 * 25),
        "w_fc1":   w(ks[4], (CONV_OUT_DIM, N_HID), CONV_OUT_DIM),       # (in, out)
        "b_fc1":   w(ks[5], (N_HID,), CONV_OUT_DIM),
        "w_v1":    w(ks[6], (N_HID, N_HID), N_HID),
        "b_v1":    w(ks[7], (N_HID,), N_HID),
        "w_v2":    w(ks[8], (N_HID, ATOMS), N_HID),
        "b_v2":    w(ks[9], (ATOMS,), N_HID),
        "w_a1":    w(ks[10], (N_HID, N_HID), N_HID),
        "b_a1":    w(ks[11], (N_HID,), N_HID),
        "w_a2":    w(ks[12], (N_HID, ATOMS * ACT_DIM), N_HID),
        "b_a2":    w(ks[13], (ATOMS * ACT_DIM,), N_HID),
    }


def reference_forward(x, params):
    hp = jax.lax.Precision.HIGHEST
    dn = ("NCHW", "OIHW", "NCHW")
    h = jax.lax.conv_general_dilated(x, params["w_conv1"], (5, 5), "VALID",
                                     dimension_numbers=dn, precision=hp)
    h = jax.nn.relu(h + params["b_conv1"][None, :, None, None])
    h = jax.lax.conv_general_dilated(h, params["w_conv2"], (5, 5), "VALID",
                                     dimension_numbers=dn, precision=hp)
    h = jax.nn.relu(h + params["b_conv2"][None, :, None, None])
    feat = h.reshape(-1, CONV_OUT_DIM)
    hid = jax.nn.relu(jnp.dot(feat, params["w_fc1"], precision=hp) + params["b_fc1"])
    sv = jax.nn.relu(jnp.dot(hid, params["w_v1"], precision=hp) + params["b_v1"])
    sv = (jnp.dot(sv, params["w_v2"], precision=hp) + params["b_v2"]).reshape(-1, 1, ATOMS)
    adv = jax.nn.relu(jnp.dot(hid, params["w_a1"], precision=hp) + params["b_a1"])
    adv = (jnp.dot(adv, params["w_a2"], precision=hp)
           + params["b_a2"]).reshape(-1, ACT_DIM, ATOMS)
    return sv + adv - jnp.mean(adv, axis=-1, keepdims=True)


# TODO(synk): train_step / reset_noise / polyak_update are training-time host
# logic (optimizer, noise resampling, target-net copy) with no forward-pass
# Pallas equivalent; not implemented.

if __name__ == "__main__":
    key = jax.random.PRNGKey(0)
    k_param, k_x = jax.random.split(key)
    params = init_params(k_param)
    packed = pack_params(params)          # one-time weight packing, outside jit
    x = jax.random.normal(k_x, (2, FRAME_HIST, IMG, IMG), jnp.float32)

    out = jax.block_until_ready(jax.jit(dueling_network_forward)(x, packed))
    ref = jax.block_until_ready(jax.jit(reference_forward)(x, params))

    assert out.shape == (2, ACT_DIM, ATOMS), out.shape
    # Kernels use bf16 operands with f32 accumulation (native MXU path); the
    # reference is full f32 (HIGHEST precision), so allow bf16-level tolerance.
    np.testing.assert_allclose(np.asarray(out), np.asarray(ref), rtol=2e-2, atol=2e-2)

    print("KERNEL_OK")
</pallas_src>

<mosaic_0001>
module attributes {stable_mosaic.version = 11 : i64} {
  func.func @_conv1_kernel(%arg0: i32, %arg1: memref<256x128xbf16, #tpu.memory_space<vmem>>, %arg2: memref<128x32xbf16, #tpu.memory_space<vmem>>, %arg3: memref<1x32xf32, #tpu.memory_space<vmem>>, %arg4: memref<256x32xbf16, #tpu.memory_space<vmem>>) attributes {dimension_semantics = [#tpu.dimension_semantics<parallel>], iteration_bounds = array<i64: 2>, scalar_prefetch = 0 : i64, scratch_operands = 0 : i64, tpu.core_type = #tpu.core_type<tc>, window_params = [{transform_indices = @transform_0, window_bounds = array<i64: 256, 128>}, {pipeline_mode = #tpu.pipeline_mode<synchronous>, transform_indices = @transform_1, window_bounds = array<i64: 128, 32>}, {pipeline_mode = #tpu.pipeline_mode<synchronous>, transform_indices = @transform_2, window_bounds = array<i64: 1, 32>}, {transform_indices = @transform_3, window_bounds = array<i64: 256, 32>}]} {
    %c0 = arith.constant 0 : index
    %c0_0 = arith.constant 0 : index
    %0 = vector.load %arg1[%c0, %c0_0] : memref<256x128xbf16, #tpu.memory_space<vmem>>, vector<256x128xbf16>
    %c0_1 = arith.constant 0 : index
    %c0_2 = arith.constant 0 : index
    %1 = vector.load %arg2[%c0_1, %c0_2] : memref<128x32xbf16, #tpu.memory_space<vmem>>, vector<128x32xbf16>
    %cst = arith.constant dense<0.000000e+00> : vector<256x32xf32>
    %2 = tpu.matmul %0, %1, %cst {dimension_numbers = #tpu.dot_dimension_numbers<[1], [0], [0], [1], [0, 0, 1, 1], [], []>} : vector<256x128xbf16>, vector<128x32xbf16>, vector<256x32xf32> -> vector<256x32xf32>
    %c0_3 = arith.constant 0 : index
    %c0_4 = arith.constant 0 : index
    %3 = vector.load %arg3[%c0_3, %c0_4] : memref<1x32xf32, #tpu.memory_space<vmem>>, vector<1x32xf32>
    %4 = vector.broadcast %3 : vector<1x32xf32> to vector<256x32xf32>
    %5 = arith.addf %2, %4 : vector<256x32xf32>
    %cst_5 = arith.constant 0.000000e+00 : f32
    %6 = vector.broadcast %cst_5 : f32 to vector<256x32xf32>
    %7 = arith.maximumf %5, %6 : vector<256x32xf32>
    %8 = arith.truncf %7 : vector<256x32xf32> to vector<256x32xbf16>
    %c0_6 = arith.constant 0 : index
    %c0_7 = arith.constant 0 : index
    %9 = vector.load %arg4[%c0_6, %c0_7] : memref<256x32xbf16, #tpu.memory_space<vmem>>, vector<256x32xbf16>
    tpu.vector_store %arg4[%c0_6, %c0_7], %8 {strides = array<i32>} : memref<256x32xbf16, #tpu.memory_space<vmem>>, vector<256x32xbf16>,
    return
  }
  func.func @transform_0(%arg0: i32) -> (i32, i32) {
    %c0_i32 = arith.constant 0 : i32
    %c0_i32_0 = arith.constant 0 : i32
    return %arg0, %c0_i32 : i32, i32
  }
  func.func @transform_1(%arg0: i32) -> (i32, i32) {
    %c0_i32 = arith.constant 0 : i32
    %c0_i32_0 = arith.constant 0 : i32
    %c0_i32_1 = arith.constant 0 : i32
    return %c0_i32, %c0_i32_0 : i32, i32
  }
  func.func @transform_2(%arg0: i32) -> (i32, i32) {
    %c0_i32 = arith.constant 0 : i32
    %c0_i32_0 = arith.constant 0 : i32
    %c0_i32_1 = arith.constant 0 : i32
    return %c0_i32, %c0_i32_0 : i32, i32
  }
  func.func @transform_3(%arg0: i32) -> (i32, i32) {
    %c0_i32 = arith.constant 0 : i32
    %c0_i32_0 = arith.constant 0 : i32
    return %arg0, %c0_i32 : i32, i32
  }
}

module attributes {stable_mosaic.version = 11 : i64} {
  func.func @_conv2_fc_head_kernel(%arg0: i32, %arg1: memref<9x2x800xbf16, #tpu.memory_space<vmem>>, %arg2: memref<800x64xbf16, #tpu.memory_space<vmem>>, %arg3: memref<1x64xf32, #tpu.memory_space<vmem>>, %arg4: memref<9x64x128xbf16, #tpu.memory_space<vmem>>, %arg5: memref<1x128xf32, #tpu.memory_space<vmem>>, %arg6: memref<128x256xbf16, #tpu.memory_space<vmem>>, %arg7: memref<1x256xf32, #tpu.memory_space<vmem>>, %arg8: memref<256x128xbf16, #tpu.memory_space<vmem>>, %arg9: memref<1x128xf32, #tpu.memory_space<vmem>>, %arg10: memref<2x128xf32, #tpu.memory_space<vmem>>, %arg11: memref<2x128xf32, #tpu.memory_space<vmem>>) attributes {dimension_semantics = [#tpu.dimension_semantics<parallel>], iteration_bounds = array<i64: 1>, scalar_prefetch = 0 : i64, scratch_operands = 1 : i64, tpu.core_type = #tpu.core_type<tc>, window_params = [{transform_indices = @transform_0, window_bounds = array<i64: 9, 2, 800>}, {pipeline_mode = #tpu.pipeline_mode<synchronous>, transform_indices = @transform_1, window_bounds = array<i64: 800, 64>}, {pipeline_mode = #tpu.pipeline_mode<synchronous>, transform_indices = @transform_2, window_bounds = array<i64: 1, 64>}, {pipeline_mode = #tpu.pipeline_mode<synchronous>, transform_indices = @transform_3, window_bounds = array<i64: 9, 64, 128>}, {pipeline_mode = #tpu.pipeline_mode<synchronous>, transform_indices = @transform_4, window_bounds = array<i64: 1, 128>}, {pipeline_mode = #tpu.pipeline_mode<synchronous>, transform_indices = @transform_5, window_bounds = array<i64: 128, 256>}, {pipeline_mode = #tpu.pipeline_mode<synchronous>, transform_indices = @transform_6, window_bounds = array<i64: 1, 256>}, {pipeline_mode = #tpu.pipeline_mode<synchronous>, transform_indices = @transform_7, window_bounds = array<i64: 256, 128>}, {pipeline_mode = #tpu.pipeline_mode<synchronous>, transform_indices = @transform_8, window_bounds = array<i64: 1, 128>}, {transform_indices = @transform_9, window_bounds = array<i64: 2, 128>}]} {
    %cst = arith.constant 0.000000e+00 : f32
    %0 = vector.broadcast %cst : f32 to vector<2x128xf32>
    %c0 = arith.constant 0 : index
    %c0_0 = arith.constant 0 : index
    %1 = vector.load %arg11[%c0, %c0_0] : memref<2x128xf32, #tpu.memory_space<vmem>>, vector<2x128xf32>
    tpu.vector_store %arg11[%c0, %c0_0], %0 {strides = array<i32>} : memref<2x128xf32, #tpu.memory_space<vmem>>, vector<2x128xf32>,
    %c0_1 = arith.constant 0 : index
    %c0_2 = arith.constant 0 : index
    %2 = vector.load %arg2[%c0_1, %c0_2] : memref<800x64xbf16, #tpu.memory_space<vmem>>, vector<800x64xbf16>
    %c0_3 = arith.constant 0 : index
    %c0_4 = arith.constant 0 : index
    %3 = vector.load %arg3[%c0_3, %c0_4] : memref<1x64xf32, #tpu.memory_space<vmem>>, vector<1x64xf32>
    %c0_i32 = arith.constant 0 : i32
    %4 = arith.index_cast %c0_i32 : i32 to index
    %c0_5 = arith.constant 0 : index
    %c0_6 = arith.constant 0 : index
    %5 = vector.load %arg1[%4, %c0_5, %c0_6] : memref<9x2x800xbf16, #tpu.memory_space<vmem>>, vector<1x2x800xbf16>
    %6 = vector.shape_cast %5 : vector<1x2x800xbf16> to vector<2x800xbf16>
    %cst_7 = arith.constant dense<0.000000e+00> : vector<2x64xf32>
    %7 = tpu.matmul %6, %2, %cst_7 {dimension_numbers = #tpu.dot_dimension_numbers<[1], [0], [0], [1], [0, 0, 1, 1], [], []>} : vector<2x800xbf16>, vector<800x64xbf16>, vector<2x64xf32> -> vector<2x64xf32>
    %8 = vector.broadcast %3 : vector<1x64xf32> to vector<2x64xf32>
    %9 = arith.addf %7, %8 : vector<2x64xf32>
    %cst_8 = arith.constant 0.000000e+00 : f32
    %10 = vector.broadcast %cst_8 : f32 to vector<2x64xf32>
    %11 = arith.maximumf %9, %10 : vector<2x64xf32>
    %12 = arith.truncf %11 : vector<2x64xf32> to vector<2x64xbf16>
    %c0_9 = arith.constant 0 : index
    %c0_10 = arith.constant 0 : index
    %13 = vector.load %arg11[%c0_9, %c0_10] : memref<2x128xf32, #tpu.memory_space<vmem>>, vector<2x128xf32>
    %14 = arith.index_cast %c0_i32 : i32 to index
    %c0_11 = arith.constant 0 : index
    %c0_12 = arith.constant 0 : index
    %15 = vector.load %arg4[%14, %c0_11, %c0_12] : memref<9x64x128xbf16, #tpu.memory_space<vmem>>, vector<1x64x128xbf16>
    %16 = vector.shape_cast %15 : vector<1x64x128xbf16> to vector<64x128xbf16>
    %cst_13 = arith.constant dense<0.000000e+00> : vector<2x128xf32>
    %17 = tpu.matmul %12, %16, %cst_13 {dimension_numbers = #tpu.dot_dimension_numbers<[1], [0], [0], [1], [0, 0, 1, 1], [], []>} : vector<2x64xbf16>, vector<64x128xbf16>, vector<2x128xf32> -> vector<2x128xf32>
    %18 = arith.addf %13, %17 : vector<2x128xf32>
    %c0_14 = arith.constant 0 : index
    %c0_15 = arith.constant 0 : index
    %19 = vector.load %arg11[%c0_14, %c0_15] : memref<2x128xf32, #tpu.memory_space<vmem>>, vector<2x128xf32>
    tpu.vector_store %arg11[%c0_14, %c0_15], %18 {strides = array<i32>} : memref<2x128xf32, #tpu.memory_space<vmem>>, vector<2x128xf32>,
    %c1_i32 = arith.constant 1 : i32
    %20 = arith.index_cast %c1_i32 : i32 to index
    %c0_16 = arith.constant 0 : index
    %c0_17 = arith.constant 0 : index
    %21 = vector.load %arg1[%20, %c0_16, %c0_17] : memref<9x2x800xbf16, #tpu.memory_space<vmem>>, vector<1x2x800xbf16>
    %22 = vector.shape_cast %21 : vector<1x2x800xbf16> to vector<2x800xbf16>
    %cst_18 = arith.constant dense<0.000000e+00> : vector<2x64xf32>
    %23 = tpu.matmul %22, %2, %cst_18 {dimension_numbers = #tpu.dot_dimension_numbers<[1], [0], [0], [1], [0, 0, 1, 1], [], []>} : vector<2x800xbf16>, vector<800x64xbf16>, vector<2x64xf32> -> vector<2x64xf32>
    %24 = vector.broadcast %3 : vector<1x64xf32> to vector<2x64xf32>
    %25 = arith.addf %23, %24 : vector<2x64xf32>
    %cst_19 = arith.constant 0.000000e+00 : f32
    %26 = vector.broadcast %cst_19 : f32 to vector<2x64xf32>
    %27 = arith.maximumf %25, %26 : vector<2x64xf32>
    %28 = arith.truncf %27 : vector<2x64xf32> to vector<2x64xbf16>
    %c0_20 = arith.constant 0 : index
    %c0_21 = arith.constant 0 : index
    %29 = vector.load %arg11[%c0_20, %c0_21] : memref<2x128xf32, #tpu.memory_space<vmem>>, vector<2x128xf32>
    %30 = arith.index_cast %c1_i32 : i32 to index
    %c0_22 = arith.constant 0 : index
    %c0_23 = arith.constant 0 : index
    %31 = vector.load %arg4[%30, %c0_22, %c0_23] : memref<9x64x128xbf16, #tpu.memory_space<vmem>>, vector<1x64x128xbf16>
    %32 = vector.shape_cast %31 : vector<1x64x128xbf16> to vector<64x128xbf16>
    %cst_24 = arith.constant dense<0.000000e+00> : vector<2x128xf32>
    %33 = tpu.matmul %28, %32, %cst_24 {dimension_numbers = #tpu.dot_dimension_numbers<[1], [0], [0], [1], [0, 0, 1, 1], [], []>} : vector<2x64xbf16>, vector<64x128xbf16>, vector<2x128xf32> -> vector<2x128xf32>
    %34 = arith.addf %29, %33 : vector<2x128xf32>
    %c0_25 = arith.constant 0 : index
    %c0_26 = arith.constant 0 : index
    %35 = vector.load %arg11[%c0_25, %c0_26] : memref<2x128xf32, #tpu.memory_space<vmem>>, vector<2x128xf32>
    tpu.vector_store %arg11[%c0_25, %c0_26], %34 {strides = array<i32>} : memref<2x128xf32, #tpu.memory_space<vmem>>, vector<2x128xf32>,
    %c2_i32 = arith.constant 2 : i32
    %36 = arith.index_cast %c2_i32 : i32 to index
    %c0_27 = arith.constant 0 : index
    %c0_28 = arith.constant 0 : index
    %37 = vector.load %arg1[%36, %c0_27, %c0_28] : memref<9x2x800xbf16, #tpu.memory_space<vmem>>, vector<1x2x800xbf16>
    %38 = vector.shape_cast %37 : vector<1x2x800xbf16> to vector<2x800xbf16>
    %cst_29 = arith.constant dense<0.000000e+00> : vector<2x64xf32>
    %39 = tpu.matmul %38, %2, %cst_29 {dimension_numbers = #tpu.dot_dimension_numbers<[1], [0], [0], [1], [0, 0, 1, 1], [], []>} : vector<2x800xbf16>, vector<800x64xbf16>, vector<2x64xf32> -> vector<2x64xf32>
    %40 = vector.broadcast %3 : vector<1x64xf32> to vector<2x64xf32>
    %41 = arith.addf %39, %40 : vector<2x64xf32>
    %cst_30 = arith.constant 0.000000e+00 : f32
    %42 = vector.broadcast %cst_30 : f32 to vector<2x64xf32>
    %43 = arith.maximumf %41, %42 : vector<2x64xf32>
    %44 = arith.truncf %43 : vector<2x64xf32> to vector<2x64xbf16>
    %c0_31 = arith.constant 0 : index
    %c0_32 = arith.constant 0 : index
    %45 = vector.load %arg11[%c0_31, %c0_32] : memref<2x128xf32, #tpu.memory_space<vmem>>, vector<2x128xf32>
    %46 = arith.index_cast %c2_i32 : i32 to index
    %c0_33 = arith.constant 0 : index
    %c0_34 = arith.constant 0 : index
    %47 = vector.load %arg4[%46, %c0_33, %c0_34] : memref<9x64x128xbf16, #tpu.memory_space<vmem>>, vector<1x64x128xbf16>
    %48 = vector.shape_cast %47 : vector<1x64x128xbf16> to vector<64x128xbf16>
    %cst_35 = arith.constant dense<0.000000e+00> : vector<2x128xf32>
    %49 = tpu.matmul %44, %48, %cst_35 {dimension_numbers = #tpu.dot_dimension_numbers<[1], [0], [0], [1], [0, 0, 1, 1], [], []>} : vector<2x64xbf16>, vector<64x128xbf16>, vector<2x128xf32> -> vector<2x128xf32>
    %50 = arith.addf %45, %49 : vector<2x128xf32>
    %c0_36 = arith.constant 0 : index
    %c0_37 = arith.constant 0 : index
    %51 = vector.load %arg11[%c0_36, %c0_37] : memref<2x128xf32, #tpu.memory_space<vmem>>, vector<2x128xf32>
    tpu.vector_store %arg11[%c0_36, %c0_37], %50 {strides = array<i32>} : memref<2x128xf32, #tpu.memory_space<vmem>>, vector<2x128xf32>,
    %c3_i32 = arith.constant 3 : i32
    %52 = arith.index_cast %c3_i32 : i32 to index
    %c0_38 = arith.constant 0 : index
    %c0_39 = arith.constant 0 : index
    %53 = vector.load %arg1[%52, %c0_38, %c0_39] : memref<9x2x800xbf16, #tpu.memory_space<vmem>>, vector<1x2x800xbf16>
    %54 = vector.shape_cast %53 : vector<1x2x800xbf16> to vector<2x800xbf16>
    %cst_40 = arith.constant dense<0.000000e+00> : vector<2x64xf32>
    %55 = tpu.matmul %54, %2, %cst_40 {dimension_numbers = #tpu.dot_dimension_numbers<[1], [0], [0], [1], [0, 0, 1, 1], [], []>} : vector<2x800xbf16>, vector<800x64xbf16>, vector<2x64xf32> -> vector<2x64xf32>
    %56 = vector.broadcast %3 : vector<1x64xf32> to vector<2x64xf32>
    %57 = arith.addf %55, %56 : vector<2x64xf32>
    %cst_41 = arith.constant 0.000000e+00 : f32
    %58 = vector.broadcast %cst_41 : f32 to vector<2x64xf32>
    %59 = arith.maximumf %57, %58 : vector<2x64xf32>
    %60 = arith.truncf %59 : vector<2x64xf32> to vector<2x64xbf16>
    %c0_42 = arith.constant 0 : index
    %c0_43 = arith.constant 0 : index
    %61 = vector.load %arg11[%c0_42, %c0_43] : memref<2x128xf32, #tpu.memory_space<vmem>>, vector<2x128xf32>
    %62 = arith.index_cast %c3_i32 : i32 to index
    %c0_44 = arith.constant 0 : index
    %c0_45 = arith.constant 0 : index
    %63 = vector.load %arg4[%62, %c0_44, %c0_45] : memref<9x64x128xbf16, #tpu.memory_space<vmem>>, vector<1x64x128xbf16>
    %64 = vector.shape_cast %63 : vector<1x64x128xbf16> to vector<64x128xbf16>
    %cst_46 = arith.constant dense<0.000000e+00> : vector<2x128xf32>
    %65 = tpu.matmul %60, %64, %cst_46 {dimension_numbers = #tpu.dot_dimension_numbers<[1], [0], [0], [1], [0, 0, 1, 1], [], []>} : vector<2x64xbf16>, vector<64x128xbf16>, vector<2x128xf32> -> vector<2x128xf32>
    %66 = arith.addf %61, %65 : vector<2x128xf32>
    %c0_47 = arith.constant 0 : index
    %c0_48 = arith.constant 0 : index
    %67 = vector.load %arg11[%c0_47, %c0_48] : memref<2x128xf32, #tpu.memory_space<vmem>>, vector<2x128xf32>
    tpu.vector_store %arg11[%c0_47, %c0_48], %66 {strides = array<i32>} : memref<2x128xf32, #tpu.memory_space<vmem>>, vector<2x128xf32>,
    %c4_i32 = arith.constant 4 : i32
    %68 = arith.index_cast %c4_i32 : i32 to index
    %c0_49 = arith.constant 0 : index
    %c0_50 = arith.constant 0 : index
    %69 = vector.load %arg1[%68, %c0_49, %c0_50] : memref<9x2x800xbf16, #tpu.memory_space<vmem>>, vector<1x2x800xbf16>
    %70 = vector.shape_cast %69 : vector<1x2x800xbf16> to vector<2x800xbf16>
    %cst_51 = arith.constant dense<0.000000e+00> : vector<2x64xf32>
    %71 = tpu.matmul %70, %2, %cst_51 {dimension_numbers = #tpu.dot_dimension_numbers<[1], [0], [0], [1], [0, 0, 1, 1], [], []>} : vector<2x800xbf16>, vector<800x64xbf16>, vector<2x64xf32> -> vector<2x64xf32>
    %72 = vector.broadcast %3 : vector<1x64xf32> to vector<2x64xf32>
    %73 = arith.addf %71, %72 : vector<2x64xf32>
    %cst_52 = arith.constant 0.000000e+00 : f32
    %74 = vector.broadcast %cst_52 : f32 to vector<2x64xf32>
    %75 = arith.maximumf %73, %74 : vector<2x64xf32>
    %76 = arith.truncf %75 : vector<2x64xf32> to vector<2x64xbf16>
    %c0_53 = arith.constant 0 : index
    %c0_54 = arith.constant 0 : index
    %77 = vector.load %arg11[%c0_53, %c0_54] : memref<2x128xf32, #tpu.memory_space<vmem>>, vector<2x128xf32>
    %78 = arith.index_cast %c4_i32 : i32 to index
    %c0_55 = arith.constant 0 : index
    %c0_56 = arith.constant 0 : index
    %79 = vector.load %arg4[%78, %c0_55, %c0_56] : memref<9x64x128xbf16, #tpu.memory_space<vmem>>, vector<1x64x128xbf16>
    %80 = vector.shape_cast %79 : vector<1x64x128xbf16> to vector<64x128xbf16>
    %cst_57 = arith.constant dense<0.000000e+00> : vector<2x128xf32>
    %81 = tpu.matmul %76, %80, %cst_57 {dimension_numbers = #tpu.dot_dimension_numbers<[1], [0], [0], [1], [0, 0, 1, 1], [], []>} : vector<2x64xbf16>, vector<64x128xbf16>, vector<2x128xf32> -> vector<2x128xf32>
    %82 = arith.addf %77, %81 : vector<2x128xf32>
    %c0_58 = arith.constant 0 : index
    %c0_59 = arith.constant 0 : index
    %83 = vector.load %arg11[%c0_58, %c0_59] : memref<2x128xf32, #tpu.memory_space<vmem>>, vector<2x128xf32>
    tpu.vector_store %arg11[%c0_58, %c0_59], %82 {strides = array<i32>} : memref<2x128xf32, #tpu.memory_space<vmem>>, vector<2x128xf32>,
    %c5_i32 = arith.constant 5 : i32
    %84 = arith.index_cast %c5_i32 : i32 to index
    %c0_60 = arith.constant 0 : index
    %c0_61 = arith.constant 0 : index
    %85 = vector.load %arg1[%84, %c0_60, %c0_61] : memref<9x2x800xbf16, #tpu.memory_space<vmem>>, vector<1x2x800xbf16>
    %86 = vector.shape_cast %85 : vector<1x2x800xbf16> to vector<2x800xbf16>
    %cst_62 = arith.constant dense<0.000000e+00> : vector<2x64xf32>
    %87 = tpu.matmul %86, %2, %cst_62 {dimension_numbers = #tpu.dot_dimension_numbers<[1], [0], [0], [1], [0, 0, 1, 1], [], []>} : vector<2x800xbf16>, vector<800x64xbf16>, vector<2x64xf32> -> vector<2x64xf32>
    %88 = vector.broadcast %3 : vector<1x64xf32> to vector<2x64xf32>
    %89 = arith.addf %87, %88 : vector<2x64xf32>
    %cst_63 = arith.constant 0.000000e+00 : f32
    %90 = vector.broadcast %cst_63 : f32 to vector<2x64xf32>
    %91 = arith.maximumf %89, %90 : vector<2x64xf32>
    %92 = arith.truncf %91 : vector<2x64xf32> to vector<2x64xbf16>
    %c0_64 = arith.constant 0 : index
    %c0_65 = arith.constant 0 : index
    %93 = vector.load %arg11[%c0_64, %c0_65] : memref<2x128xf32, #tpu.memory_space<vmem>>, vector<2x128xf32>
    %94 = arith.index_cast %c5_i32 : i32 to index
    %c0_66 = arith.constant 0 : index
    %c0_67 = arith.constant 0 : index
    %95 = vector.load %arg4[%94, %c0_66, %c0_67] : memref<9x64x128xbf16, #tpu.memory_space<vmem>>, vector<1x64x128xbf16>
    %96 = vector.shape_cast %95 : vector<1x64x128xbf16> to vector<64x128xbf16>
    %cst_68 = arith.constant dense<0.000000e+00> : vector<2x128xf32>
    %97 = tpu.matmul %92, %96, %cst_68 {dimension_numbers = #tpu.dot_dimension_numbers<[1], [0], [0], [1], [0, 0, 1, 1], [], []>} : vector<2x64xbf16>, vector<64x128xbf16>, vector<2x128xf32> -> vector<2x128xf32>
    %98 = arith.addf %93, %97 : vector<2x128xf32>
    %c0_69 = arith.constant 0 : index
    %c0_70 = arith.constant 0 : index
    %99 = vector.load %arg11[%c0_69, %c0_70] : memref<2x128xf32, #tpu.memory_space<vmem>>, vector<2x128xf32>
    tpu.vector_store %arg11[%c0_69, %c0_70], %98 {strides = array<i32>} : memref<2x128xf32, #tpu.memory_space<vmem>>, vector<2x128xf32>,
    %c6_i32 = arith.constant 6 : i32
    %100 = arith.index_cast %c6_i32 : i32 to index
    %c0_71 = arith.constant 0 : index
    %c0_72 = arith.constant 0 : index
    %101 = vector.load %arg1[%100, %c0_71, %c0_72] : memref<9x2x800xbf16, #tpu.memory_space<vmem>>, vector<1x2x800xbf16>
    %102 = vector.shape_cast %101 : vector<1x2x800xbf16> to vector<2x800xbf16>
    %cst_73 = arith.constant dense<0.000000e+00> : vector<2x64xf32>
    %103 = tpu.matmul %102, %2, %cst_73 {dimension_numbers = #tpu.dot_dimension_numbers<[1], [0], [0], [1], [0, 0, 1, 1], [], []>} : vector<2x800xbf16>, vector<800x64xbf16>, vector<2x64xf32> -> vector<2x64xf32>
    %104 = vector.broadcast %3 : vector<1x64xf32> to vector<2x64xf32>
    %105 = arith.addf %103, %104 : vector<2x64xf32>
    %cst_74 = arith.constant 0.000000e+00 : f32
    %106 = vector.broadcast %cst_74 : f32 to vector<2x64xf32>
    %107 = arith.maximumf %105, %106 : vector<2x64xf32>
    %108 = arith.truncf %107 : vector<2x64xf32> to vector<2x64xbf16>
    %c0_75 = arith.constant 0 : index
    %c0_76 = arith.constant 0 : index
    %109 = vector.load %arg11[%c0_75, %c0_76] : memref<2x128xf32, #tpu.memory_space<vmem>>, vector<2x128xf32>
    %110 = arith.index_cast %c6_i32 : i32 to index
    %c0_77 = arith.constant 0 : index
    %c0_78 = arith.constant 0 : index
    %111 = vector.load %arg4[%110, %c0_77, %c0_78] : memref<9x64x128xbf16, #tpu.memory_space<vmem>>, vector<1x64x128xbf16>
    %112 = vector.shape_cast %111 : vector<1x64x128xbf16> to vector<64x128xbf16>
    %cst_79 = arith.constant dense<0.000000e+00> : vector<2x128xf32>
    %113 = tpu.matmul %108, %112, %cst_79 {dimension_numbers = #tpu.dot_dimension_numbers<[1], [0], [0], [1], [0, 0, 1, 1], [], []>} : vector<2x64xbf16>, vector<64x128xbf16>, vector<2x128xf32> -> vector<2x128xf32>
    %114 = arith.addf %109, %113 : vector<2x128xf32>
    %c0_80 = arith.constant 0 : index
    %c0_81 = arith.constant 0 : index
    %115 = vector.load %arg11[%c0_80, %c0_81] : memref<2x128xf32, #tpu.memory_space<vmem>>, vector<2x128xf32>
    tpu.vector_store %arg11[%c0_80, %c0_81], %114 {strides = array<i32>} : memref<2x128xf32, #tpu.memory_space<vmem>>, vector<2x128xf32>,
    %c7_i32 = arith.constant 7 : i32
    %116 = arith.index_cast %c7_i32 : i32 to index
    %c0_82 = arith.constant 0 : index
    %c0_83 = arith.constant 0 : index
    %117 = vector.load %arg1[%116, %c0_82, %c0_83] : memref<9x2x800xbf16, #tpu.memory_space<vmem>>, vector<1x2x800xbf16>
    %118 = vector.shape_cast %117 : vector<1x2x800xbf16> to vector<2x800xbf16>
    %cst_84 = arith.constant dense<0.000000e+00> : vector<2x64xf32>
    %119 = tpu.matmul %118, %2, %cst_84 {dimension_numbers = #tpu.dot_dimension_numbers<[1], [0], [0], [1], [0, 0, 1, 1], [], []>} : vector<2x800xbf16>, vector<800x64xbf16>, vector<2x64xf32> -> vector<2x64xf32>
    %120 = vector.broadcast %3 : vector<1x64xf32> to vector<2x64xf32>
    %121 = arith.addf %119, %120 : vector<2x64xf32>
    %cst_85 = arith.constant 0.000000e+00 : f32
    %122 = vector.broadcast %cst_85 : f32 to vector<2x64xf32>
    %123 = arith.maximumf %121, %122 : vector<2x64xf32>
    %124 = arith.truncf %123 : vector<2x64xf32> to vector<2x64xbf16>
    %c0_86 = arith.constant 0 : index
    %c0_87 = arith.constant 0 : index
    %125 = vector.load %arg11[%c0_86, %c0_87] : memref<2x128xf32, #tpu.memory_space<vmem>>, vector<2x128xf32>
    %126 = arith.index_cast %c7_i32 : i32 to index
    %c0_88 = arith.constant 0 : index
    %c0_89 = arith.constant 0 : index
    %127 = vector.load %arg4[%126, %c0_88, %c0_89] : memref<9x64x128xbf16, #tpu.memory_space<vmem>>, vector<1x64x128xbf16>
    %128 = vector.shape_cast %127 : vector<1x64x128xbf16> to vector<64x128xbf16>
    %cst_90 = arith.constant dense<0.000000e+00> : vector<2x128xf32>
    %129 = tpu.matmul %124, %128, %cst_90 {dimension_numbers = #tpu.dot_dimension_numbers<[1], [0], [0], [1], [0, 0, 1, 1], [], []>} : vector<2x64xbf16>, vector<64x128xbf16>, vector<2x128xf32> -> vector<2x128xf32>
    %130 = arith.addf %125, %129 : vector<2x128xf32>
    %c0_91 = arith.constant 0 : index
    %c0_92 = arith.constant 0 : index
    %131 = vector.load %arg11[%c0_91, %c0_92] : memref<2x128xf32, #tpu.memory_space<vmem>>, vector<2x128xf32>
    tpu.vector_store %arg11[%c0_91, %c0_92], %130 {strides = array<i32>} : memref<2x128xf32, #tpu.memory_space<vmem>>, vector<2x128xf32>,
    %c8_i32 = arith.constant 8 : i32
    %132 = arith.index_cast %c8_i32 : i32 to index
    %c0_93 = arith.constant 0 : index
    %c0_94 = arith.constant 0 : index
    %133 = vector.load %arg1[%132, %c0_93, %c0_94] : memref<9x2x800xbf16, #tpu.memory_space<vmem>>, vector<1x2x800xbf16>
    %134 = vector.shape_cast %133 : vector<1x2x800xbf16> to vector<2x800xbf16>
    %cst_95 = arith.constant dense<0.000000e+00> : vector<2x64xf32>
    %135 = tpu.matmul %134, %2, %cst_95 {dimension_numbers = #tpu.dot_dimension_numbers<[1], [0], [0], [1], [0, 0, 1, 1], [], []>} : vector<2x800xbf16>, vector<800x64xbf16>, vector<2x64xf32> -> vector<2x64xf32>
    %136 = vector.broadcast %3 : vector<1x64xf32> to vector<2x64xf32>
    %137 = arith.addf %135, %136 : vector<2x64xf32>
    %cst_96 = arith.constant 0.000000e+00 : f32
    %138 = vector.broadcast %cst_96 : f32 to vector<2x64xf32>
    %139 = arith.maximumf %137, %138 : vector<2x64xf32>
    %140 = arith.truncf %139 : vector<2x64xf32> to vector<2x64xbf16>
    %c0_97 = arith.constant 0 : index
    %c0_98 = arith.constant 0 : index
    %141 = vector.load %arg11[%c0_97, %c0_98] : memref<2x128xf32, #tpu.memory_space<vmem>>, vector<2x128xf32>
    %142 = arith.index_cast %c8_i32 : i32 to index
    %c0_99 = arith.constant 0 : index
    %c0_100 = arith.constant 0 : index
    %143 = vector.load %arg4[%142, %c0_99, %c0_100] : memref<9x64x128xbf16, #tpu.memory_space<vmem>>, vector<1x64x128xbf16>
    %144 = vector.shape_cast %143 : vector<1x64x128xbf16> to vector<64x128xbf16>
    %cst_101 = arith.constant dense<0.000000e+00> : vector<2x128xf32>
    %145 = tpu.matmul %140, %144, %cst_101 {dimension_numbers = #tpu.dot_dimension_numbers<[1], [0], [0], [1], [0, 0, 1, 1], [], []>} : vector<2x64xbf16>, vector<64x128xbf16>, vector<2x128xf32> -> vector<2x128xf32>
    %146 = arith.addf %141, %145 : vector<2x128xf32>
    %c0_102 = arith.constant 0 : index
    %c0_103 = arith.constant 0 : index
    %147 = vector.load %arg11[%c0_102, %c0_103] : memref<2x128xf32, #tpu.memory_space<vmem>>, vector<2x128xf32>
    tpu.vector_store %arg11[%c0_102, %c0_103], %146 {strides = array<i32>} : memref<2x128xf32, #tpu.memory_space<vmem>>, vector<2x128xf32>,
    %c9_i32 = arith.constant 9 : i32
    %c0_104 = arith.constant 0 : index
    %c0_105 = arith.constant 0 : index
    %148 = vector.load %arg11[%c0_104, %c0_105] : memref<2x128xf32, #tpu.memory_space<vmem>>, vector<2x128xf32>
    %c0_106 = arith.constant 0 : index
    %c0_107 = arith.constant 0 : index
    %149 = vector.load %arg5[%c0_106, %c0_107] : memref<1x128xf32, #tpu.memory_space<vmem>>, vector<1x128xf32>
    %150 = vector.broadcast %149 : vector<1x128xf32> to vector<2x128xf32>
    %151 = arith.addf %148, %150 : vector<2x128xf32>
    %cst_108 = arith.constant 0.000000e+00 : f32
    %152 = vector.broadcast %cst_108 : f32 to vector<2x128xf32>
    %153 = arith.maximumf %151, %152 : vector<2x128xf32>
    %154 = arith.truncf %153 : vector<2x128xf32> to vector<2x128xbf16>
    %c0_109 = arith.constant 0 : index
    %c0_110 = arith.constant 0 : index
    %155 = vector.load %arg6[%c0_109, %c0_110] : memref<128x256xbf16, #tpu.memory_space<vmem>>, vector<128x256xbf16>
    %cst_111 = arith.constant dense<0.000000e+00> : vector<2x256xf32>
    %156 = tpu.matmul %154, %155, %cst_111 {dimension_numbers = #tpu.dot_dimension_numbers<[1], [0], [0], [1], [0, 0, 1, 1], [], []>} : vector<2x128xbf16>, vector<128x256xbf16>, vector<2x256xf32> -> vector<2x256xf32>
    %c0_112 = arith.constant 0 : index
    %c0_113 = arith.constant 0 : index
    %157 = vector.load %arg7[%c0_112, %c0_113] : memref<1x256xf32, #tpu.memory_space<vmem>>, vector<1x256xf32>
    %158 = vector.broadcast %157 : vector<1x256xf32> to vector<2x256xf32>
    %159 = arith.addf %156, %158 : vector<2x256xf32>
    %cst_114 = arith.constant 0.000000e+00 : f32
    %160 = vector.broadcast %cst_114 : f32 to vector<2x256xf32>
    %161 = arith.maximumf %159, %160 : vector<2x256xf32>
    %162 = arith.truncf %161 : vector<2x256xf32> to vector<2x256xbf16>
    %c0_115 = arith.constant 0 : index
    %c0_116 = arith.constant 0 : index
    %163 = vector.load %arg8[%c0_115, %c0_116] : memref<256x128xbf16, #tpu.memory_space<vmem>>, vector<256x128xbf16>
    %cst_117 = arith.constant dense<0.000000e+00> : vector<2x128xf32>
    %164 = tpu.matmul %162, %163, %cst_117 {dimension_numbers = #tpu.dot_dimension_numbers<[1], [0], [0], [1], [0, 0, 1, 1], [], []>} : vector<2x256xbf16>, vector<256x128xbf16>, vector<2x128xf32> -> vector<2x128xf32>
    %c0_118 = arith.constant 0 : index
    %c0_119 = arith.constant 0 : index
    %165 = vector.load %arg9[%c0_118, %c0_119] : memref<1x128xf32, #tpu.memory_space<vmem>>, vector<1x128xf32>
    %166 = vector.broadcast %165 : vector<1x128xf32> to vector<2x128xf32>
    %167 = arith.addf %164, %166 : vector<2x128xf32>
    %c0_120 = arith.constant 0 : index
    %c0_121 = arith.constant 0 : index
    %168 = vector.load %arg10[%c0_120, %c0_121] : memref<2x128xf32, #tpu.memory_space<vmem>>, vector<2x128xf32>
    tpu.vector_store %arg10[%c0_120, %c0_121], %167 {strides = array<i32>} : memref<2x128xf32, #tpu.memory_space<vmem>>, vector<2x128xf32>,
    return
  }
  func.func @transform_0(%arg0: i32) -> (i32, i32, i32) {
    %c0_i32 = arith.constant 0 : i32
    %c0_i32_0 = arith.constant 0 : i32
    %c0_i32_1 = arith.constant 0 : i32
    return %c0_i32, %arg0, %c0_i32_0 : i32, i32, i32
  }
  func.func @transform_1(%arg0: i32) -> (i32, i32) {
    %c0_i32 = arith.constant 0 : i32
    %c0_i32_0 = arith.constant 0 : i32
    %c0_i32_1 = arith.constant 0 : i32
    return %c0_i32, %c0_i32_0 : i32, i32
  }
  func.func @transform_2(%arg0: i32) -> (i32, i32) {
    %c0_i32 = arith.constant 0 : i32
    %c0_i32_0 = arith.constant 0 : i32
    %c0_i32_1 = arith.constant 0 : i32
    return %c0_i32, %c0_i32_0 : i32, i32
  }
  func.func @transform_3(%arg0: i32) -> (i32, i32, i32) {
    %c0_i32 = arith.constant 0 : i32
    %c0_i32_0 = arith.constant 0 : i32
    %c0_i32_1 = arith.constant 0 : i32
    %c0_i32_2 = arith.constant 0 : i32
    return %c0_i32, %c0_i32_0, %c0_i32_1 : i32, i32, i32
  }
  func.func @transform_4(%arg0: i32) -> (i32, i32) {
    %c0_i32 = arith.constant 0 : i32
    %c0_i32_0 = arith.constant 0 : i32
    %c0_i32_1 = arith.constant 0 : i32
    return %c0_i32, %c0_i32_0 : i32, i32
  }
  func.func @transform_5(%arg0: i32) -> (i32, i32) {
    %c0_i32 = arith.constant 0 : i32
    %c0_i32_0 = arith.constant 0 : i32
    %c0_i32_1 = arith.constant 0 : i32
    return %c0_i32, %c0_i32_0 : i32, i32
  }
  func.func @transform_6(%arg0: i32) -> (i32, i32) {
    %c0_i32 = arith.constant 0 : i32
    %c0_i32_0 = arith.constant 0 : i32
    %c0_i32_1 = arith.constant 0 : i32
    return %c0_i32, %c0_i32_0 : i32, i32
  }
  func.func @transform_7(%arg0: i32) -> (i32, i32) {
    %c0_i32 = arith.constant 0 : i32
    %c0_i32_0 = arith.constant 0 : i32
    %c0_i32_1 = arith.constant 0 : i32
    return %c0_i32, %c0_i32_0 : i32, i32
  }
  func.func @transform_8(%arg0: i32) -> (i32, i32) {
    %c0_i32 = arith.constant 0 : i32
    %c0_i32_0 = arith.constant 0 : i32
    %c0_i32_1 = arith.constant 0 : i32
    return %c0_i32, %c0_i32_0 : i32, i32
  }
  func.func @transform_9(%arg0: i32) -> (i32, i32) {
    %c0_i32 = arith.constant 0 : i32
    %c0_i32_0 = arith.constant 0 : i32
    return %arg0, %c0_i32 : i32, i32
  }
}

</mosaic_0001>

<bundles_post_ra>
// kernel: dueling_network_forward.2
= control target key start
LH: loop header
LB: loop body
LE: loop exit
PB: predicated region body
PF: predicated region fallthrough
CT: control target
= control target key end

     0   :  { %s1032_s12 = smov 0   ;;  %s1201_s0 = inlined_call_operand.vmem [shape: bf16[512,128], index: 0, kind: input, shape index: {}]   ;;  %s1202_s1 = inlined_call_operand.vmem [shape: bf16[128,32], index: 1, kind: input, shape index: {}]   ;;  %s1203_s2 = inlined_call_operand.vmem [shape: f32[1,32], index: 2, kind: input, shape index: {}]   ;;  %s1204_s3 = inlined_call_operand.vmem [shape: bf16[512,32], index: 3, kind: output, shape index: {}]  }
   0x1 LB: > { %s784_s13 = sadd.s32 4294967295, %s1010_s12   ;;  %p788_p0 = scmp.ge.s32.totalorder %s1010_s12, 1  ;;  %s1010_s12 = sphi %s1032_s12, %s13_s12  }
   0x2   : > { %p138_p1 = scmp.lt.s32.totalorder %s1010_s12, 3 }
   0x4   : > { %p139_p2 = pnand %p788_p0, %p138_p1 }
   0x5   : > { %s789_s16 = sshll.u32 (!%p139_p2), %s784_s13, 5 }
   0x6   : > { %142 = sbr.rel (%p139_p2) target bundleno = 275 (0x113), region = 32  ;;  %p163_p3 = scmp.lt.s32.totalorder (!%p139_p2), %s789_s16, 63 }
   0xb   : > { %v980_v0 = vld [vmem:[%s1202_s1 + $0x38] sm:$0xff]   ;;  %v981_v1 = vld [vmem:[%s1202_s1 + $0x30] sm:$0xff]   ;;  %s1206_s16 = smov (!%p163_p3, %s789_s16), 63  ;;  %v982_v2 = vld [vmem:[%s1202_s1 + $0x28] sm:$0xff]   ;;  %vm695_vm0 = vcmask 257024  }
   0xc   : > { %908 = vmatprep.subr.bf16.mxu0 %v980_v0  ;;  %956 = vmatprep.subr.bf16.mxu1 %v980_v0  ;;  %s790_s21 = sshll.u32 %s1206_s16, 2  ;;  %v983_v3 = vld [vmem:[%s1202_s1 + $0x20] sm:$0xff]   ;;  %v984_v6 = vld [vmem:[%s1202_s1 + $0x18] sm:$0xff]   ;;  %v985_v7 = vld [vmem:[%s1202_s1 + $0x10] sm:$0xff]  }
   0xd   : > { %909 = vmatpush3.bf16.msra.mxu0 %v980_v0  ;;  %964 = vmatpush3.bf16.msra.mxu1 %v980_v0  ;;  %s1057_s24 = scalar_lea.vmem %s1201_s0, %s790_s21  ;;  %v986_v8 = vld [vmem:[%s1202_s1 + $0x8] sm:$0xff]   ;;  %v987_v9 = vld [vmem:[%s1202_s1] sm:$0xff]   ;;  %s1104_s13 = scalar_lea.vmem %s1204_s3, %s790_s21 }
   0xe   : > { %910 = vmatprep.subr.bf16.mxu0 %v981_v1  ;;  %957 = vmatprep.subr.bf16.mxu1 %v981_v1  ;;  %v988_v4 = vld [vmem:[%s1057_s24] sm:$0xff]   ;;  %v990_v10 = vld [vmem:[%s1057_s24 + $0x8] sm:$0xff]   ;;  %v992_v12 = vld [vmem:[%s1057_s24 + $0x10] sm:$0xff]  }
   0xf   : > { %v989_v5 = vld [vmem:[%s1057_s24 + $0x40] sm:$0xff]   ;;  %924 = vmatprep.mubr.bf16.mxu0 %v988_v4  ;;  %v991_v11 = vld [vmem:[%s1057_s24 + $0x48] sm:$0xff]   ;;  %v993_v13 = vld [vmem:[%s1057_s24 + $0x50] sm:$0xff]  }
  0x10   : > { %940 = vmatprep.mubr.bf16.mxu1 %v989_v5  ;;  %v994_v14 = vld [vmem:[%s1057_s24 + $0x18] sm:$0xff]   ;;  %v996_v16 = vld [vmem:[%s1057_s24 + $0x20] sm:$0xff]   ;;  %v998_v18 = vld [vmem:[%s1057_s24 + $0x28] sm:$0xff]  }
  0x11   : > { %911 = vmatpush3.bf16.msra.mxu0 %v981_v1  ;;  %965 = vmatpush3.bf16.msra.mxu1 %v981_v1  ;;  %v995_v15 = vld [vmem:[%s1057_s24 + $0x58] sm:$0xff]   ;;  %v997_v17 = vld [vmem:[%s1057_s24 + $0x60] sm:$0xff]   ;;  %v999_v19 = vld [vmem:[%s1057_s24 + $0x68] sm:$0xff]  }
  0x12   : > { %912 = vmatprep.subr.bf16.mxu0 %v982_v2  ;;  %958 = vmatprep.subr.bf16.mxu1 %v982_v2  ;;  %v1000_v20 = vld [vmem:[%s1057_s24 + $0x30] sm:$0xff]   ;;  %v1002_v22 = vld [vmem:[%s1057_s24 + $0x38] sm:$0xff]   ;;  %v1093_v24 = vld [vmem:[%s1203_s2] ss:$0 sm:$0xff] }
  0x13   : > { %v1001_v21 = vld [vmem:[%s1057_s24 + $0x70] sm:$0xff]   ;;  %v1003_v23 = vld [vmem:[%s1057_s24 + $0x78] sm:$0xff]  }
  0x15   : > { %913 = vmatpush3.bf16.msra.mxu0 %v982_v2  ;;  %966 = vmatpush3.bf16.msra.mxu1 %v982_v2 }
  0x16   : > { %914 = vmatprep.subr.bf16.mxu0 %v983_v3  ;;  %959 = vmatprep.subr.bf16.mxu1 %v983_v3 }
  0x19   : > { %915 = vmatpush3.bf16.msra.mxu0 %v983_v3  ;;  %967 = vmatpush3.bf16.msra.mxu1 %v983_v3 }
  0x1a   : > { %916 = vmatprep.subr.bf16.mxu0 %v984_v6  ;;  %960 = vmatprep.subr.bf16.mxu1 %v984_v6 }
  0x1d   : > { %917 = vmatpush3.bf16.msra.mxu0 %v984_v6  ;;  %968 = vmatpush3.bf16.msra.mxu1 %v984_v6 }
  0x1e   : > { %918 = vmatprep.subr.bf16.mxu0 %v985_v7  ;;  %961 = vmatprep.subr.bf16.mxu1 %v985_v7 }
  0x21   : > { %919 = vmatpush3.bf16.msra.mxu0 %v985_v7  ;;  %969 = vmatpush3.bf16.msra.mxu1 %v985_v7 }
  0x22   : > { %920 = vmatprep.subr.bf16.mxu0 %v986_v8  ;;  %962 = vmatprep.subr.bf16.mxu1 %v986_v8 }
  0x25   : > { %921 = vmatpush3.bf16.msra.mxu0 %v986_v8  ;;  %970 = vmatpush3.bf16.msra.mxu1 %v986_v8 }
  0x26   : > { %922 = vmatprep.subr.bf16.mxu0 %v987_v9  ;;  %963 = vmatprep.subr.bf16.mxu1 %v987_v9 }
  0x29   : > { %923 = vmatpush3.bf16.msra.mxu0 %v987_v9  ;;  %971 = vmatpush3.bf16.msra.mxu1 %v987_v9 }
  0x2c   : > { %925 = vmatmul.mubr.bf16.vlgmr.msra.gmra.mxu0 %v990_v10  ;;  %941 = vmatmul.mubr.bf16.vlgmr.msra.gmra.mxu1 %v991_v11 }
  0x2d   : > { %928 = vmatprep.mubr.bf16.mxu0 %v992_v12  ;;  %944 = vmatprep.mubr.bf16.mxu1 %v993_v13 }
  0x34   : > { %929 = vmatmul.mubr.bf16.gmra.mxu0 %v994_v14  ;;  %945 = vmatmul.mubr.bf16.gmra.mxu1 %v995_v15 }
  0x35   : > { %932 = vmatprep.mubr.bf16.mxu0 %v996_v16  ;;  %948 = vmatprep.mubr.bf16.mxu1 %v997_v17 }
  0x3c   : > { %933 = vmatmul.mubr.bf16.gmra.mxu0 %v998_v18  ;;  %949 = vmatmul.mubr.bf16.gmra.mxu1 %v999_v19 }
  0x3d   : > { %936 = vmatprep.mubr.bf16.mxu0 %v1000_v20  ;;  %952 = vmatprep.mubr.bf16.mxu1 %v1001_v21 }
  0x44   : > { %937 = vmatmul.mubr.bf16.gmra.mxu0 %v1002_v22  ;;  %953 = vmatmul.mubr.bf16.gmra.mxu1 %v1003_v23 }
  0xec   : > { %v926_v25 = vpop.f32.mrf.mxu0  ;;  %v942_v26 = vpop.f32.mrf.mxu1 }
  0xed   : > { %v417_v27 = vadd.f32 %v926_v25, %v1093_v24  ;;  %v481_v28 = vadd.f32 %v942_v26, %v1093_v24 }
  0xee   : > { %v408_v29 = vpop.f32.mrf.mxu0  ;;  %v472_v30 = vpop.f32.mrf.mxu1 }
  0xef   : > { %v537_v31 = vmax.f32 %v417_v27, 0.0  ;;  %v553_v32 = vmax.f32 %v481_v28, 0.0  ;;  %v409_v33 = vadd.f32 %v1093_v24, %v408_v29  ;;  %v473_v34 = vadd.f32 %v1093_v24, %v472_v30 }
  0xf0   : > { %v927_v35 = vpop.f32.mrf.mxu0  ;;  %v943_v36 = vpop.f32.mrf.mxu1 }
  0xf1   : > { %v854_v37 = vpack.c.bf16 %v537_v31, %v537_v31  ;;  %v870_v38 = vpack.c.bf16 %v553_v32, %v553_v32  ;;  %v535_v39 = vmax.f32 %v409_v33, 0.0  ;;  %v551_v40 = vmax.f32 %v473_v34, 0.0 }
  0xf2   : > { %v420_v41 = vadd.f32 %v927_v35, %v1093_v24  ;;  %v484_v42 = vadd.f32 %v943_v36, %v1093_v24  ;;  %v411_v43 = vpop.f32.mrf.mxu0  ;;  %v475_v44 = vpop.f32.mrf.mxu1 }
  0xf3   : > { %698 = vst.msk [vmem:[%s1104_s13 + $0x8] sm:$0xf] %vm695_vm0, %v854_v37  ;;  %714 = vst.msk [vmem:[%s1104_s13 + $0x48] sm:$0xf] %vm695_vm0, %v870_v38  ;;  %v852_v45 = vpack.c.bf16 %v535_v39, %v535_v39  ;;  %v868_v46 = vpack.c.bf16 %v551_v40, %v551_v40  ;;  %v412_v47 = vadd.f32 %v1093_v24, %v411_v43 }
  0xf4   : > { %v476_v48 = vadd.f32 %v1093_v24, %v475_v44  ;;  %v538_v49 = vmax.f32 %v420_v41, 0.0  ;;  %v554_v50 = vmax.f32 %v484_v42, 0.0  ;;  %v930_v51 = vpop.f32.mrf.mxu0  ;;  %v946_v52 = vpop.f32.mrf.mxu1 }
  0xf5   : > { %696 = vst.msk [vmem:[%s1104_s13] sm:$0xf] %vm695_vm0, %v852_v45  ;;  %712 = vst.msk [vmem:[%s1104_s13 + $0x40] sm:$0xf] %vm695_vm0, %v868_v46  ;;  %v536_v53 = vmax.f32 %v412_v47, 0.0  ;;  %v433_v55 = vadd.f32 %v930_v51, %v1093_v24  ;;  %v497_v56 = vadd.f32 %v946_v52, %v1093_v24 }
  0xf6   : > { %v552_v54 = vmax.f32 %v476_v48, 0.0  ;;  %v855_v57 = vpack.c.bf16 %v538_v49, %v538_v49  ;;  %v871_v58 = vpack.c.bf16 %v554_v50, %v554_v50  ;;  %v424_v59 = vpop.f32.mrf.mxu0  ;;  %v488_v60 = vpop.f32.mrf.mxu1 }
  0xf7   : > { %v853_v61 = vpack.c.bf16 %v536_v53, %v536_v53  ;;  %v541_v63 = vmax.f32 %v433_v55, 0.0  ;;  %v557_v0 = vmax.f32 %v497_v56, 0.0  ;;  %v425_v1 = vadd.f32 %v1093_v24, %v424_v59 }
  0xf8   : > { %v869_v62 = vpack.c.bf16 %v552_v54, %v552_v54  ;;  %699 = vst.msk [vmem:[%s1104_s13 + $0xc] sm:$0xf] %vm695_vm0, %v855_v57  ;;  %715 = vst.msk [vmem:[%s1104_s13 + $0x4c] sm:$0xf] %vm695_vm0, %v871_v58  ;;  %v489_v2 = vadd.f32 %v1093_v24, %v488_v60  ;;  %v931_v3 = vpop.f32.mrf.mxu0  ;;  %v947_v4 = vpop.f32.mrf.mxu1 }
  0xf9   : > { %697 = vst.msk [vmem:[%s1104_s13 + $0x4] sm:$0xf] %vm695_vm0, %v853_v61  ;;  %v858_v5 = vpack.c.bf16 %v541_v63, %v541_v63  ;;  %v874_v6 = vpack.c.bf16 %v557_v0, %v557_v0  ;;  %v436_v7 = vadd.f32 %v931_v3, %v1093_v24  ;;  %v500_v8 = vadd.f32 %v947_v4, %v1093_v24 }
  0xfa   : > { %713 = vst.msk [vmem:[%s1104_s13 + $0x44] sm:$0xf] %vm695_vm0, %v869_v62  ;;  %v539_v9 = vmax.f32 %v425_v1, 0.0  ;;  %v555_v10 = vmax.f32 %v489_v2, 0.0  ;;  %v427_v11 = vpop.f32.mrf.mxu0  ;;  %v491_v12 = vpop.f32.mrf.mxu1 }
  0xfb   : > { %702 = vst.msk [vmem:[%s1104_s13 + $0x18] sm:$0xf] %vm695_vm0, %v858_v5  ;;  %718 = vst.msk [vmem:[%s1104_s13 + $0x58] sm:$0xf] %vm695_vm0, %v874_v6  ;;  %v542_v13 = vmax.f32 %v436_v7, 0.0  ;;  %v558_v14 = vmax.f32 %v500_v8, 0.0  ;;  %v428_v15 = vadd.f32 %v1093_v24, %v427_v11  ;;  %v492_v16 = vadd.f32 %v1093_v24, %v491_v12 }
  0xfc   : > { %v856_v17 = vpack.c.bf16 %v539_v9, %v539_v9  ;;  %v872_v18 = vpack.c.bf16 %v555_v10, %v555_v10  ;;  %v934_v19 = vpop.f32.mrf.mxu0  ;;  %v950_v20 = vpop.f32.mrf.mxu1 }
  0xfd   : > { %v859_v21 = vpack.c.bf16 %v542_v13, %v542_v13  ;;  %v875_v22 = vpack.c.bf16 %v558_v14, %v558_v14  ;;  %v540_v23 = vmax.f32 %v428_v15, 0.0  ;;  %v556_v25 = vmax.f32 %v492_v16, 0.0 }
  0xfe   : > { %700 = vst.msk [vmem:[%s1104_s13 + $0x10] sm:$0xf] %vm695_vm0, %v856_v17  ;;  %716 = vst.msk [vmem:[%s1104_s13 + $0x50] sm:$0xf] %vm695_vm0, %v872_v18  ;;  %v449_v26 = vadd.f32 %v934_v19, %v1093_v24  ;;  %v513_v27 = vadd.f32 %v950_v20, %v1093_v24  ;;  %v440_v28 = vpop.f32.mrf.mxu0  ;;  %v504_v29 = vpop.f32.mrf.mxu1 }
  0xff   : > { %703 = vst.msk [vmem:[%s1104_s13 + $0x1c] sm:$0xf] %vm695_vm0, %v859_v21  ;;  %719 = vst.msk [vmem:[%s1104_s13 + $0x5c] sm:$0xf] %vm695_vm0, %v875_v22  ;;  %v857_v30 = vpack.c.bf16 %v540_v23, %v540_v23  ;;  %v873_v31 = vpack.c.bf16 %v556_v25, %v556_v25  ;;  %v441_v32 = vadd.f32 %v1093_v24, %v440_v28 }
 0x100   : > { %v505_v33 = vadd.f32 %v1093_v24, %v504_v29  ;;  %v545_v34 = vmax.f32 %v449_v26, 0.0  ;;  %v561_v35 = vmax.f32 %v513_v27, 0.0  ;;  %v935_v36 = vpop.f32.mrf.mxu0  ;;  %v951_v37 = vpop.f32.mrf.mxu1 }
 0x101   : > { %701 = vst.msk [vmem:[%s1104_s13 + $0x14] sm:$0xf] %vm695_vm0, %v857_v30  ;;  %717 = vst.msk [vmem:[%s1104_s13 + $0x54] sm:$0xf] %vm695_vm0, %v873_v31  ;;  %v543_v38 = vmax.f32 %v441_v32, 0.0  ;;  %v452_v40 = vadd.f32 %v935_v36, %v1093_v24  ;;  %v516_v41 = vadd.f32 %v951_v37, %v1093_v24 }
 0x102   : > { %v559_v39 = vmax.f32 %v505_v33, 0.0  ;;  %v862_v42 = vpack.c.bf16 %v545_v34, %v545_v34  ;;  %v878_v43 = vpack.c.bf16 %v561_v35, %v561_v35  ;;  %v443_v44 = vpop.f32.mrf.mxu0  ;;  %v507_v45 = vpop.f32.mrf.mxu1 }
 0x103   : > { %v860_v46 = vpack.c.bf16 %v543_v38, %v543_v38  ;;  %v546_v48 = vmax.f32 %v452_v40, 0.0  ;;  %v562_v49 = vmax.f32 %v516_v41, 0.0  ;;  %v444_v50 = vadd.f32 %v1093_v24, %v443_v44 }
 0x104   : > { %v876_v47 = vpack.c.bf16 %v559_v39, %v559_v39  ;;  %706 = vst.msk [vmem:[%s1104_s13 + $0x28] sm:$0xf] %vm695_vm0, %v862_v42  ;;  %722 = vst.msk [vmem:[%s1104_s13 + $0x68] sm:$0xf] %vm695_vm0, %v878_v43  ;;  %v508_v51 = vadd.f32 %v1093_v24, %v507_v45  ;;  %v938_v52 = vpop.f32.mrf.mxu0  ;;  %v954_v53 = vpop.f32.mrf.mxu1 }
 0x105   : > { %704 = vst.msk [vmem:[%s1104_s13 + $0x20] sm:$0xf] %vm695_vm0, %v860_v46  ;;  %v863_v54 = vpack.c.bf16 %v546_v48, %v546_v48  ;;  %v879_v55 = vpack.c.bf16 %v562_v49, %v562_v49  ;;  %v465_v56 = vadd.f32 %v938_v52, %v1093_v24  ;;  %v529_v57 = vadd.f32 %v954_v53, %v1093_v24 }
 0x106   : > { %720 = vst.msk [vmem:[%s1104_s13 + $0x60] sm:$0xf] %vm695_vm0, %v876_v47  ;;  %v544_v58 = vmax.f32 %v444_v50, 0.0  ;;  %v560_v59 = vmax.f32 %v508_v51, 0.0  ;;  %v456_v60 = vpop.f32.mrf.mxu0  ;;  %v520_v61 = vpop.f32.mrf.mxu1 }
 0x107   : > { %707 = vst.msk [vmem:[%s1104_s13 + $0x2c] sm:$0xf] %vm695_vm0, %v863_v54  ;;  %723 = vst.msk [vmem:[%s1104_s13 + $0x6c] sm:$0xf] %vm695_vm0, %v879_v55  ;;  %v549_v62 = vmax.f32 %v465_v56, 0.0  ;;  %v565_v63 = vmax.f32 %v529_v57, 0.0  ;;  %v457_v0 = vadd.f32 %v1093_v24, %v456_v60  ;;  %v521_v1 = vadd.f32 %v1093_v24, %v520_v61 }
 0x108   : > { %v861_v2 = vpack.c.bf16 %v544_v58, %v544_v58  ;;  %v877_v3 = vpack.c.bf16 %v560_v59, %v560_v59  ;;  %v939_v4 = vpop.f32.mrf.mxu0  ;;  %v955_v5 = vpop.f32.mrf.mxu1 }
 0x109   : > { %v866_v6 = vpack.c.bf16 %v549_v62, %v549_v62  ;;  %v882_v7 = vpack.c.bf16 %v565_v63, %v565_v63  ;;  %v547_v8 = vmax.f32 %v457_v0, 0.0  ;;  %v563_v9 = vmax.f32 %v521_v1, 0.0 }
 0x10a   : > { %705 = vst.msk [vmem:[%s1104_s13 + $0x24] sm:$0xf] %vm695_vm0, %v861_v2  ;;  %721 = vst.msk [vmem:[%s1104_s13 + $0x64] sm:$0xf] %vm695_vm0, %v877_v3  ;;  %v468_v10 = vadd.f32 %v939_v4, %v1093_v24  ;;  %v532_v11 = vadd.f32 %v955_v5, %v1093_v24  ;;  %v459_v12 = vpop.f32.mrf.mxu0  ;;  %v523_v13 = vpop.f32.mrf.mxu1 }
 0x10b   : > { %710 = vst.msk [vmem:[%s1104_s13 + $0x38] sm:$0xf] %vm695_vm0, %v866_v6  ;;  %726 = vst.msk [vmem:[%s1104_s13 + $0x78] sm:$0xf] %vm695_vm0, %v882_v7  ;;  %v864_v14 = vpack.c.bf16 %v547_v8, %v547_v8  ;;  %v880_v15 = vpack.c.bf16 %v563_v9, %v563_v9  ;;  %v460_v16 = vadd.f32 %v1093_v24, %v459_v12 }
 0x10c   : > { %v524_v17 = vadd.f32 %v1093_v24, %v523_v13  ;;  %v550_v18 = vmax.f32 %v468_v10, 0.0  ;;  %v566_v19 = vmax.f32 %v532_v11, 0.0 }
 0x10d   : > { %708 = vst.msk [vmem:[%s1104_s13 + $0x30] sm:$0xf] %vm695_vm0, %v864_v14  ;;  %724 = vst.msk [vmem:[%s1104_s13 + $0x70] sm:$0xf] %vm695_vm0, %v880_v15  ;;  %v548_v20 = vmax.f32 %v460_v16, 0.0 }
 0x10e   : > { %v564_v21 = vmax.f32 %v524_v17, 0.0  ;;  %v867_v22 = vpack.c.bf16 %v550_v18, %v550_v18  ;;  %v883_v23 = vpack.c.bf16 %v566_v19, %v566_v19 }
 0x10f   : > { %v865_v25 = vpack.c.bf16 %v548_v20, %v548_v20 }
 0x110   : > { %v881_v26 = vpack.c.bf16 %v564_v21, %v564_v21  ;;  %711 = vst.msk [vmem:[%s1104_s13 + $0x3c] sm:$0xf] %vm695_vm0, %v867_v22  ;;  %727 = vst.msk [vmem:[%s1104_s13 + $0x7c] sm:$0xf] %vm695_vm0, %v883_v23 }
 0x111   : > { %709 = vst.msk [vmem:[%s1104_s13 + $0x34] sm:$0xf] %vm695_vm0, %v865_v25 }
 0x112   : > { %725 = vst.msk [vmem:[%s1104_s13 + $0x74] sm:$0xf] %vm695_vm0, %v881_v26 }
 0x113 PF: > { %s13_s12 = sadd.s32 1, %s1010_s12  }
 0x114   : > { %p10_p4 = scmp.ge.s32.totalorder %s13_s12, 4  }
 0x116   :  { %12 = sbr.rel (!%p10_p4) target bundleno = 1 (0x1), region = 62 }

// kernel: dueling_network_forward.3
= control target key start
LH: loop header
LB: loop body
LE: loop exit
PB: predicated region body
PF: predicated region fallthrough
CT: control target
= control target key end

     0   :  { %v6317_v1 = vmov 0.0   ;;  %v4784_v22 = vmov 1966171168   ;;  %v147_v24 = vlaneseq  ;;  %vm4785_vm0 = vmmov 0   ;;  %s6294_s1 = inlined_call_operand.vmem [shape: bf16[800,64], index: 1, kind: input, shape index: {}]   ;;  %s6295_s0 = inlined_call_operand.vmem [shape: bf16[9,2,800], index: 0, kind: input, shape index: {}]   ;;  %s6296_s3 = inlined_call_operand.vmem [shape: bf16[9,64,128], index: 3, kind: input, shape index: {}]   ;;  %s6297_s2 = inlined_call_operand.vmem [shape: f32[1,64], index: 2, kind: input, shape index: {}]   ;;  %s6298_s5 = inlined_call_operand.vmem [shape: bf16[128,256], index: 5, kind: input, shape index: {}]   ;;  %s6299_s7 = inlined_call_operand.vmem [shape: bf16[256,128], index: 7, kind: input, shape index: {}]   ;;  %s6300_s4 = inlined_call_operand.vmem [shape: f32[1,128], index: 4, kind: input, shape index: {}]   ;;  %s6301_s6 = inlined_call_operand.vmem [shape: f32[1,256], index: 6, kind: input, shape index: {}]   ;;  %s6302_s8 = inlined_call_operand.vmem [shape: f32[1,128], index: 8, kind: input, shape index: {}]   ;;  %s6303_s9 = inlined_call_operand.vmem [shape: f32[2,128], index: 9, kind: output, shape index: {}]  }
   0x1   :  { %v4840_v0 = vld [vmem:[%s6294_s1 + $0x78] sm:$0xff]   ;;  %33 = vst [vmem:[#allocation2] sm:$0x3] %v6317_v1  ;;  %v4864_v5 = vld [vmem:[%s6294_s1 + $0x70] sm:$0xff]   ;;  %v4888_v9 = vld [vmem:[%s6294_s1 + $0x68] sm:$0xff]   ;;  %v145_v23 = vunpack.c.l.s4 %v4784_v22  ;;  %vm497_vm1 = vcmask 261120  }
   0x2   :  { %6352 = vst [vmem:[#allocation3_spill] sm:$0xff] %v4840_v0  ;;  %v4846_v2 = vld [vmem:[%s6294_s1 + $0x38] sm:$0xff]   ;;  %3705 = vmatprep.subr.bf16.mxu0 %v4840_v0  ;;  %v4870_v6 = vld [vmem:[%s6294_s1 + $0x30] sm:$0xff]   ;;  %v4894_v10 = vld [vmem:[%s6294_s1 + $0x28] sm:$0xff]   ;;  %v4986_v30 = vshrl.u32 %v147_v24, 7  ;;  %vm696_vm2 = vcmask 523264  }
   0x3   :  { %v4852_v3 = vld [vmem:[%s6294_s1 + $0xf8] sm:$0xff]   ;;  %3706 = vmatpush3.bf16.msra.mxu0 %v4846_v2  ;;  %v4876_v7 = vld [vmem:[%s6294_s1 + $0xf0] sm:$0xff]   ;;  %v4900_v11 = vld [vmem:[%s6294_s1 + $0xe8] sm:$0xff]   ;;  %v146_v29 = vunpack.c.0.s8 %v145_v23 }
   0x4   :  { %v4858_v4 = vld [vmem:[%s6294_s1 + $0xb8] sm:$0xff]   ;;  %3727 = vmatprep.subr.bf16.mxu1 %v4852_v3  ;;  %3707 = vmatprep.subr.bf16.mxu0 %v4864_v5  ;;  %v4882_v8 = vld [vmem:[%s6294_s1 + $0xb0] sm:$0xff]   ;;  %v4906_v12 = vld [vmem:[%s6294_s1 + $0xa8] sm:$0xff]   ;;  %6357 = vst [vmem:[#allocation8_spill] sm:$0xff] %v4986_v30 }
   0x5   :  { %3728 = vmatpush3.bf16.msra.mxu1 %v4858_v4  ;;  %v4912_v13 = vld [vmem:[%s6294_s1 + $0x60] sm:$0xff]   ;;  %v4936_v17 = vld [vmem:[%s6294_s1 + $0x58] sm:$0xff]   ;;  %v4960_v21 = vld [vmem:[%s6294_s1 + $0x50] sm:$0xff]   ;;  %v5013_v35 = vsub.s32 %v146_v29, %v4986_v30 }
   0x6   :  { %3729 = vmatprep.subr.bf16.mxu1 %v4876_v7  ;;  %v4918_v14 = vld [vmem:[%s6294_s1 + $0x20] sm:$0xff]   ;;  %v4942_v18 = vld [vmem:[%s6294_s1 + $0x18] sm:$0xff]   ;;  %v4966_v25 = vld [vmem:[%s6294_s1 + $0x10] sm:$0xff]  }
   0x7   :  { %3708 = vmatpush3.bf16.msra.mxu0 %v4870_v6  ;;  %v4924_v15 = vld [vmem:[%s6294_s1 + $0xe0] sm:$0xff]   ;;  %v4948_v19 = vld [vmem:[%s6294_s1 + $0xd8] sm:$0xff]   ;;  %v4972_v26 = vld [vmem:[%s6294_s1 + $0xd0] sm:$0xff]  }
   0x8   :  { %3709 = vmatprep.subr.bf16.mxu0 %v4888_v9  ;;  %v4930_v16 = vld [vmem:[%s6294_s1 + $0xa0] sm:$0xff]   ;;  %6353 = vst [vmem:[#allocation4_spill] sm:$0xff] %v4948_v19  ;;  %v4954_v20 = vld [vmem:[%s6294_s1 + $0x98] sm:$0xff]   ;;  %6355 = vst [vmem:[#allocation6_spill] sm:$0xff] %v4972_v26 }
   0x9   :  { %3730 = vmatpush3.bf16.msra.mxu1 %v4882_v8  ;;  %6354 = vst [vmem:[#allocation5_spill] sm:$0xff] %v4954_v20  ;;  %v4978_v27 = vld [vmem:[%s6294_s1 + $0x90] sm:$0xff]   ;;  %v4984_v28 = vld [vmem:[%s6294_s1 + $0x48] sm:$0xff]   ;;  %v5010_v34 = vld [vmem:[%s6294_s1 + $0x40] sm:$0xff]  }
   0xa   :  { %3731 = vmatprep.subr.bf16.mxu1 %v4900_v11  ;;  %6356 = vst [vmem:[#allocation7_spill] sm:$0xff] %v4978_v27  ;;  %v4992_v31 = vld [vmem:[%s6294_s1 + $0x8] sm:$0xff]   ;;  %v5019_v36 = vld [vmem:[%s6294_s1] sm:$0xff]   ;;  %v5041_v42 = vld [vmem:[%s6294_s1 + $0x178] sm:$0xff]  }
   0xb   :  { %3710 = vmatpush3.bf16.msra.mxu0 %v4894_v10  ;;  %v4998_v32 = vld [vmem:[%s6294_s1 + $0xc8] sm:$0xff]   ;;  %v5025_v37 = vld [vmem:[%s6294_s1 + $0xc0] sm:$0xff]   ;;  %v5052_v47 = vld [vmem:[%s6294_s1 + $0x138] sm:$0xff]  }
   0xc   :  { %3711 = vmatprep.subr.bf16.mxu0 %v4912_v13  ;;  %6358 = vst [vmem:[#allocation9_spill] sm:$0xff] %v4998_v32  ;;  %v5004_v33 = vld [vmem:[%s6294_s1 + $0x88] sm:$0xff]   ;;  %6360 = vst [vmem:[#allocation11_spill] sm:$0xff] %v5025_v37  ;;  %v135_v38 = vld [vmem:[%s6295_s0] sm:$0x7f] }
   0xd   :  { %3732 = vmatpush3.bf16.msra.mxu1 %v4906_v12  ;;  %6359 = vst [vmem:[#allocation10_spill] sm:$0xff] %v5004_v33  ;;  %v143_v39 = vcombine.high %v135_v38, %v135_v38  ;;  %v150_v40 = vrot.slane %v135_v38, %v5013_v35  ;;  %v5036_v41 = vld [vmem:[%s6294_s1 + $0x80] sm:$0xff]   ;;  %v5057_v50 = vld [vmem:[%s6294_s1 + $0x170] sm:$0xff]   ;;  %v5070_v54 = vld [vmem:[%s6294_s1 + $0x168] sm:$0xff]  }
   0xe   :  { %3733 = vmatprep.subr.bf16.mxu1 %v4924_v15  ;;  %6361 = vst [vmem:[#allocation12_spill] sm:$0xff] %v5036_v41  ;;  %v5064_v53 = vld [vmem:[%s6294_s1 + $0x130] sm:$0xff]   ;;  %v5078_v55 = vld [vmem:[%s6294_s1 + $0x128] sm:$0xff]   ;;  %v5084_v56 = vld [vmem:[%s6294_s1 + $0x160] sm:$0xff]  }
   0xf   :  { %3712 = vmatpush3.bf16.msra.mxu0 %v4918_v14  ;;  %v158_v43 = vcombine.high %v150_v40, %v150_v40  ;;  %v166_v44 = vrot.slane %v150_v40, %v5013_v35  ;;  %v157_v45 = vrot.slane %v143_v39, %v5013_v35  ;;  %v5089_v57 = vld [vmem:[%s6294_s1 + $0x188] sm:$0xff]   ;;  %v5095_v58 = vld [vmem:[%s6294_s1 + $0x120] sm:$0xff]   ;;  %v5102_v60 = vld [vmem:[%s6294_s1 + $0x158] sm:$0xff]  }
  0x10   :  { %3713 = vmatprep.subr.bf16.mxu0 %v4936_v17  ;;  %6362 = vst [vmem:[#allocation13_spill] sm:$0xff] %v5089_v57  ;;  %v5109_v61 = vld [vmem:[%s6294_s1 + $0x180] sm:$0xff]   ;;  %v5115_v62 = vld [vmem:[%s6294_s1 + $0x118] sm:$0xff]   ;;  %v5121_v22 = vld [vmem:[%s6294_s1 + $0x150] sm:$0xff]  }
  0x11   :  { %3734 = vmatpush3.bf16.msra.mxu1 %v4930_v16  ;;  %v180_v46 = vrot.slane %v158_v43, %v5013_v35  ;;  %v159_v48 = vcombine.high %v157_v45, %v157_v45  ;;  %v188_v49 = vcombine.high %v166_v44, %v166_v44  ;;  %v173_v59 = vrot.slane %v157_v45, %v5013_v35  ;;  %v5129_v23 = vld [vmem:[%s6294_s1 + $0x110] sm:$0xff]   ;;  %v5136_v24 = vld [vmem:[%s6294_s1 + $0x148] sm:$0xff]   ;;  %v5150_v38 = vld [vmem:[%s6294_s1 + $0x140] sm:$0xff]  }
  0x12   :  { %3735 = vmatprep.subr.bf16.mxu1 %v4948_v19  ;;  %6363 = vst [vmem:[#allocation14_spill] sm:$0xff] %v5109_v61  ;;  %v5144_v29 = vld [vmem:[%s6294_s1 + $0x108] sm:$0xff]   ;;  %v5156_v39 = vld [vmem:[%s6294_s1 + $0x100] sm:$0xff]   ;;  %v4628_v40 = vld [vmem:[%s6296_s3 + $0x18] sm:$0xff]  }
  0x13   :  { %3714 = vmatpush3.bf16.msra.mxu0 %v4942_v18  ;;  %533 = vmatprep.mubr.bf16.mxu0 %v180_v46  ;;  %v190_v51 = vcombine.high %v180_v46, %v180_v46  ;;  %v187_v52 = vrot.slane %v159_v48, %v5013_v35  ;;  %v189_v63 = vcombine.high %v173_v59, %v173_v59  ;;  %v4629_v43 = vld [vmem:[%s6296_s3 + $0x10] sm:$0xff]   ;;  %v4631_v45 = vld [vmem:[%s6296_s3] sm:$0xff]  }
  0x14   :  { %3715 = vmatprep.subr.bf16.mxu0 %v4960_v21  ;;  %v3551_v46 = vld [vmem:[%s6295_s0 + $0x7] sm:$0x7f] }
  0x15   :  { %3736 = vmatpush3.bf16.msra.mxu1 %v4954_v20  ;;  %573 = vmatprep.mubr.bf16.mxu1 %v190_v51  ;;  %v752_v48 = vrot.slane %v3551_v46, %v5013_v35 }
  0x16   :  { %3737 = vmatprep.subr.bf16.mxu1 %v4972_v26 }
  0x17   :  { %3716 = vmatpush3.bf16.msra.mxu0 %v4966_v25 }
  0x18   :  { %3717 = vmatprep.subr.bf16.mxu0 %v4984_v28 }
  0x19   :  { %3738 = vmatpush3.bf16.msra.mxu1 %v4978_v27 }
  0x1a   :  { %3739 = vmatprep.subr.bf16.mxu1 %v4998_v32 }
  0x1b   :  { %3718 = vmatpush3.bf16.msra.mxu0 %v4992_v31 }
  0x1c   :  { %3719 = vmatprep.subr.bf16.mxu0 %v5010_v34 }
  0x1d   :  { %3740 = vmatpush3.bf16.msra.mxu1 %v5004_v33 }
  0x1e   :  { %3741 = vmatprep.subr.bf16.mxu1 %v5025_v37 }
  0x1f   :  { %3720 = vmatpush3.bf16.msra.mxu0 %v5019_v36 }
  0x20   :  { %3749 = vmatprep.subr.bf16.mxu0 %v5041_v42 }
  0x21   :  { %3742 = vmatpush3.bf16.msra.mxu1 %v5036_v41 }
  0x22   :  { %4393 = vmatprep.subr.bf16.mxu1 %v6317_v1  ;;  %534 = vmatmul.mubr.bf16.vlgmr.msra.gmra.mxu0 %v166_v44  ;;  %v4630_v44 = vld [vmem:[%s6296_s3 + $0x8] sm:$0xff]  }
  0x23   :  { %3750 = vmatpush3.bf16.msra.mxu0 %v5052_v47  ;;  %613 = vmatprep.mubr.bf16.mxu0 %v187_v52  ;;  %v5199_v52 = vrot.slane %v752_v48, %v5013_v35 }
  0x24   :  { %574 = vmatmul.mubr.bf16.vlgmr.msra.gmra.mxu1 %v188_v49  ;;  %3751 = vmatprep.subr.bf16.mxu0 %v5057_v50  ;;  %v760_v49 = vcombine.high %v752_v48, %v752_v48 }
  0x25   :  { %4397 = vmatprep.mubr.msk.bf16.mxu1 %vm4785_vm0, %v6317_v1  ;;  %4394 = vmatpush3.bf16.msra.mxu1 %v5089_v57 }
  0x26   :  { %4395 = vmatprep.subr.bf16.mxu1 %v6317_v1  ;;  %v782_v51 = vrot.slane %v760_v49, %v5013_v35 }
  0x27   :  { %3752 = vmatpush3.bf16.msra.mxu0 %v5064_v53 }
  0x28   :  { %3753 = vmatprep.subr.bf16.mxu0 %v5070_v54 }
  0x29   :  { %4396 = vmatpush3.bf16.msra.mxu1 %v5109_v61 }
  0x2a   :  { %4401 = vmatprep.subr.bf16.mxu1 %v6317_v1 }
  0x2b   :  { %3754 = vmatpush3.bf16.msra.mxu0 %v5078_v55 }
  0x2c   :  { %3755 = vmatprep.subr.bf16.mxu0 %v5084_v56  ;;  %4398 = vmatmul.mubr.msk.bf16.vlgmr.msra.gmra.mxu1 %vm497_vm1, %v189_v63  ;;  %v790_v63 = vcombine.high %v5199_v52, %v5199_v52 }
  0x2d   :  { %4409 = vmatprep.mubr.msk.bf16.mxu1 %vm4785_vm0, %v6317_v1  ;;  %4402 = vmatpush3.bf16.msra.mxu1 %v4628_v40  ;;  %v745_v40 = vcombine.high %v3551_v46, %v3551_v46 }
  0x2e   :  { %4403 = vmatprep.subr.bf16.mxu1 %v6317_v1 }
  0x2f   :  { %3756 = vmatpush3.bf16.msra.mxu0 %v5095_v58 }
  0x30   :  { %3757 = vmatprep.subr.bf16.mxu0 %v5102_v60 }
  0x31   :  { %4404 = vmatpush3.bf16.msra.mxu1 %v4629_v43  ;;  %v759_v43 = vrot.slane %v745_v40, %v5013_v35 }
  0x32   :  { %4405 = vmatprep.subr.bf16.mxu1 %v6317_v1 }
  0x33   :  { %3758 = vmatpush3.bf16.msra.mxu0 %v5115_v62 }
  0x34   :  { %3759 = vmatprep.subr.bf16.mxu0 %v5121_v22 }
  0x35   :  { %4406 = vmatpush3.bf16.msra.mxu1 %v4630_v44  ;;  %v5211_v44 = vrot.slane %v759_v43, %v5013_v35 }
  0x36   :  { %4407 = vmatprep.subr.bf16.mxu1 %v6317_v1 }
  0x37   :  { %3760 = vmatpush3.bf16.msra.mxu0 %v5129_v23 }
  0x38   :  { %3761 = vmatprep.subr.bf16.mxu0 %v5136_v24 }
  0x39   :  { %4408 = vmatpush3.bf16.msra.mxu1 %v4631_v45  ;;  %v791_v45 = vcombine.high %v5211_v44, %v5211_v44 }
  0x3a   :  { %3779 = vmatprep.subr.bf16.mxu1 %v4840_v0 }
  0x3b   :  { %3762 = vmatpush3.bf16.msra.mxu0 %v5144_v29 }
  0x3c   :  { %3763 = vmatprep.subr.bf16.mxu0 %v5150_v38 }
  0x3f   :  { %3764 = vmatpush3.bf16.msra.mxu0 %v5156_v39 }
  0x40   :  { %3801 = vmatprep.subr.bf16.mxu0 %v4852_v3 }
  0x42   :  { %614 = vmatmul.mubr.bf16.vlgmr.msra.gmra.mxu0 %v173_v59  ;;  %v792_v59 = vcombine.high %v782_v51, %v782_v51 }
  0x43   :  { %3802 = vmatpush3.bf16.msra.mxu0 %v4858_v4 }
  0x44   :  { %3803 = vmatprep.subr.bf16.mxu0 %v4876_v7  ;;  %874 = vmatprep.mubr.bf16.mxu0 %v792_v59 }
  0x47   :  { %3804 = vmatpush3.bf16.msra.mxu0 %v4882_v8 }
  0x48   :  { %3805 = vmatprep.subr.bf16.mxu0 %v4900_v11 }
  0x4b   :  { %3806 = vmatpush3.bf16.msra.mxu0 %v4906_v12 }
  0x4c   :  { %3807 = vmatprep.subr.bf16.mxu0 %v4924_v15 }
  0x4f   :  { %3808 = vmatpush3.bf16.msra.mxu0 %v4930_v16 }
  0x50   :  { %3809 = vmatprep.subr.bf16.mxu0 %v4948_v19 }
  0x53   :  { %3810 = vmatpush3.bf16.msra.mxu0 %v4954_v20 }
  0x54   :  { %3811 = vmatprep.subr.bf16.mxu0 %v4972_v26 }
  0x57   :  { %3812 = vmatpush3.bf16.msra.mxu0 %v4978_v27 }
  0x58   :  { %3813 = vmatprep.subr.bf16.mxu0 %v4998_v32 }
  0x5b   :  { %3814 = vmatpush3.bf16.msra.mxu0 %v5004_v33 }
  0x5c   :  { %3815 = vmatprep.subr.bf16.mxu0 %v5025_v37 }
  0x5f   :  { %3816 = vmatpush3.bf16.msra.mxu0 %v5036_v41 }
  0x60   :  { %4413 = vmatprep.subr.bf16.mxu0 %v6317_v1 }
  0x62   :  { %875 = vmatmul.mubr.bf16.vlgmr.msra.gmra.mxu0 %v790_v63 }
  0x63   :  { %4414 = vmatpush3.bf16.msra.mxu0 %v5089_v57  ;;  %4417 = vmatprep.mubr.msk.bf16.mxu0 %vm4785_vm0, %v6317_v1 }
  0x64   :  { %4415 = vmatprep.subr.bf16.mxu0 %v6317_v1 }
  0x67   :  { %4416 = vmatpush3.bf16.msra.mxu0 %v5109_v61 }
  0x68   :  { %4421 = vmatprep.subr.bf16.mxu0 %v6317_v1 }
  0x6a   :  { %4418 = vmatmul.mubr.msk.bf16.vlgmr.msra.gmra.mxu0 %vm497_vm1, %v791_v45  ;;  %v5221_v45 = vld [vmem:[%s6297_s2] ss:$0 sm:$0xff] }
  0x6b   :  { %4429 = vmatprep.mubr.msk.bf16.mxu0 %vm4785_vm0, %v6317_v1 }
  0xe2   :  { %v3721_v48 = vpop.f32.mrf.mxu0 }
  0xe4   :  { %v3722_v49 = vpop.f32.mrf.mxu0  ;;  %v3743_v59 = vpop.f32.mrf.mxu1 }
  0xe5   :  { %v3723_v33 = vadd.f32 %v3722_v49, %v3721_v48  ;;  %v4634_v48 = vld [vmem:[%s6296_s3 + $0x30] sm:$0xff]  }
  0xe6   :  { %v3724_v63 = vpop.f32.mrf.mxu0  ;;  %v3744_v30 = vpop.f32.mrf.mxu1 }
  0xe7   :  { %v536_v1 = vadd.f32 %v3723_v33, %v5221_v45  ;;  %v3745_v32 = vadd.f32 %v3744_v30, %v3743_v59  ;;  %v6371_v30 = vld [vmem:[#allocation12_spill] sm:$0xff] }
  0xe8   :  { %v3725_v61 = vpop.f32.mrf.mxu0  ;;  %v3746_v46 = vpop.f32.mrf.mxu1 }
  0xe9   :  { %v576_v63 = vadd.f32 %v3745_v32, %v536_v1  ;;  %v761_v1 = vcombine.high %v759_v43, %v759_v43  ;;  %v6372_v32 = vmov 0.0   ;;  %v4633_v43 = vld [vmem:[%s6296_s3 + $0x38] sm:$0xff]  }
  0xea   :  { %v3747_v57 = vpop.f32.mrf.mxu1  ;;  %4422 = vmatpush3.bf16.msra.mxu0 %v4633_v43  ;;  %v6374_v43 = vld [vmem:[#allocation13_spill] sm:$0xff] }
  0xeb   :  { %4423 = vmatprep.subr.bf16.mxu0 %v6372_v32 }
  0xec   :  { %v655_v40 = vpop.f32.mrf.mxu1 }
  0xee   :  { %v4399_v0 = vpop.f32.mrf.mxu1  ;;  %4424 = vmatpush3.bf16.msra.mxu0 %v4634_v48  ;;  %v663_v48 = vld [vmem:[#allocation2] sm:$0x3] }
  0xef   :  { %4425 = vmatprep.subr.bf16.mxu0 %v6372_v32 }
  0xf0   :  { %v658_v41 = vpop.f32.mrf.mxu1 }
  0xf2   :  { %v4400_v37 = vpop.f32.mrf.mxu1 }
 0x102   :  { %v3765_v27 = vpop.f32.mrf.mxu0 }
 0x104   :  { %v3766_v26 = vpop.f32.mrf.mxu0 }
 0x105   :  { %v3767_v20 = vadd.f32 %v3766_v26, %v3765_v27  ;;  %v6365_v26 = vld [vmem:[#allocation5_spill] sm:$0xff]  ;;  %v6367_v27 = vld [vmem:[#allocation7_spill] sm:$0xff] }
 0x106   :  { %v3768_v61 = vpop.f32.mrf.mxu0 }
 0x107   :  { %v616_v46 = vadd.f32 %v3767_v20, %v576_v63  ;;  %v6364_v20 = vld [vmem:[#allocation4_spill] sm:$0xff] }
 0x108   :  { %v3769_v57 = vpop.f32.mrf.mxu0 }
 0x109   :  { %v656_v19 = vadd.f32 %v655_v40, %v616_v46  ;;  %v4635_v40 = vld [vmem:[%s6296_s3 + $0x28] sm:$0xff]   ;;  %v4636_v46 = vld [vmem:[%s6296_s3 + $0x20] sm:$0xff]  }
 0x10a   :  { %4426 = vmatpush3.bf16.msra.mxu0 %v4635_v40  ;;  %v6373_v57 = vld [vmem:[#allocation3_spill] sm:$0xff] }
 0x10b   :  { %v661_v0 = vmax.f32 %v656_v19, 0.0  ;;  %v789_v19 = vrot.slane %v761_v1, %v5013_v35  ;;  %4427 = vmatprep.subr.bf16.mxu0 %v6372_v32 }
 0x10d   :  { %v662_v37 = vpack.c.bf16 %v661_v0, %v661_v0  ;;  %v3566_v0 = vld [vmem:[%s6295_s0 + $0xe] sm:$0x7f] }
 0x10e   :  { %4428 = vmatpush3.bf16.msra.mxu0 %v4636_v46  ;;  %v1046_v46 = vcombine.high %v3566_v0, %v3566_v0 }
 0x10f   :  { %4410 = vmatmul.mubr.msk.bf16.vlgmr.msra.gmra.mxu1 %vm696_vm2, %v662_v37  ;;  %3853 = vmatprep.subr.bf16.mxu0 %v6373_v57  ;;  %v1053_v37 = vrot.slane %v3566_v0, %v5013_v35 }
 0x110   :  { %3780 = vmatpush3.bf16.msra.mxu1 %v4846_v2  ;;  %834 = vmatprep.mubr.bf16.mxu1 %v782_v51 }
 0x111   :  { %3781 = vmatprep.subr.bf16.mxu1 %v4864_v5  ;;  %v1061_v1 = vcombine.high %v1053_v37, %v1053_v37 }
 0x114   :  { %3782 = vmatpush3.bf16.msra.mxu1 %v4870_v6 }
 0x115   :  { %3783 = vmatprep.subr.bf16.mxu1 %v4888_v9 }
 0x118   :  { %3784 = vmatpush3.bf16.msra.mxu1 %v4894_v10 }
 0x119   :  { %3785 = vmatprep.subr.bf16.mxu1 %v4912_v13 }
 0x11c   :  { %3786 = vmatpush3.bf16.msra.mxu1 %v4918_v14 }
 0x11d   :  { %3787 = vmatprep.subr.bf16.mxu1 %v4936_v17 }
 0x120   :  { %3788 = vmatpush3.bf16.msra.mxu1 %v4942_v18 }
 0x121   :  { %3789 = vmatprep.subr.bf16.mxu1 %v4960_v21 }
 0x122   :  { %v3817_v33 = vpop.f32.mrf.mxu0 }
 0x124   :  { %3790 = vmatpush3.bf16.msra.mxu1 %v4966_v25  ;;  %v3818_v41 = vpop.f32.mrf.mxu0 }
 0x125   :  { %3791 = vmatprep.subr.bf16.mxu1 %v4984_v28  ;;  %v3819_v51 = vadd.f32 %v3818_v41, %v3817_v33  ;;  %v1069_v33 = vrot.slane %v1053_v37, %v5013_v35  ;;  %v1060_v37 = vrot.slane %v1046_v46, %v5013_v35 }
 0x128   :  { %3792 = vmatpush3.bf16.msra.mxu1 %v4992_v31 }
 0x129   :  { %3793 = vmatprep.subr.bf16.mxu1 %v5010_v34 }
 0x12c   :  { %3794 = vmatpush3.bf16.msra.mxu1 %v5019_v36 }
 0x12d   :  { %3823 = vmatprep.subr.bf16.mxu1 %v5041_v42 }
 0x12f   :  { %835 = vmatmul.mubr.bf16.vlgmr.msra.gmra.mxu1 %v5199_v52  ;;  %v3820_v52 = vpop.f32.mrf.mxu0 }
 0x130   :  { %3824 = vmatpush3.bf16.msra.mxu1 %v5052_v47  ;;  %914 = vmatprep.mubr.bf16.mxu1 %v789_v19  ;;  %v1083_v19 = vrot.slane %v1061_v1, %v5013_v35  ;;  %v1091_v52 = vcombine.high %v1069_v33, %v1069_v33  ;;  %v1076_v1 = vrot.slane %v1060_v37, %v5013_v35 }
 0x131   :  { %3825 = vmatprep.subr.bf16.mxu1 %v5057_v50 }
 0x132   :  { %v1093_v41 = vcombine.high %v1083_v19, %v1083_v19 }
 0x134   :  { %3826 = vmatpush3.bf16.msra.mxu1 %v5064_v53 }
 0x135   :  { %3827 = vmatprep.subr.bf16.mxu1 %v5070_v54 }
 0x138   :  { %3828 = vmatpush3.bf16.msra.mxu1 %v5078_v55 }
 0x139   :  { %3829 = vmatprep.subr.bf16.mxu1 %v5084_v56 }
 0x13c   :  { %3830 = vmatpush3.bf16.msra.mxu1 %v5095_v58 }
 0x13d   :  { %3831 = vmatprep.subr.bf16.mxu1 %v5102_v60 }
 0x140   :  { %3832 = vmatpush3.bf16.msra.mxu1 %v5115_v62 }
 0x141   :  { %3833 = vmatprep.subr.bf16.mxu1 %v5121_v22 }
 0x144   :  { %3834 = vmatpush3.bf16.msra.mxu1 %v5129_v23 }
 0x145   :  { %3835 = vmatprep.subr.bf16.mxu1 %v5136_v24 }
 0x148   :  { %3836 = vmatpush3.bf16.msra.mxu1 %v5144_v29 }
 0x149   :  { %3837 = vmatprep.subr.bf16.mxu1 %v5150_v38 }
 0x14c   :  { %3838 = vmatpush3.bf16.msra.mxu1 %v5156_v39 }
 0x14d   :  { %3875 = vmatprep.subr.bf16.mxu1 %v4852_v3  ;;  %v6366_v3 = vld [vmem:[#allocation6_spill] sm:$0xff] }
 0x14f   :  { %915 = vmatmul.mubr.bf16.vlgmr.msra.gmra.mxu1 %v5211_v44  ;;  %v3821_v44 = vpop.f32.mrf.mxu0 }
 0x150   :  { %3876 = vmatpush3.bf16.msra.mxu1 %v4858_v4  ;;  %v6368_v4 = vld [vmem:[#allocation9_spill] sm:$0xff]  ;;  %1175 = vmatprep.mubr.bf16.mxu1 %v1093_v41  ;;  %v6375_v44 = vld [vmem:[#allocation14_spill] sm:$0xff]  ;;  %v1092_v41 = vcombine.high %v1076_v1, %v1076_v1 }
 0x151   :  { %3877 = vmatprep.subr.bf16.mxu1 %v4876_v7  ;;  %v6369_v7 = vld [vmem:[#allocation10_spill] sm:$0xff]  ;;  %v956_v49 = vpop.f32.mrf.mxu0 }
 0x153   :  { %v4419_v59 = vpop.f32.mrf.mxu0 }
 0x154   :  { %3878 = vmatpush3.bf16.msra.mxu1 %v4882_v8  ;;  %v6370_v8 = vld [vmem:[#allocation11_spill] sm:$0xff] }
 0x155   :  { %3879 = vmatprep.subr.bf16.mxu1 %v4900_v11  ;;  %v959_v63 = vpop.f32.mrf.mxu0 }
 0x157   :  { %v4420_v61 = vpop.f32.mrf.mxu0 }
 0x158   :  { %3880 = vmatpush3.bf16.msra.mxu1 %v4906_v12 }
 0x159   :  { %3881 = vmatprep.subr.bf16.mxu1 %v4924_v15 }
 0x15c   :  { %3882 = vmatpush3.bf16.msra.mxu1 %v4930_v16 }
 0x15d   :  { %3883 = vmatprep.subr.bf16.mxu1 %v6364_v20 }
 0x160   :  { %3884 = vmatpush3.bf16.msra.mxu1 %v6365_v26 }
 0x161   :  { %3885 = vmatprep.subr.bf16.mxu1 %v6366_v3 }
 0x164   :  { %3886 = vmatpush3.bf16.msra.mxu1 %v6367_v27 }
 0x165   :  { %3887 = vmatprep.subr.bf16.mxu1 %v6368_v4 }
 0x168   :  { %3888 = vmatpush3.bf16.msra.mxu1 %v6369_v7 }
 0x169   :  { %3889 = vmatprep.subr.bf16.mxu1 %v6370_v8 }
 0x16c   :  { %3890 = vmatpush3.bf16.msra.mxu1 %v6371_v30 }
 0x16d   :  { %4433 = vmatprep.subr.bf16.mxu1 %v6372_v32 }
 0x16f   :  { %1176 = vmatmul.mubr.bf16.vlgmr.msra.gmra.mxu1 %v1091_v52 }
 0x170   :  { %4434 = vmatpush3.bf16.msra.mxu1 %v6374_v43  ;;  %4437 = vmatprep.mubr.msk.bf16.mxu1 %vm4785_vm0, %v6372_v32 }
 0x171   :  { %4435 = vmatprep.subr.bf16.mxu1 %v6372_v32 }
 0x174   :  { %4436 = vmatpush3.bf16.msra.mxu1 %v6375_v44 }
 0x175   :  { %4441 = vmatprep.subr.bf16.mxu1 %v6372_v32 }
 0x177   :  { %4438 = vmatmul.mubr.msk.bf16.vlgmr.msra.gmra.mxu1 %vm497_vm1, %v1092_v41 }
 0x178   :  { %4449 = vmatprep.mubr.msk.bf16.mxu1 %vm4785_vm0, %v6372_v32 }
 0x1cf   :  { %v734_v59 = vpop.f32.mrf.mxu1 }
 0x1d0   :  { %v740_v40 = vadd.f32 %v734_v59, %v663_v48 }
 0x1d1   :  { %v4411_v63 = vpop.f32.mrf.mxu1 }
 0x1d2   :  { %741 = vst [vmem:[#allocation2] sm:$0x3] %v740_v40 }
 0x1d3   :  { %v737_v61 = vpop.f32.mrf.mxu1 }
 0x1d5   :  { %v4412_v57 = vpop.f32.mrf.mxu1 }
 0x1ef   :  { %v3795_v52 = vpop.f32.mrf.mxu1 }
 0x1f1   :  { %v3796_v44 = vpop.f32.mrf.mxu1 }
 0x1f2   :  { %v3797_v48 = vadd.f32 %v3796_v44, %v3795_v52  ;;  %v6382_v44 = vld [vmem:[#allocation14_spill] sm:$0xff] }
 0x1f3   :  { %v3798_v43 = vpop.f32.mrf.mxu1 }
 0x1f4   :  { %v837_v59 = vadd.f32 %v3797_v48, %v5221_v45  ;;  %v6381_v43 = vld [vmem:[#allocation13_spill] sm:$0xff] }
 0x1f5   :  { %v3799_v30 = vpop.f32.mrf.mxu1 }
 0x1f6   :  { %v877_v63 = vadd.f32 %v3819_v51, %v837_v59 }
 0x20f   :  { %v3839_v40 = vpop.f32.mrf.mxu1 }
 0x211   :  { %v3840_v0 = vpop.f32.mrf.mxu1 }
 0x212   :  { %v3841_v61 = vadd.f32 %v3840_v0, %v3839_v40 }
 0x213   :  { %v3842_v46 = vpop.f32.mrf.mxu1 }
 0x214   :  { %v917_v57 = vadd.f32 %v3841_v61, %v877_v63 }
 0x215   :  { %v3843_v8 = vpop.f32.mrf.mxu1 }
 0x216   :  { %v957_v7 = vadd.f32 %v956_v49, %v917_v57 }
 0x218   :  { %v962_v4 = vmax.f32 %v957_v7, 0.0  ;;  %v3581_v7 = vld [vmem:[%s6295_s0 + $0x15] sm:$0x7f] }
 0x219   :  { %v1354_v8 = vrot.slane %v3581_v7, %v5013_v35  ;;  %v1347_v40 = vcombine.high %v3581_v7, %v3581_v7  ;;  %v5461_v7 = vld [vmem:[%s6294_s1 + $0x60] sm:$0xff]  }
 0x21a   :  { %v963_v41 = vpack.c.bf16 %v962_v4, %v962_v4  ;;  %v5398_v4 = vld [vmem:[%s6294_s1 + $0x78] sm:$0xff]  }
 0x21b   :  { %6380 = vst [vmem:[#allocation4_spill] sm:$0xff] %v5398_v4  ;;  %v1362_v30 = vcombine.high %v1354_v8, %v1354_v8  ;;  %v5407_v49 = vrot.slane %v1354_v8, %v5013_v35  ;;  %v1361_v63 = vrot.slane %v1347_v40, %v5013_v35  ;;  %v5467_v8 = vld [vmem:[%s6294_s1 + $0x20] sm:$0xff]  }
 0x21c   :  { %4430 = vmatmul.mubr.msk.bf16.vlgmr.msra.gmra.mxu0 %vm696_vm2, %v963_v41 }
 0x21d   :  { %3854 = vmatpush3.bf16.msra.mxu0 %v4846_v2  ;;  %1135 = vmatprep.mubr.bf16.mxu0 %v1083_v19  ;;  %v1062_v2 = vcombine.high %v1060_v37, %v1060_v37  ;;  %v1384_v51 = vrot.slane %v1362_v30, %v5013_v35  ;;  %v964_v37 = vld [vmem:[#allocation2] sm:$0x3]  ;;  %v5419_v61 = vrot.slane %v1361_v63, %v5013_v35  ;;  %v5473_v30 = vld [vmem:[%s6294_s1 + $0x58] sm:$0xff]  }
 0x21e   :  { %3855 = vmatprep.subr.bf16.mxu0 %v4864_v5 }
 0x21f   :  { %v1090_v5 = vrot.slane %v1062_v2, %v5013_v35  ;;  %v1394_v19 = vcombine.high %v1384_v51, %v1384_v51  ;;  %v1393_v46 = vcombine.high %v5419_v61, %v5419_v61 }
 0x221   :  { %3856 = vmatpush3.bf16.msra.mxu0 %v4870_v6  ;;  %v5346_v6 = vld [vmem:[%s6294_s1 + $0xf8] sm:$0xff]  }
 0x222   :  { %3857 = vmatprep.subr.bf16.mxu0 %v4888_v9  ;;  %v5352_v9 = vld [vmem:[%s6294_s1 + $0xb8] sm:$0xff]  }
 0x225   :  { %3858 = vmatpush3.bf16.msra.mxu0 %v4894_v10  ;;  %v5358_v10 = vld [vmem:[%s6294_s1 + $0xf0] sm:$0xff]  }
 0x226   :  { %3859 = vmatprep.subr.bf16.mxu0 %v4912_v13  ;;  %v5364_v13 = vld [vmem:[%s6294_s1 + $0xb0] sm:$0xff]  }
 0x229   :  { %3860 = vmatpush3.bf16.msra.mxu0 %v4918_v14  ;;  %v6376_v14 = vld [vmem:[#allocation9_spill] sm:$0xff] }
 0x22a   :  { %3861 = vmatprep.subr.bf16.mxu0 %v4936_v17  ;;  %v6377_v17 = vld [vmem:[#allocation10_spill] sm:$0xff] }
 0x22d   :  { %3862 = vmatpush3.bf16.msra.mxu0 %v4942_v18  ;;  %v6378_v18 = vld [vmem:[#allocation11_spill] sm:$0xff] }
 0x22e   :  { %3863 = vmatprep.subr.bf16.mxu0 %v4960_v21 }
 0x231   :  { %3864 = vmatpush3.bf16.msra.mxu0 %v4966_v25  ;;  %v4638_v25 = vld [vmem:[%s6296_s3 + $0x58] sm:$0xff]  }
 0x232   :  { %3865 = vmatprep.subr.bf16.mxu0 %v4984_v28  ;;  %4442 = vmatpush3.bf16.msra.mxu1 %v4638_v25 }
 0x233   :  { %4443 = vmatprep.subr.bf16.mxu1 %v6372_v32 }
 0x235   :  { %3866 = vmatpush3.bf16.msra.mxu0 %v4992_v31  ;;  %v4639_v31 = vld [vmem:[%s6296_s3 + $0x50] sm:$0xff]  }
 0x236   :  { %3867 = vmatprep.subr.bf16.mxu0 %v5010_v34  ;;  %4444 = vmatpush3.bf16.msra.mxu1 %v4639_v31 }
 0x237   :  { %4445 = vmatprep.subr.bf16.mxu1 %v6372_v32 }
 0x239   :  { %3868 = vmatpush3.bf16.msra.mxu0 %v5019_v36 }
 0x23a   :  { %3897 = vmatprep.subr.bf16.mxu0 %v5041_v42 }
 0x23c   :  { %1136 = vmatmul.mubr.bf16.vlgmr.msra.gmra.mxu0 %v1069_v33  ;;  %v1392_v33 = vcombine.high %v5407_v49, %v5407_v49 }
 0x23d   :  { %3898 = vmatpush3.bf16.msra.mxu0 %v5052_v47  ;;  %1215 = vmatprep.mubr.bf16.mxu0 %v1090_v5 }
 0x23e   :  { %3899 = vmatprep.subr.bf16.mxu0 %v5057_v50 }
 0x241   :  { %3900 = vmatpush3.bf16.msra.mxu0 %v5064_v53 }
 0x242   :  { %3901 = vmatprep.subr.bf16.mxu0 %v5070_v54 }
 0x245   :  { %3902 = vmatpush3.bf16.msra.mxu0 %v5078_v55 }
 0x246   :  { %3903 = vmatprep.subr.bf16.mxu0 %v5084_v56 }
 0x249   :  { %3904 = vmatpush3.bf16.msra.mxu0 %v5095_v58 }
 0x24a   :  { %3905 = vmatprep.subr.bf16.mxu0 %v5102_v60 }
 0x24d   :  { %3906 = vmatpush3.bf16.msra.mxu0 %v5115_v62 }
 0x24e   :  { %3907 = vmatprep.subr.bf16.mxu0 %v5121_v22 }
 0x251   :  { %3908 = vmatpush3.bf16.msra.mxu0 %v5129_v23 }
 0x252   :  { %3909 = vmatprep.subr.bf16.mxu0 %v5136_v24 }
 0x255   :  { %3910 = vmatpush3.bf16.msra.mxu0 %v5144_v29 }
 0x256   :  { %3911 = vmatprep.subr.bf16.mxu0 %v5150_v38 }
 0x259   :  { %3912 = vmatpush3.bf16.msra.mxu0 %v5156_v39 }
 0x25a   :  { %3949 = vmatprep.subr.bf16.mxu0 %v5346_v6 }
 0x25c   :  { %1216 = vmatmul.mubr.bf16.vlgmr.msra.gmra.mxu0 %v1076_v1 }
 0x25d   :  { %3950 = vmatpush3.bf16.msra.mxu0 %v5352_v9  ;;  %1476 = vmatprep.mubr.bf16.mxu0 %v1394_v19  ;;  %v5485_v19 = vld [vmem:[%s6294_s1 + $0x50] sm:$0xff]  }
 0x25e   :  { %3951 = vmatprep.subr.bf16.mxu0 %v5358_v10 }
 0x261   :  { %3952 = vmatpush3.bf16.msra.mxu0 %v5364_v13 }
 0x262   :  { %3953 = vmatprep.subr.bf16.mxu0 %v4900_v11  ;;  %v6379_v11 = vld [vmem:[#allocation12_spill] sm:$0xff] }
 0x265   :  { %3954 = vmatpush3.bf16.msra.mxu0 %v4906_v12  ;;  %v3891_v12 = vpop.f32.mrf.mxu1 }
 0x266   :  { %3955 = vmatprep.subr.bf16.mxu0 %v4924_v15 }
 0x267   :  { %v3892_v15 = vpop.f32.mrf.mxu1 }
 0x269   :  { %3956 = vmatpush3.bf16.msra.mxu0 %v4930_v16  ;;  %v3893_v16 = vadd.f32 %v3892_v15, %v3891_v12  ;;  %v3894_v21 = vpop.f32.mrf.mxu1 }
 0x26a   :  { %3957 = vmatprep.subr.bf16.mxu0 %v6364_v20  ;;  %v4640_v20 = vld [vmem:[%s6296_s3 + $0x48] sm:$0xff]  }
 0x26b   :  { %v3895_v28 = vpop.f32.mrf.mxu1  ;;  %4446 = vmatpush3.bf16.msra.mxu1 %v4640_v20 }
 0x26c   :  { %4447 = vmatprep.subr.bf16.mxu1 %v6372_v32 }
 0x26d   :  { %3958 = vmatpush3.bf16.msra.mxu0 %v6365_v26  ;;  %v1257_v34 = vpop.f32.mrf.mxu1 }
 0x26e   :  { %3959 = vmatprep.subr.bf16.mxu0 %v6366_v3 }
 0x26f   :  { %v4439_v36 = vpop.f32.mrf.mxu1 }
 0x271   :  { %3960 = vmatpush3.bf16.msra.mxu0 %v6367_v27  ;;  %v1260_v26 = vpop.f32.mrf.mxu1  ;;  %v4641_v27 = vld [vmem:[%s6296_s3 + $0x40] sm:$0xff]  }
 0x272   :  { %3961 = vmatprep.subr.bf16.mxu0 %v6376_v14  ;;  %4448 = vmatpush3.bf16.msra.mxu1 %v4641_v27  ;;  %v5431_v26 = vld [vmem:[%s6294_s1 + $0x38] sm:$0xff]   ;;  %v5455_v27 = vld [vmem:[%s6294_s1 + $0x28] sm:$0xff]  }
 0x273   :  { %v4440_v3 = vpop.f32.mrf.mxu1  ;;  %3927 = vmatprep.subr.bf16.mxu1 %v5398_v4 }
 0x274   :  { %v5449_v3 = vld [vmem:[%s6294_s1 + $0x68] sm:$0xff]  }
 0x275   :  { %3962 = vmatpush3.bf16.msra.mxu0 %v6377_v17 }
 0x276   :  { %3963 = vmatprep.subr.bf16.mxu0 %v6378_v18 }
 0x279   :  { %3964 = vmatpush3.bf16.msra.mxu0 %v6379_v11 }
 0x27a   :  { %4453 = vmatprep.subr.bf16.mxu0 %v6372_v32 }
 0x27c   :  { %1477 = vmatmul.mubr.bf16.vlgmr.msra.gmra.mxu0 %v1392_v33  ;;  %v5491_v33 = vld [vmem:[%s6294_s1 + $0x10] sm:$0xff]  }
 0x27d   :  { %4454 = vmatpush3.bf16.msra.mxu0 %v6381_v43  ;;  %4457 = vmatprep.mubr.msk.bf16.mxu0 %vm4785_vm0, %v6372_v32 }
 0x27e   :  { %4455 = vmatprep.subr.bf16.mxu0 %v6372_v32 }
 0x281   :  { %4456 = vmatpush3.bf16.msra.mxu0 %v6382_v44 }
 0x282   :  { %4461 = vmatprep.subr.bf16.mxu0 %v6372_v32 }
 0x284   :  { %4458 = vmatmul.mubr.msk.bf16.vlgmr.msra.gmra.mxu0 %vm497_vm1, %v1393_v46 }
 0x285   :  { %4469 = vmatprep.mubr.msk.bf16.mxu0 %vm4785_vm0, %v6372_v32 }
 0x2dc   :  { %v1035_v1 = vpop.f32.mrf.mxu0 }
 0x2dd   :  { %v1041_v52 = vadd.f32 %v1035_v1, %v964_v37  ;;  %v5497_v37 = vld [vmem:[%s6294_s1 + $0x48] sm:$0xff]  }
 0x2de   :  { %v4431_v48 = vpop.f32.mrf.mxu0  ;;  %v5503_v1 = vld [vmem:[%s6294_s1 + $0x8] sm:$0xff]  }
 0x2df   :  { %1042 = vst [vmem:[#allocation2] sm:$0x3] %v1041_v52  ;;  %v1363_v52 = vcombine.high %v1361_v63, %v1361_v63  ;;  %v5509_v48 = vld [vmem:[%s6294_s1 + $0x40] sm:$0xff]   ;;  %v4644_v63 = vld [vmem:[%s6296_s3 + $0x70] sm:$0xff]  }
 0x2e0   :  { %v1038_v59 = vpop.f32.mrf.mxu0 }
 0x2e1   :  { %v5515_v59 = vld [vmem:[%s6294_s1] sm:$0xff]   ;;  %v1391_v40 = vrot.slane %v1363_v52, %v5013_v35 }
 0x2e2   :  { %v4432_v0 = vpop.f32.mrf.mxu0 }
 0x2fc   :  { %v3869_v57 = vpop.f32.mrf.mxu0 }
 0x2fe   :  { %v3870_v41 = vpop.f32.mrf.mxu0 }
 0x2ff   :  { %v3871_v14 = vadd.f32 %v3870_v41, %v3869_v57  ;;  %v4645_v57 = vld [vmem:[%s6296_s3 + $0x68] sm:$0xff]  }
 0x300   :  { %v3872_v2 = vpop.f32.mrf.mxu0 }
 0x301   :  { %v1138_v17 = vadd.f32 %v3871_v14, %v5221_v45  ;;  %v3596_v14 = vld [vmem:[%s6295_s0 + $0x1c] sm:$0x7f] }
 0x302   :  { %v3873_v5 = vpop.f32.mrf.mxu0  ;;  %v1648_v52 = vcombine.high %v3596_v14, %v3596_v14 }
 0x303   :  { %v1178_v12 = vadd.f32 %v3893_v16, %v1138_v17  ;;  %v5437_v16 = vld [vmem:[%s6294_s1 + $0x70] sm:$0xff]   ;;  %v4646_v5 = vld [vmem:[%s6296_s3 + $0x60] sm:$0xff]   ;;  %v1655_v17 = vrot.slane %v3596_v14, %v5013_v35 }
 0x31c   :  { %v3913_v18 = vpop.f32.mrf.mxu0 }
 0x31e   :  { %v3914_v11 = vpop.f32.mrf.mxu0 }
 0x31f   :  { %v3915_v15 = vadd.f32 %v3914_v11, %v3913_v18  ;;  %v1663_v18 = vcombine.high %v1655_v17, %v1655_v17 }
 0x320   :  { %v3916_v21 = vpop.f32.mrf.mxu0 }
 0x321   :  { %v1218_v25 = vadd.f32 %v3915_v15, %v1178_v12  ;;  %v1685_v11 = vrot.slane %v1663_v18, %v5013_v35  ;;  %v1671_v12 = vrot.slane %v1655_v17, %v5013_v35 }
 0x322   :  { %v3917_v28 = vpop.f32.mrf.mxu0 }
 0x323   :  { %v1258_v31 = vadd.f32 %v1257_v34, %v1218_v25  ;;  %v5443_v34 = vld [vmem:[%s6294_s1 + $0x30] sm:$0xff]   ;;  %v1695_v15 = vcombine.high %v1685_v11, %v1685_v11  ;;  %v1693_v21 = vcombine.high %v1671_v12, %v1671_v12  ;;  %v1265_v25 = vld [vmem:[#allocation2] sm:$0x3] }
 0x325   :  { %v1263_v36 = vmax.f32 %v1258_v31, 0.0 }
 0x327   :  { %v1264_v20 = vpack.c.bf16 %v1263_v36, %v1263_v36 }
 0x329   :  { %4450 = vmatmul.mubr.msk.bf16.vlgmr.msra.gmra.mxu1 %vm696_vm2, %v1264_v20 }
 0x32a   :  { %3928 = vmatpush3.bf16.msra.mxu1 %v5431_v26  ;;  %1436 = vmatprep.mubr.bf16.mxu1 %v1384_v51  ;;  %v5479_v51 = vld [vmem:[%s6294_s1 + $0x18] sm:$0xff]  }
 0x32b   :  { %3929 = vmatprep.subr.bf16.mxu1 %v5437_v16 }
 0x32e   :  { %3930 = vmatpush3.bf16.msra.mxu1 %v5443_v34 }
 0x32f   :  { %3931 = vmatprep.subr.bf16.mxu1 %v5449_v3 }
 0x332   :  { %3932 = vmatpush3.bf16.msra.mxu1 %v5455_v27 }
 0x333   :  { %3933 = vmatprep.subr.bf16.mxu1 %v5461_v7 }
 0x336   :  { %3934 = vmatpush3.bf16.msra.mxu1 %v5467_v8 }
 0x337   :  { %3935 = vmatprep.subr.bf16.mxu1 %v5473_v30 }
 0x33a   :  { %3936 = vmatpush3.bf16.msra.mxu1 %v5479_v51 }
 0x33b   :  { %3937 = vmatprep.subr.bf16.mxu1 %v5485_v19 }
 0x33e   :  { %3938 = vmatpush3.bf16.msra.mxu1 %v5491_v33 }
 0x33f   :  { %3939 = vmatprep.subr.bf16.mxu1 %v5497_v37 }
 0x342   :  { %3940 = vmatpush3.bf16.msra.mxu1 %v5503_v1 }
 0x343   :  { %3941 = vmatprep.subr.bf16.mxu1 %v5509_v48 }
 0x346   :  { %3942 = vmatpush3.bf16.msra.mxu1 %v5515_v59 }
 0x347   :  { %3971 = vmatprep.subr.bf16.mxu1 %v5041_v42  ;;  %v5544_v42 = vld [vmem:[%s6294_s1 + $0xe8] sm:$0xff]  }
 0x349   :  { %1437 = vmatmul.mubr.bf16.vlgmr.msra.gmra.mxu1 %v5407_v49  ;;  %v4643_v49 = vld [vmem:[%s6296_s3 + $0x78] sm:$0xff]  }
 0x34a   :  { %3972 = vmatpush3.bf16.msra.mxu1 %v5052_v47  ;;  %1516 = vmatprep.mubr.bf16.mxu1 %v1391_v40  ;;  %v5550_v47 = vld [vmem:[%s6294_s1 + $0xa8] sm:$0xff]  }
 0x34b   :  { %3973 = vmatprep.subr.bf16.mxu1 %v5057_v50  ;;  %v5556_v50 = vld [vmem:[%s6294_s1 + $0xe0] sm:$0xff]   ;;  %4462 = vmatpush3.bf16.msra.mxu0 %v4643_v49 }
 0x34c   :  { %4463 = vmatprep.subr.bf16.mxu0 %v6372_v32 }
 0x34e   :  { %3974 = vmatpush3.bf16.msra.mxu1 %v5064_v53  ;;  %v5562_v53 = vld [vmem:[%s6294_s1 + $0xa0] sm:$0xff]  }
 0x34f   :  { %3975 = vmatprep.subr.bf16.mxu1 %v5070_v54  ;;  %v5568_v54 = vld [vmem:[%s6294_s1 + $0xd8] sm:$0xff]   ;;  %4464 = vmatpush3.bf16.msra.mxu0 %v4644_v63 }
 0x350   :  { %6383 = vst [vmem:[#allocation5_spill] sm:$0xff] %v5568_v54  ;;  %4465 = vmatprep.subr.bf16.mxu0 %v6372_v32 }
 0x352   :  { %3976 = vmatpush3.bf16.msra.mxu1 %v5078_v55  ;;  %v5574_v55 = vld [vmem:[%s6294_s1 + $0x98] sm:$0xff]  }
 0x353   :  { %3977 = vmatprep.subr.bf16.mxu1 %v5084_v56  ;;  %6384 = vst [vmem:[#allocation6_spill] sm:$0xff] %v5574_v55  ;;  %v5580_v56 = vld [vmem:[%s6294_s1 + $0xd0] sm:$0xff]   ;;  %4466 = vmatpush3.bf16.msra.mxu0 %v4645_v57 }
 0x354   :  { %6385 = vst [vmem:[#allocation7_spill] sm:$0xff] %v5580_v56  ;;  %4467 = vmatprep.subr.bf16.mxu0 %v6372_v32 }
 0x356   :  { %3978 = vmatpush3.bf16.msra.mxu1 %v5095_v58  ;;  %v5586_v58 = vld [vmem:[%s6294_s1 + $0x90] sm:$0xff]  }
 0x357   :  { %3979 = vmatprep.subr.bf16.mxu1 %v5102_v60  ;;  %6386 = vst [vmem:[#allocation3_spill] sm:$0xff] %v5586_v58  ;;  %v5592_v60 = vld [vmem:[%s6294_s1 + $0xc8] sm:$0xff]   ;;  %4468 = vmatpush3.bf16.msra.mxu0 %v4646_v5 }
 0x358   :  { %6387 = vst [vmem:[#allocation9_spill] sm:$0xff] %v5592_v60  ;;  %4001 = vmatprep.subr.bf16.mxu0 %v5398_v4 }
 0x35a   :  { %3980 = vmatpush3.bf16.msra.mxu1 %v5115_v62  ;;  %v5598_v62 = vld [vmem:[%s6294_s1 + $0x88] sm:$0xff]  }
 0x35b   :  { %3981 = vmatprep.subr.bf16.mxu1 %v5121_v22  ;;  %6388 = vst [vmem:[#allocation10_spill] sm:$0xff] %v5598_v62  ;;  %v5604_v22 = vld [vmem:[%s6294_s1 + $0xc0] sm:$0xff]  }
 0x35c   :  { %6389 = vst [vmem:[#allocation11_spill] sm:$0xff] %v5604_v22 }
 0x35e   :  { %3982 = vmatpush3.bf16.msra.mxu1 %v5129_v23  ;;  %v5610_v23 = vld [vmem:[%s6294_s1 + $0x80] sm:$0xff]  }
 0x35f   :  { %3983 = vmatprep.subr.bf16.mxu1 %v5136_v24  ;;  %6390 = vst [vmem:[#allocation12_spill] sm:$0xff] %v5610_v23  ;;  %v3965_v24 = vpop.f32.mrf.mxu0 }
 0x362   :  { %3984 = vmatpush3.bf16.msra.mxu1 %v5144_v29  ;;  %v3966_v29 = vpop.f32.mrf.mxu0 }
 0x363   :  { %3985 = vmatprep.subr.bf16.mxu1 %v5150_v38  ;;  %v3967_v38 = vadd.f32 %v3966_v29, %v3965_v24  ;;  %v1662_v24 = vrot.slane %v1648_v52, %v5013_v35  ;;  %v5708_v52 = vld [vmem:[%s6294_s1 + $0x160] sm:$0xff]  }
 0x366   :  { %3986 = vmatpush3.bf16.msra.mxu1 %v5156_v39  ;;  %v3968_v39 = vpop.f32.mrf.mxu0 }
 0x367   :  { %4023 = vmatprep.subr.bf16.mxu1 %v5346_v6 }
 0x368   :  { %v3969_v0 = vpop.f32.mrf.mxu0 }
 0x369   :  { %1517 = vmatmul.mubr.bf16.vlgmr.msra.gmra.mxu1 %v5419_v61 }
 0x36a   :  { %4024 = vmatpush3.bf16.msra.mxu1 %v5352_v9  ;;  %v1558_v61 = vpop.f32.mrf.mxu0  ;;  %1777 = vmatprep.mubr.bf16.mxu1 %v1695_v15 }
 0x36b   :  { %4025 = vmatprep.subr.bf16.mxu1 %v5358_v10 }
 0x36c   :  { %v4459_v46 = vpop.f32.mrf.mxu0 }
 0x36e   :  { %4026 = vmatpush3.bf16.msra.mxu1 %v5364_v13  ;;  %v1561_v41 = vpop.f32.mrf.mxu0 }
 0x36f   :  { %4027 = vmatprep.subr.bf16.mxu1 %v5544_v42 }
 0x370   :  { %v4460_v2 = vpop.f32.mrf.mxu0 }
 0x372   :  { %4028 = vmatpush3.bf16.msra.mxu1 %v5550_v47 }
 0x373   :  { %4029 = vmatprep.subr.bf16.mxu1 %v5556_v50 }
 0x376   :  { %4030 = vmatpush3.bf16.msra.mxu1 %v5562_v53 }
 0x377   :  { %4031 = vmatprep.subr.bf16.mxu1 %v5568_v54 }
 0x37a   :  { %4032 = vmatpush3.bf16.msra.mxu1 %v5574_v55 }
 0x37b   :  { %4033 = vmatprep.subr.bf16.mxu1 %v5580_v56 }
 0x37e   :  { %4034 = vmatpush3.bf16.msra.mxu1 %v5586_v58 }
 0x37f   :  { %4035 = vmatprep.subr.bf16.mxu1 %v5592_v60 }
 0x382   :  { %4036 = vmatpush3.bf16.msra.mxu1 %v5598_v62 }
 0x383   :  { %4037 = vmatprep.subr.bf16.mxu1 %v5604_v22 }
 0x386   :  { %4038 = vmatpush3.bf16.msra.mxu1 %v5610_v23 }
 0x387   :  { %4473 = vmatprep.subr.bf16.mxu1 %v6372_v32 }
 0x389   :  { %1778 = vmatmul.mubr.bf16.vlgmr.msra.gmra.mxu1 %v1693_v21 }
 0x38a   :  { %4474 = vmatpush3.bf16.msra.mxu1 %v6381_v43  ;;  %4477 = vmatprep.mubr.msk.bf16.mxu1 %vm4785_vm0, %v6372_v32  ;;  %v5644_v43 = vrot.slane %v1662_v24, %v5013_v35 }
 0x38b   :  { %4475 = vmatprep.subr.bf16.mxu1 %v6372_v32 }
 0x38c   :  { %v1694_v29 = vcombine.high %v5644_v43, %v5644_v43 }
 0x38e   :  { %4476 = vmatpush3.bf16.msra.mxu1 %v6382_v44 }
 0x38f   :  { %4481 = vmatprep.subr.bf16.mxu1 %v6372_v32 }
 0x391   :  { %4478 = vmatmul.mubr.msk.bf16.vlgmr.msra.gmra.mxu1 %vm497_vm1, %v1694_v29  ;;  %v5726_v29 = vld [vmem:[%s6294_s1 + $0x118] sm:$0xff]  }
 0x392   :  { %4489 = vmatprep.mubr.msk.bf16.mxu1 %vm4785_vm0, %v6372_v32 }
 0x3e9   :  { %v1336_v28 = vpop.f32.mrf.mxu1 }
 0x3ea   :  { %v1342_v31 = vadd.f32 %v1336_v28, %v1265_v25  ;;  %v5678_v28 = vld [vmem:[%s6294_s1 + $0x138] sm:$0xff]  }
 0x3eb   :  { %v4451_v36 = vpop.f32.mrf.mxu1 }
 0x3ec   :  { %1343 = vst [vmem:[#allocation2] sm:$0x3] %v1342_v31  ;;  %v5684_v31 = vld [vmem:[%s6294_s1 + $0x170] sm:$0xff]  }
 0x3ed   :  { %v1339_v20 = vpop.f32.mrf.mxu1  ;;  %v5690_v36 = vld [vmem:[%s6294_s1 + $0x130] sm:$0xff]  }
 0x3ee   :  { %v5702_v20 = vld [vmem:[%s6294_s1 + $0x128] sm:$0xff]  }
 0x3ef   :  { %v4452_v40 = vpop.f32.mrf.mxu1 }
 0x3f0   :  { %v5714_v40 = vld [vmem:[%s6294_s1 + $0x120] sm:$0xff]  }
 0x409   :  { %v3943_v44 = vpop.f32.mrf.mxu1 }
 0x40b   :  { %v3944_v39 = vpop.f32.mrf.mxu1 }
 0x40c   :  { %v3945_v63 = vadd.f32 %v3944_v39, %v3943_v44  ;;  %v5732_v44 = vld [vmem:[%s6294_s1 + $0x150] sm:$0xff]  }
 0x40d   :  { %v3946_v49 = vpop.f32.mrf.mxu1  ;;  %v5738_v39 = vld [vmem:[%s6294_s1 + $0x110] sm:$0xff]  }
 0x40e   :  { %v1439_v46 = vadd.f32 %v3945_v63, %v5221_v45  ;;  %v5744_v49 = vld [vmem:[%s6294_s1 + $0x148] sm:$0xff]   ;;  %v5756_v63 = vld [vmem:[%s6294_s1 + $0x140] sm:$0xff]  }
 0x40f   :  { %v3947_v0 = vpop.f32.mrf.mxu1 }
 0x410   :  { %v1479_v2 = vadd.f32 %v3967_v38, %v1439_v46  ;;  %v1664_v38 = vcombine.high %v1662_v24, %v1662_v24  ;;  %v5720_v24 = vld [vmem:[%s6294_s1 + $0x158] sm:$0xff]   ;;  %v5750_v0 = vld [vmem:[%s6294_s1 + $0x108] sm:$0xff]   ;;  %v5762_v46 = vld [vmem:[%s6294_s1 + $0x100] sm:$0xff]  }
 0x429   :  { %v3987_v57 = vpop.f32.mrf.mxu1 }
 0x42b   :  { %v3988_v41 = vpop.f32.mrf.mxu1 }
 0x42c   :  { %v3989_v5 = vadd.f32 %v3988_v41, %v3987_v57 }
 0x42d   :  { %v3990_v14 = vpop.f32.mrf.mxu1 }
 0x42e   :  { %v1519_v17 = vadd.f32 %v3989_v5, %v1479_v2  ;;  %v4648_v5 = vld [vmem:[%s6296_s3 + $0x98] sm:$0xff]  }
 0x42f   :  { %v3991_v18 = vpop.f32.mrf.mxu1  ;;  %4482 = vmatpush3.bf16.msra.mxu1 %v4648_v5 }
 0x430   :  { %v1559_v15 = vadd.f32 %v1558_v61, %v1519_v17  ;;  %v1692_v61 = vrot.slane %v1664_v38, %v5013_v35  ;;  %4483 = vmatprep.subr.bf16.mxu1 %v6372_v32  ;;  %v4649_v17 = vld [vmem:[%s6296_s3 + $0x90] sm:$0xff]  }
 0x432   :  { %v1564_v21 = vmax.f32 %v1559_v15, 0.0 }
 0x433   :  { %4484 = vmatpush3.bf16.msra.mxu1 %v4649_v17 }
 0x434   :  { %v1565_v25 = vpack.c.bf16 %v1564_v21, %v1564_v21  ;;  %4485 = vmatprep.subr.bf16.mxu1 %v6372_v32  ;;  %v4650_v21 = vld [vmem:[%s6296_s3 + $0x88] sm:$0xff]  }
 0x436   :  { %4470 = vmatmul.mubr.msk.bf16.vlgmr.msra.gmra.mxu0 %vm696_vm2, %v1565_v25 }
 0x437   :  { %4002 = vmatpush3.bf16.msra.mxu0 %v5431_v26  ;;  %1737 = vmatprep.mubr.bf16.mxu0 %v1685_v11  ;;  %v5672_v11 = vld [vmem:[%s6294_s1 + $0x178] sm:$0xff]  }
 0x438   :  { %4003 = vmatprep.subr.bf16.mxu0 %v5437_v16  ;;  %4486 = vmatpush3.bf16.msra.mxu1 %v4650_v21  ;;  %v5808_v21 = vld [vmem:[%s6294_s1 + $0x188] sm:$0xff]  }
 0x439   :  { %4487 = vmatprep.subr.bf16.mxu1 %v6372_v32  ;;  %6391 = vst [vmem:[#allocation13_spill] sm:$0xff] %v5808_v21 }
 0x43b   :  { %4004 = vmatpush3.bf16.msra.mxu0 %v5443_v34 }
 0x43c   :  { %4005 = vmatprep.subr.bf16.mxu0 %v5449_v3 }
 0x43f   :  { %4006 = vmatpush3.bf16.msra.mxu0 %v5455_v27 }
 0x440   :  { %4007 = vmatprep.subr.bf16.mxu0 %v5461_v7 }
 0x443   :  { %4008 = vmatpush3.bf16.msra.mxu0 %v5467_v8 }
 0x444   :  { %4009 = vmatprep.subr.bf16.mxu0 %v5473_v30 }
 0x447   :  { %4010 = vmatpush3.bf16.msra.mxu0 %v5479_v51 }
 0x448   :  { %4011 = vmatprep.subr.bf16.mxu0 %v5485_v19 }
 0x44b   :  { %4012 = vmatpush3.bf16.msra.mxu0 %v5491_v33 }
 0x44c   :  { %4013 = vmatprep.subr.bf16.mxu0 %v5497_v37 }
 0x44f   :  { %4014 = vmatpush3.bf16.msra.mxu0 %v5503_v1 }
 0x450   :  { %4015 = vmatprep.subr.bf16.mxu0 %v5509_v48 }
 0x453   :  { %4016 = vmatpush3.bf16.msra.mxu0 %v5515_v59 }
 0x454   :  { %4045 = vmatprep.subr.bf16.mxu0 %v5672_v11 }
 0x456   :  { %1738 = vmatmul.mubr.bf16.vlgmr.msra.gmra.mxu0 %v1671_v12  ;;  %v5696_v12 = vld [vmem:[%s6294_s1 + $0x168] sm:$0xff]  }
 0x457   :  { %4046 = vmatpush3.bf16.msra.mxu0 %v5678_v28  ;;  %1817 = vmatprep.mubr.bf16.mxu0 %v1692_v61  ;;  %v4651_v61 = vld [vmem:[%s6296_s3 + $0x80] sm:$0xff]  }
 0x458   :  { %4047 = vmatprep.subr.bf16.mxu0 %v5684_v31  ;;  %4488 = vmatpush3.bf16.msra.mxu1 %v4651_v61 }
 0x459   :  { %4075 = vmatprep.subr.bf16.mxu1 %v5398_v4 }
 0x45b   :  { %4048 = vmatpush3.bf16.msra.mxu0 %v5690_v36 }
 0x45c   :  { %4049 = vmatprep.subr.bf16.mxu0 %v5696_v12 }
 0x45f   :  { %4050 = vmatpush3.bf16.msra.mxu0 %v5702_v20 }
 0x460   :  { %4051 = vmatprep.subr.bf16.mxu0 %v5708_v52 }
 0x463   :  { %4052 = vmatpush3.bf16.msra.mxu0 %v5714_v40 }
 0x464   :  { %4053 = vmatprep.subr.bf16.mxu0 %v5720_v24 }
 0x467   :  { %4054 = vmatpush3.bf16.msra.mxu0 %v5726_v29 }
 0x468   :  { %4055 = vmatprep.subr.bf16.mxu0 %v5732_v44 }
 0x46b   :  { %4056 = vmatpush3.bf16.msra.mxu0 %v5738_v39 }
 0x46c   :  { %4057 = vmatprep.subr.bf16.mxu0 %v5744_v49 }
 0x46f   :  { %4058 = vmatpush3.bf16.msra.mxu0 %v5750_v0 }
 0x470   :  { %4059 = vmatprep.subr.bf16.mxu0 %v5756_v63 }
 0x473   :  { %4060 = vmatpush3.bf16.msra.mxu0 %v5762_v46 }
 0x474   :  { %4097 = vmatprep.subr.bf16.mxu0 %v5346_v6 }
 0x476   :  { %1818 = vmatmul.mubr.bf16.vlgmr.msra.gmra.mxu0 %v5644_v43  ;;  %v4039_v43 = vpop.f32.mrf.mxu1 }
 0x477   :  { %4098 = vmatpush3.bf16.msra.mxu0 %v5352_v9 }
 0x478   :  { %4099 = vmatprep.subr.bf16.mxu0 %v5358_v10  ;;  %v4040_v57 = vpop.f32.mrf.mxu1 }
 0x479   :  { %v4041_v41 = vadd.f32 %v4040_v57, %v4039_v43  ;;  %v3611_v43 = vld [vmem:[%s6295_s0 + $0x23] sm:$0x7f] }
 0x47a   :  { %v4042_v2 = vpop.f32.mrf.mxu1  ;;  %v1956_v57 = vrot.slane %v3611_v43, %v5013_v35 }
 0x47b   :  { %4100 = vmatpush3.bf16.msra.mxu0 %v5364_v13 }
 0x47c   :  { %4101 = vmatprep.subr.bf16.mxu0 %v5544_v42  ;;  %v4043_v14 = vpop.f32.mrf.mxu1  ;;  %v1964_v2 = vcombine.high %v1956_v57, %v1956_v57 }
 0x47d   :  { %v1972_v14 = vrot.slane %v1956_v57, %v5013_v35 }
 0x47e   :  { %v1859_v18 = vpop.f32.mrf.mxu1  ;;  %v1986_v5 = vrot.slane %v1964_v2, %v5013_v35 }
 0x47f   :  { %4102 = vmatpush3.bf16.msra.mxu0 %v5550_v47 }
 0x480   :  { %4103 = vmatprep.subr.bf16.mxu0 %v5556_v50  ;;  %v4479_v15 = vpop.f32.mrf.mxu1  ;;  %v1996_v17 = vcombine.high %v1986_v5, %v1986_v5 }
 0x481   :  { %v1994_v15 = vcombine.high %v1972_v14, %v1972_v14 }
 0x482   :  { %v1862_v25 = vpop.f32.mrf.mxu1  ;;  %2078 = vmatprep.mubr.bf16.mxu0 %v1996_v17 }
 0x483   :  { %4104 = vmatpush3.bf16.msra.mxu0 %v5562_v53  ;;  %v5817_v25 = vld [vmem:[%s6294_s1 + $0x180] sm:$0xff]  }
 0x484   :  { %4105 = vmatprep.subr.bf16.mxu0 %v5568_v54  ;;  %v4480_v38 = vpop.f32.mrf.mxu1  ;;  %6392 = vst [vmem:[#allocation14_spill] sm:$0xff] %v5817_v25 }
 0x485   :  { %v1566_v38 = vld [vmem:[#allocation2] sm:$0x3] }
 0x487   :  { %4106 = vmatpush3.bf16.msra.mxu0 %v5574_v55 }
 0x488   :  { %4107 = vmatprep.subr.bf16.mxu0 %v5580_v56 }
 0x48b   :  { %4108 = vmatpush3.bf16.msra.mxu0 %v5586_v58 }
 0x48c   :  { %4109 = vmatprep.subr.bf16.mxu0 %v5592_v60 }
 0x48f   :  { %4110 = vmatpush3.bf16.msra.mxu0 %v5598_v62 }
 0x490   :  { %4111 = vmatprep.subr.bf16.mxu0 %v5604_v22 }
 0x493   :  { %4112 = vmatpush3.bf16.msra.mxu0 %v5610_v23 }
 0x494   :  { %4493 = vmatprep.subr.bf16.mxu0 %v6372_v32 }
 0x496   :  { %2079 = vmatmul.mubr.bf16.vlgmr.msra.gmra.mxu0 %v1994_v15  ;;  %v1949_v15 = vcombine.high %v3611_v43, %v3611_v43 }
 0x497   :  { %4494 = vmatpush3.bf16.msra.mxu0 %v5808_v21  ;;  %4497 = vmatprep.mubr.msk.bf16.mxu0 %vm4785_vm0, %v6372_v32 }
 0x498   :  { %4495 = vmatprep.subr.bf16.mxu0 %v6372_v32  ;;  %v1963_v4 = vrot.slane %v1949_v15, %v5013_v35 }
 0x49a   :  { %v1979_v23 = vrot.slane %v1963_v4, %v5013_v35 }
 0x49b   :  { %4496 = vmatpush3.bf16.msra.mxu0 %v5817_v25 }
 0x49c   :  { %4501 = vmatprep.subr.bf16.mxu0 %v6372_v32  ;;  %v1995_v22 = vcombine.high %v1979_v23, %v1979_v23 }
 0x49e   :  { %4498 = vmatmul.mubr.msk.bf16.vlgmr.msra.gmra.mxu0 %vm497_vm1, %v1995_v22 }
 0x49f   :  { %4509 = vmatprep.mubr.msk.bf16.mxu0 %vm4785_vm0, %v6372_v32 }
 0x4f6   :  { %v1637_v61 = vpop.f32.mrf.mxu0 }
 0x4f7   :  { %v1643_v57 = vadd.f32 %v1637_v61, %v1566_v38 }
 0x4f8   :  { %v4471_v2 = vpop.f32.mrf.mxu0 }
 0x4f9   :  { %1644 = vst [vmem:[#allocation2] sm:$0x3] %v1643_v57 }
 0x4fa   :  { %v1640_v17 = vpop.f32.mrf.mxu0 }
 0x4fc   :  { %v4472_v21 = vpop.f32.mrf.mxu0 }
 0x516   :  { %v4017_v25 = vpop.f32.mrf.mxu0 }
 0x518   :  { %v4018_v62 = vpop.f32.mrf.mxu0 }
 0x519   :  { %v4019_v38 = vadd.f32 %v4018_v62, %v4017_v25  ;;  %v6398_v62 = vld [vmem:[#allocation10_spill] sm:$0xff] }
 0x51a   :  { %v4020_v60 = vpop.f32.mrf.mxu0 }
 0x51b   :  { %v1740_v61 = vadd.f32 %v4019_v38, %v5221_v45  ;;  %v1965_v45 = vcombine.high %v1963_v4, %v1963_v4  ;;  %v6393_v4 = vld [vmem:[#allocation5_spill] sm:$0xff] }
 0x51c   :  { %v4021_v58 = vpop.f32.mrf.mxu0  ;;  %v6397_v60 = vld [vmem:[#allocation9_spill] sm:$0xff] }
 0x51d   :  { %v1780_v21 = vadd.f32 %v4041_v41, %v1740_v61  ;;  %v6396_v58 = vld [vmem:[#allocation3_spill] sm:$0xff]  ;;  %v6400_v41 = vld [vmem:[#allocation12_spill] sm:$0xff]  ;;  %v4653_v38 = vld [vmem:[%s6296_s3 + $0xb8] sm:$0xff]  }
 0x51e   :  { %4502 = vmatpush3.bf16.msra.mxu0 %v4653_v38 }
 0x51f   :  { %4503 = vmatprep.subr.bf16.mxu0 %v6372_v32 }
 0x536   :  { %v4061_v57 = vpop.f32.mrf.mxu0 }
 0x538   :  { %v4062_v43 = vpop.f32.mrf.mxu0 }
 0x539   :  { %v4063_v2 = vadd.f32 %v4062_v43, %v4061_v57  ;;  %v4654_v57 = vld [vmem:[%s6296_s3 + $0xb0] sm:$0xff]  }
 0x53a   :  { %v4064_v17 = vpop.f32.mrf.mxu0  ;;  %4504 = vmatpush3.bf16.msra.mxu0 %v4654_v57 }
 0x53b   :  { %v1820_v15 = vadd.f32 %v4063_v2, %v1780_v21  ;;  %4505 = vmatprep.subr.bf16.mxu0 %v6372_v32  ;;  %v4655_v2 = vld [vmem:[%s6296_s3 + $0xa8] sm:$0xff]  }
 0x53c   :  { %v4065_v56 = vpop.f32.mrf.mxu0 }
 0x53d   :  { %v1860_v55 = vadd.f32 %v1859_v18, %v1820_v15  ;;  %v6395_v56 = vld [vmem:[#allocation7_spill] sm:$0xff] }
 0x53e   :  { %4506 = vmatpush3.bf16.msra.mxu0 %v4655_v2  ;;  %v6403_v2 = vld [vmem:[#allocation14_spill] sm:$0xff] }
 0x53f   :  { %v1865_v54 = vmax.f32 %v1860_v55, 0.0  ;;  %v6394_v55 = vld [vmem:[#allocation6_spill] sm:$0xff]  ;;  %4507 = vmatprep.subr.bf16.mxu0 %v6372_v32 }
 0x541   :  { %v1866_v22 = vpack.c.bf16 %v1865_v54, %v1865_v54  ;;  %v1993_v54 = vrot.slane %v1965_v45, %v5013_v35  ;;  %v6401_v45 = vld [vmem:[#allocation4_spill] sm:$0xff] }
 0x543   :  { %4490 = vmatmul.mubr.msk.bf16.vlgmr.msra.gmra.mxu1 %vm696_vm2, %v1866_v22  ;;  %v4656_v22 = vld [vmem:[%s6296_s3 + $0xa0] sm:$0xff]  }
 0x544   :  { %4076 = vmatpush3.bf16.msra.mxu1 %v5431_v26  ;;  %2038 = vmatprep.mubr.bf16.mxu1 %v1986_v5 }
 0x545   :  { %4077 = vmatprep.subr.bf16.mxu1 %v5437_v16  ;;  %4508 = vmatpush3.bf16.msra.mxu0 %v4656_v22 }
 0x546   :  { %4149 = vmatprep.subr.bf16.mxu0 %v6401_v45 }
 0x548   :  { %4078 = vmatpush3.bf16.msra.mxu1 %v5443_v34 }
 0x549   :  { %4079 = vmatprep.subr.bf16.mxu1 %v5449_v3 }
 0x54c   :  { %4080 = vmatpush3.bf16.msra.mxu1 %v5455_v27 }
 0x54d   :  { %4081 = vmatprep.subr.bf16.mxu1 %v5461_v7 }
 0x550   :  { %4082 = vmatpush3.bf16.msra.mxu1 %v5467_v8 }
 0x551   :  { %4083 = vmatprep.subr.bf16.mxu1 %v5473_v30 }
 0x554   :  { %4084 = vmatpush3.bf16.msra.mxu1 %v5479_v51 }
 0x555   :  { %4085 = vmatprep.subr.bf16.mxu1 %v5485_v19 }
 0x556   :  { %v4113_v18 = vpop.f32.mrf.mxu0 }
 0x558   :  { %4086 = vmatpush3.bf16.msra.mxu1 %v5491_v33  ;;  %v4114_v5 = vpop.f32.mrf.mxu0 }
 0x559   :  { %4087 = vmatprep.subr.bf16.mxu1 %v5497_v37 }
 0x55a   :  { %v4116_v25 = vpop.f32.mrf.mxu0 }
 0x55c   :  { %4088 = vmatpush3.bf16.msra.mxu1 %v5503_v1  ;;  %v4117_v61 = vpop.f32.mrf.mxu0 }
 0x55d   :  { %4089 = vmatprep.subr.bf16.mxu1 %v5509_v48 }
 0x55e   :  { %v2160_v43 = vpop.f32.mrf.mxu0 }
 0x560   :  { %4090 = vmatpush3.bf16.msra.mxu1 %v5515_v59  ;;  %v4499_v21 = vpop.f32.mrf.mxu0 }
 0x561   :  { %4119 = vmatprep.subr.bf16.mxu1 %v5672_v11  ;;  %v6402_v21 = vld [vmem:[#allocation13_spill] sm:$0xff] }
 0x562   :  { %v2163_v17 = vpop.f32.mrf.mxu0 }
 0x563   :  { %2039 = vmatmul.mubr.bf16.vlgmr.msra.gmra.mxu1 %v1972_v14  ;;  %v4115_v14 = vadd.f32 %v4114_v5, %v4113_v18  ;;  %v1867_v17 = vld [vmem:[#allocation2] sm:$0x3] }
 0x564   :  { %4120 = vmatpush3.bf16.msra.mxu1 %v5678_v28  ;;  %2118 = vmatprep.mubr.bf16.mxu1 %v1993_v54  ;;  %v4500_v15 = vpop.f32.mrf.mxu0  ;;  %v3626_v54 = vld [vmem:[%s6295_s0 + $0x2a] sm:$0x7f] }
 0x565   :  { %4121 = vmatprep.subr.bf16.mxu1 %v5684_v31  ;;  %v2257_v18 = vrot.slane %v3626_v54, %v5013_v35  ;;  %v2250_v45 = vcombine.high %v3626_v54, %v3626_v54  ;;  %v5913_v54 = vld [vmem:[%s6297_s2] ss:$0 sm:$0xff] }
 0x567   :  { %v2265_v5 = vcombine.high %v2257_v18, %v2257_v18  ;;  %v2273_v38 = vrot.slane %v2257_v18, %v5013_v35 }
 0x568   :  { %4122 = vmatpush3.bf16.msra.mxu1 %v5690_v36 }
 0x569   :  { %4123 = vmatprep.subr.bf16.mxu1 %v5696_v12  ;;  %v2287_v25 = vrot.slane %v2265_v5, %v5013_v35  ;;  %v2295_v57 = vcombine.high %v2273_v38, %v2273_v38 }
 0x56b   :  { %v2297_v61 = vcombine.high %v2287_v25, %v2287_v25 }
 0x56c   :  { %4124 = vmatpush3.bf16.msra.mxu1 %v5702_v20 }
 0x56d   :  { %4125 = vmatprep.subr.bf16.mxu1 %v5708_v52 }
 0x570   :  { %4126 = vmatpush3.bf16.msra.mxu1 %v5714_v40 }
 0x571   :  { %4127 = vmatprep.subr.bf16.mxu1 %v5720_v24 }
 0x574   :  { %4128 = vmatpush3.bf16.msra.mxu1 %v5726_v29 }
 0x575   :  { %4129 = vmatprep.subr.bf16.mxu1 %v5732_v44 }
 0x578   :  { %4130 = vmatpush3.bf16.msra.mxu1 %v5738_v39 }
 0x579   :  { %4131 = vmatprep.subr.bf16.mxu1 %v5744_v49 }
 0x57c   :  { %4132 = vmatpush3.bf16.msra.mxu1 %v5750_v0 }
 0x57d   :  { %4133 = vmatprep.subr.bf16.mxu1 %v5756_v63 }
 0x580   :  { %4134 = vmatpush3.bf16.msra.mxu1 %v5762_v46 }
 0x581   :  { %4171 = vmatprep.subr.bf16.mxu1 %v5346_v6 }
 0x583   :  { %2119 = vmatmul.mubr.bf16.vlgmr.msra.gmra.mxu1 %v1979_v23  ;;  %v6399_v23 = vld [vmem:[#allocation11_spill] sm:$0xff] }
 0x584   :  { %4172 = vmatpush3.bf16.msra.mxu1 %v5352_v9  ;;  %2379 = vmatprep.mubr.bf16.mxu1 %v2297_v61 }
 0x585   :  { %4173 = vmatprep.subr.bf16.mxu1 %v5358_v10 }
 0x588   :  { %4174 = vmatpush3.bf16.msra.mxu1 %v5364_v13 }
 0x589   :  { %4175 = vmatprep.subr.bf16.mxu1 %v5544_v42 }
 0x58c   :  { %4176 = vmatpush3.bf16.msra.mxu1 %v5550_v47 }
 0x58d   :  { %4177 = vmatprep.subr.bf16.mxu1 %v5556_v50 }
 0x590   :  { %4178 = vmatpush3.bf16.msra.mxu1 %v5562_v53 }
 0x591   :  { %4179 = vmatprep.subr.bf16.mxu1 %v6393_v4 }
 0x594   :  { %4180 = vmatpush3.bf16.msra.mxu1 %v6394_v55 }
 0x595   :  { %4181 = vmatprep.subr.bf16.mxu1 %v6395_v56 }
 0x598   :  { %4182 = vmatpush3.bf16.msra.mxu1 %v6396_v58 }
 0x599   :  { %4183 = vmatprep.subr.bf16.mxu1 %v6397_v60 }
 0x59c   :  { %4184 = vmatpush3.bf16.msra.mxu1 %v6398_v62 }
 0x59d   :  { %4185 = vmatprep.subr.bf16.mxu1 %v6399_v23 }
 0x5a0   :  { %4186 = vmatpush3.bf16.msra.mxu1 %v6400_v41 }
 0x5a1   :  { %4513 = vmatprep.subr.bf16.mxu1 %v6372_v32 }
 0x5a3   :  { %2380 = vmatmul.mubr.bf16.vlgmr.msra.gmra.mxu1 %v2295_v57  ;;  %v2264_v57 = vrot.slane %v2250_v45, %v5013_v35 }
 0x5a4   :  { %4514 = vmatpush3.bf16.msra.mxu1 %v6402_v21  ;;  %4517 = vmatprep.mubr.msk.bf16.mxu1 %vm4785_vm0, %v6372_v32 }
 0x5a5   :  { %4515 = vmatprep.subr.bf16.mxu1 %v6372_v32  ;;  %v2280_v21 = vrot.slane %v2264_v57, %v5013_v35 }
 0x5a7   :  { %v2296_v41 = vcombine.high %v2280_v21, %v2280_v21 }
 0x5a8   :  { %4516 = vmatpush3.bf16.msra.mxu1 %v6403_v2 }
 0x5a9   :  { %4521 = vmatprep.subr.bf16.mxu1 %v6372_v32 }
 0x5ab   :  { %4518 = vmatmul.mubr.msk.bf16.vlgmr.msra.gmra.mxu1 %vm497_vm1, %v2296_v41 }
 0x5ac   :  { %4529 = vmatprep.mubr.msk.bf16.mxu1 %vm4785_vm0, %v6372_v32 }
 0x603   :  { %v1938_v15 = vpop.f32.mrf.mxu1 }
 0x604   :  { %v1944_v22 = vadd.f32 %v1938_v15, %v1867_v17 }
 0x605   :  { %v4491_v5 = vpop.f32.mrf.mxu1 }
 0x606   :  { %1945 = vst [vmem:[#allocation2] sm:$0x3] %v1944_v22 }
 0x607   :  { %v1941_v18 = vpop.f32.mrf.mxu1 }
 0x609   :  { %v4492_v61 = vpop.f32.mrf.mxu1 }
 0x623   :  { %v4091_v2 = vpop.f32.mrf.mxu1 }
 0x625   :  { %v4092_v23 = vpop.f32.mrf.mxu1 }
 0x626   :  { %v4093_v17 = vadd.f32 %v4092_v23, %v4091_v2  ;;  %v4659_v2 = vld [vmem:[%s6296_s3 + $0xd0] sm:$0xff]  }
 0x627   :  { %v4094_v62 = vpop.f32.mrf.mxu1 }
 0x628   :  { %v2041_v45 = vadd.f32 %v5913_v54, %v4093_v17  ;;  %v6411_v62 = vmov 0.0  }
 0x629   :  { %v4095_v60 = vpop.f32.mrf.mxu1 }
 0x62a   :  { %v2081_v5 = vadd.f32 %v4115_v14, %v2041_v45  ;;  %v6410_v60 = vld [vmem:[#allocation12_spill] sm:$0xff] }
 0x62b   :  { %v4660_v45 = vld [vmem:[%s6296_s3 + $0xc8] sm:$0xff]  }
 0x643   :  { %v4135_v15 = vpop.f32.mrf.mxu1 }
 0x645   :  { %v4136_v22 = vpop.f32.mrf.mxu1 }
 0x646   :  { %v4137_v18 = vadd.f32 %v4136_v22, %v4135_v15 }
 0x647   :  { %v4138_v41 = vpop.f32.mrf.mxu1 }
 0x648   :  { %v2121_v61 = vadd.f32 %v4137_v18, %v2081_v5  ;;  %v4661_v5 = vld [vmem:[%s6296_s3 + $0xc0] sm:$0xff]   ;;  %v6412_v18 = vld [vmem:[#allocation4_spill] sm:$0xff] }
 0x649   :  { %v4139_v58 = vpop.f32.mrf.mxu1  ;;  %v3641_v41 = vld [vmem:[%s6295_s0 + $0x31] sm:$0x7f] }
 0x64a   :  { %v2161_v32 = vadd.f32 %v2160_v43, %v2121_v61  ;;  %v6406_v58 = vld [vmem:[#allocation3_spill] sm:$0xff]  ;;  %v2558_v61 = vrot.slane %v3641_v41, %v5013_v35 }
 0x64c   :  { %v2166_v56 = vmax.f32 %v2161_v32, 0.0  ;;  %v2266_v32 = vcombine.high %v2264_v57, %v2264_v57 }
 0x64e   :  { %v2167_v55 = vpack.c.bf16 %v2166_v56, %v2166_v56  ;;  %v6404_v56 = vld [vmem:[#allocation6_spill] sm:$0xff] }
 0x650   :  { %4510 = vmatmul.mubr.msk.bf16.vlgmr.msra.gmra.mxu0 %vm696_vm2, %v2167_v55  ;;  %v2294_v55 = vrot.slane %v2266_v32, %v5013_v35  ;;  %v2566_v32 = vcombine.high %v2558_v61, %v2558_v61 }
 0x651   :  { %4150 = vmatpush3.bf16.msra.mxu0 %v5431_v26  ;;  %2339 = vmatprep.mubr.bf16.mxu0 %v2287_v25 }
 0x652   :  { %4151 = vmatprep.subr.bf16.mxu0 %v5437_v16 }
 0x655   :  { %4152 = vmatpush3.bf16.msra.mxu0 %v5443_v34 }
 0x656   :  { %4153 = vmatprep.subr.bf16.mxu0 %v5449_v3 }
 0x659   :  { %4154 = vmatpush3.bf16.msra.mxu0 %v5455_v27 }
 0x65a   :  { %4155 = vmatprep.subr.bf16.mxu0 %v5461_v7 }
 0x65d   :  { %4156 = vmatpush3.bf16.msra.mxu0 %v5467_v8 }
 0x65e   :  { %4157 = vmatprep.subr.bf16.mxu0 %v5473_v30 }
 0x661   :  { %4158 = vmatpush3.bf16.msra.mxu0 %v5479_v51 }
 0x662   :  { %4159 = vmatprep.subr.bf16.mxu0 %v5485_v19 }
 0x663   :  { %v4187_v23 = vpop.f32.mrf.mxu1 }
 0x665   :  { %4160 = vmatpush3.bf16.msra.mxu0 %v5491_v33  ;;  %v4188_v14 = vpop.f32.mrf.mxu1 }
 0x666   :  { %4161 = vmatprep.subr.bf16.mxu0 %v5497_v37  ;;  %v4189_v43 = vadd.f32 %v4188_v14, %v4187_v23  ;;  %v2574_v23 = vrot.slane %v2558_v61, %v5013_v35 }
 0x667   :  { %v4190_v25 = vpop.f32.mrf.mxu1 }
 0x668   :  { %v2596_v25 = vcombine.high %v2574_v23, %v2574_v23 }
 0x669   :  { %4162 = vmatpush3.bf16.msra.mxu0 %v5503_v1 }
 0x66a   :  { %4163 = vmatprep.subr.bf16.mxu0 %v5509_v48 }
 0x66d   :  { %4164 = vmatpush3.bf16.msra.mxu0 %v5515_v59 }
 0x66e   :  { %4193 = vmatprep.subr.bf16.mxu0 %v5672_v11 }
 0x670   :  { %2340 = vmatmul.mubr.bf16.vlgmr.msra.gmra.mxu0 %v2273_v38  ;;  %v4658_v38 = vld [vmem:[%s6296_s3 + $0xd8] sm:$0xff]  }
 0x671   :  { %4194 = vmatpush3.bf16.msra.mxu0 %v5678_v28  ;;  %2419 = vmatprep.mubr.bf16.mxu0 %v2294_v55  ;;  %v2588_v55 = vrot.slane %v2566_v32, %v5013_v35 }
 0x672   :  { %4195 = vmatprep.subr.bf16.mxu0 %v5684_v31  ;;  %4522 = vmatpush3.bf16.msra.mxu1 %v4658_v38  ;;  %v6413_v38 = vld [vmem:[#allocation13_spill] sm:$0xff] }
 0x673   :  { %4523 = vmatprep.subr.bf16.mxu1 %v6411_v62  ;;  %v2598_v14 = vcombine.high %v2588_v55, %v2588_v55 }
 0x675   :  { %4196 = vmatpush3.bf16.msra.mxu0 %v5690_v36 }
 0x676   :  { %4197 = vmatprep.subr.bf16.mxu0 %v5696_v12  ;;  %4524 = vmatpush3.bf16.msra.mxu1 %v4659_v2  ;;  %v2168_v2 = vld [vmem:[#allocation2] sm:$0x3] }
 0x677   :  { %4525 = vmatprep.subr.bf16.mxu1 %v6411_v62 }
 0x679   :  { %4198 = vmatpush3.bf16.msra.mxu0 %v5702_v20 }
 0x67a   :  { %4199 = vmatprep.subr.bf16.mxu0 %v5708_v52  ;;  %4526 = vmatpush3.bf16.msra.mxu1 %v4660_v45 }
 0x67b   :  { %4527 = vmatprep.subr.bf16.mxu1 %v6411_v62 }
 0x67d   :  { %4200 = vmatpush3.bf16.msra.mxu0 %v5714_v40 }
 0x67e   :  { %4201 = vmatprep.subr.bf16.mxu0 %v5720_v24  ;;  %4528 = vmatpush3.bf16.msra.mxu1 %v4661_v5  ;;  %v2551_v5 = vcombine.high %v3641_v41, %v3641_v41 }
 0x67f   :  { %4223 = vmatprep.subr.bf16.mxu1 %v6412_v18 }
 0x680   :  { %v2565_v61 = vrot.slane %v2551_v5, %v5013_v35 }
 0x681   :  { %4202 = vmatpush3.bf16.msra.mxu0 %v5726_v29 }
 0x682   :  { %4203 = vmatprep.subr.bf16.mxu0 %v5732_v44  ;;  %v2581_v32 = vrot.slane %v2565_v61, %v5013_v35 }
 0x685   :  { %4204 = vmatpush3.bf16.msra.mxu0 %v5738_v39 }
 0x686   :  { %4205 = vmatprep.subr.bf16.mxu0 %v5744_v49 }
 0x689   :  { %4206 = vmatpush3.bf16.msra.mxu0 %v5750_v0 }
 0x68a   :  { %4207 = vmatprep.subr.bf16.mxu0 %v5756_v63 }
 0x68d   :  { %4208 = vmatpush3.bf16.msra.mxu0 %v5762_v46 }
 0x68e   :  { %4245 = vmatprep.subr.bf16.mxu0 %v5346_v6  ;;  %v6405_v6 = vld [vmem:[#allocation7_spill] sm:$0xff] }
 0x690   :  { %2420 = vmatmul.mubr.bf16.vlgmr.msra.gmra.mxu0 %v2280_v21  ;;  %v4191_v21 = vpop.f32.mrf.mxu1 }
 0x691   :  { %4246 = vmatpush3.bf16.msra.mxu0 %v5352_v9  ;;  %v6407_v9 = vld [vmem:[#allocation9_spill] sm:$0xff]  ;;  %2680 = vmatprep.mubr.bf16.mxu0 %v2598_v14  ;;  %v6414_v21 = vld [vmem:[#allocation14_spill] sm:$0xff]  ;;  %v2597_v14 = vcombine.high %v2581_v32, %v2581_v32 }
 0x692   :  { %4247 = vmatprep.subr.bf16.mxu0 %v5358_v10  ;;  %v6408_v10 = vld [vmem:[#allocation10_spill] sm:$0xff]  ;;  %v2461_v57 = vpop.f32.mrf.mxu1 }
 0x694   :  { %v4519_v17 = vpop.f32.mrf.mxu1 }
 0x695   :  { %4248 = vmatpush3.bf16.msra.mxu0 %v5364_v13  ;;  %v6409_v13 = vld [vmem:[#allocation11_spill] sm:$0xff] }
 0x696   :  { %4249 = vmatprep.subr.bf16.mxu0 %v5544_v42  ;;  %v2464_v15 = vpop.f32.mrf.mxu1 }
 0x698   :  { %v4520_v22 = vpop.f32.mrf.mxu1 }
 0x699   :  { %4250 = vmatpush3.bf16.msra.mxu0 %v5550_v47 }
 0x69a   :  { %4251 = vmatprep.subr.bf16.mxu0 %v5556_v50 }
 0x69d   :  { %4252 = vmatpush3.bf16.msra.mxu0 %v5562_v53 }
 0x69e   :  { %4253 = vmatprep.subr.bf16.mxu0 %v6393_v4 }
 0x6a1   :  { %4254 = vmatpush3.bf16.msra.mxu0 %v6404_v56 }
 0x6a2   :  { %4255 = vmatprep.subr.bf16.mxu0 %v6405_v6 }
 0x6a5   :  { %4256 = vmatpush3.bf16.msra.mxu0 %v6406_v58 }
 0x6a6   :  { %4257 = vmatprep.subr.bf16.mxu0 %v6407_v9 }
 0x6a9   :  { %4258 = vmatpush3.bf16.msra.mxu0 %v6408_v10 }
 0x6aa   :  { %4259 = vmatprep.subr.bf16.mxu0 %v6409_v13 }
 0x6ad   :  { %4260 = vmatpush3.bf16.msra.mxu0 %v6410_v60 }
 0x6ae   :  { %4533 = vmatprep.subr.bf16.mxu0 %v6411_v62 }
 0x6b0   :  { %2681 = vmatmul.mubr.bf16.vlgmr.msra.gmra.mxu0 %v2596_v25 }
 0x6b1   :  { %4534 = vmatpush3.bf16.msra.mxu0 %v6413_v38  ;;  %4537 = vmatprep.mubr.msk.bf16.mxu0 %vm4785_vm0, %v6411_v62 }
 0x6b2   :  { %4535 = vmatprep.subr.bf16.mxu0 %v6411_v62 }
 0x6b5   :  { %4536 = vmatpush3.bf16.msra.mxu0 %v6414_v21 }
 0x6b6   :  { %4541 = vmatprep.subr.bf16.mxu0 %v6411_v62 }
 0x6b8   :  { %4538 = vmatmul.mubr.msk.bf16.vlgmr.msra.gmra.mxu0 %vm497_vm1, %v2597_v14 }
 0x6b9   :  { %4549 = vmatprep.mubr.msk.bf16.mxu0 %vm4785_vm0, %v6411_v62 }
 0x710   :  { %v2239_v17 = vpop.f32.mrf.mxu0 }
 0x711   :  { %v2245_v45 = vadd.f32 %v2239_v17, %v2168_v2 }
 0x712   :  { %v4511_v15 = vpop.f32.mrf.mxu0 }
 0x713   :  { %2246 = vst [vmem:[#allocation2] sm:$0x3] %v2245_v45 }
 0x714   :  { %v2242_v22 = vpop.f32.mrf.mxu0 }
 0x716   :  { %v4512_v18 = vpop.f32.mrf.mxu0 }
 0x730   :  { %v4165_v25 = vpop.f32.mrf.mxu0 }
 0x732   :  { %v4166_v21 = vpop.f32.mrf.mxu0 }
 0x733   :  { %v4167_v2 = vadd.f32 %v4166_v21, %v4165_v25  ;;  %v6420_v21 = vld [vmem:[#allocation14_spill] sm:$0xff] }
 0x734   :  { %v4168_v38 = vpop.f32.mrf.mxu0 }
 0x735   :  { %v2342_v17 = vadd.f32 %v5913_v54, %v4167_v2  ;;  %v6419_v38 = vld [vmem:[#allocation13_spill] sm:$0xff] }
 0x736   :  { %v4169_v60 = vpop.f32.mrf.mxu0 }
 0x737   :  { %v2382_v15 = vadd.f32 %v4189_v43, %v2342_v17 }
 0x750   :  { %v4209_v45 = vpop.f32.mrf.mxu0 }
 0x752   :  { %v4210_v41 = vpop.f32.mrf.mxu0 }
 0x753   :  { %v4211_v22 = vadd.f32 %v4210_v41, %v4209_v45 }
 0x754   :  { %v4212_v5 = vpop.f32.mrf.mxu0 }
 0x755   :  { %v2422_v18 = vadd.f32 %v4211_v22, %v2382_v15 }
 0x756   :  { %v4213_v13 = vpop.f32.mrf.mxu0 }
 0x757   :  { %v2462_v10 = vadd.f32 %v2461_v57, %v2422_v18 }
 0x759   :  { %v2467_v9 = vmax.f32 %v2462_v10, 0.0  ;;  %v3656_v10 = vld [vmem:[%s6295_s0 + $0x38] sm:$0x7f] }
 0x75a   :  { %v2859_v13 = vrot.slane %v3656_v10, %v5013_v35  ;;  %v2852_v45 = vcombine.high %v3656_v10, %v3656_v10  ;;  %v4778_v10 = vld [vmem:[%s6294_s1 + $0x10] sm:$0xff]  }
 0x75b   :  { %v2468_v14 = vpack.c.bf16 %v2467_v9, %v2467_v9  ;;  %v4767_v9 = vld [vmem:[%s6294_s1 + $0x78] sm:$0xff]  }
 0x75c   :  { %v2867_v60 = vcombine.high %v2859_v13, %v2859_v13  ;;  %v6082_v57 = vrot.slane %v2859_v13, %v5013_v35  ;;  %v2866_v15 = vrot.slane %v2852_v45, %v5013_v35  ;;  %v4779_v13 = vld [vmem:[%s6294_s1 + $0x48] sm:$0xff]  }
 0x75d   :  { %4530 = vmatmul.mubr.msk.bf16.vlgmr.msra.gmra.mxu1 %vm696_vm2, %v2468_v14 }
 0x75e   :  { %4224 = vmatpush3.bf16.msra.mxu1 %v5431_v26  ;;  %2640 = vmatprep.mubr.bf16.mxu1 %v2588_v55  ;;  %v2567_v26 = vcombine.high %v2565_v61, %v2565_v61  ;;  %v2889_v43 = vrot.slane %v2867_v60, %v5013_v35  ;;  %v2469_v61 = vld [vmem:[#allocation2] sm:$0x3]  ;;  %v6094_v22 = vrot.slane %v2866_v15, %v5013_v35  ;;  %v4780_v60 = vld [vmem:[%s6294_s1 + $0x8] sm:$0xff]  }
 0x75f   :  { %4225 = vmatprep.subr.bf16.mxu1 %v5437_v16 }
 0x760   :  { %v2595_v16 = vrot.slane %v2567_v26, %v5013_v35  ;;  %v2899_v55 = vcombine.high %v2889_v43, %v2889_v43  ;;  %v2898_v5 = vcombine.high %v6094_v22, %v6094_v22 }
 0x762   :  { %4226 = vmatpush3.bf16.msra.mxu1 %v5443_v34  ;;  %v4763_v34 = vld [vmem:[%s6294_s1 + $0xf8] sm:$0xff]  }
 0x763   :  { %4227 = vmatprep.subr.bf16.mxu1 %v5449_v3  ;;  %v4764_v3 = vld [vmem:[%s6294_s1 + $0xb8] sm:$0xff]  }
 0x766   :  { %4228 = vmatpush3.bf16.msra.mxu1 %v5455_v27  ;;  %v4765_v27 = vld [vmem:[%s6294_s1 + $0xf0] sm:$0xff]  }
 0x767   :  { %4229 = vmatprep.subr.bf16.mxu1 %v5461_v7  ;;  %v4766_v7 = vld [vmem:[%s6294_s1 + $0xb0] sm:$0xff]  }
 0x76a   :  { %4230 = vmatpush3.bf16.msra.mxu1 %v5467_v8  ;;  %v6415_v8 = vld [vmem:[#allocation9_spill] sm:$0xff] }
 0x76b   :  { %4231 = vmatprep.subr.bf16.mxu1 %v5473_v30  ;;  %v6416_v30 = vld [vmem:[#allocation10_spill] sm:$0xff] }
 0x76e   :  { %4232 = vmatpush3.bf16.msra.mxu1 %v5479_v51  ;;  %v6417_v51 = vld [vmem:[#allocation11_spill] sm:$0xff] }
 0x76f   :  { %4233 = vmatprep.subr.bf16.mxu1 %v5485_v19  ;;  %v6418_v19 = vld [vmem:[#allocation12_spill] sm:$0xff] }
 0x772   :  { %4234 = vmatpush3.bf16.msra.mxu1 %v5491_v33  ;;  %v4261_v33 = vpop.f32.mrf.mxu0 }
 0x773   :  { %4235 = vmatprep.subr.bf16.mxu1 %v5497_v37 }
 0x774   :  { %v4262_v37 = vpop.f32.mrf.mxu0 }
 0x776   :  { %4236 = vmatpush3.bf16.msra.mxu1 %v5503_v1  ;;  %v4263_v1 = vadd.f32 %v4262_v37, %v4261_v33 }
 0x777   :  { %4237 = vmatprep.subr.bf16.mxu1 %v5509_v48  ;;  %v4264_v48 = vpop.f32.mrf.mxu0 }
 0x77a   :  { %4238 = vmatpush3.bf16.msra.mxu1 %v5515_v59  ;;  %v4663_v59 = vld [vmem:[%s6296_s3 + $0xf8] sm:$0xff]  }
 0x77b   :  { %4267 = vmatprep.subr.bf16.mxu1 %v5672_v11  ;;  %4542 = vmatpush3.bf16.msra.mxu0 %v4663_v59 }
 0x77c   :  { %4543 = vmatprep.subr.bf16.mxu0 %v6411_v62 }
 0x77d   :  { %2641 = vmatmul.mubr.bf16.vlgmr.msra.gmra.mxu1 %v2574_v23  ;;  %v2897_v23 = vcombine.high %v6082_v57, %v6082_v57 }
 0x77e   :  { %4268 = vmatpush3.bf16.msra.mxu1 %v5678_v28  ;;  %2720 = vmatprep.mubr.bf16.mxu1 %v2595_v16 }
 0x77f   :  { %4269 = vmatprep.subr.bf16.mxu1 %v5684_v31 }
 0x782   :  { %4270 = vmatpush3.bf16.msra.mxu1 %v5690_v36 }
 0x783   :  { %4271 = vmatprep.subr.bf16.mxu1 %v5696_v12 }
 0x786   :  { %4272 = vmatpush3.bf16.msra.mxu1 %v5702_v20 }
 0x787   :  { %4273 = vmatprep.subr.bf16.mxu1 %v5708_v52 }
 0x78a   :  { %4274 = vmatpush3.bf16.msra.mxu1 %v5714_v40 }
 0x78b   :  { %4275 = vmatprep.subr.bf16.mxu1 %v5720_v24 }
 0x78e   :  { %4276 = vmatpush3.bf16.msra.mxu1 %v5726_v29 }
 0x78f   :  { %4277 = vmatprep.subr.bf16.mxu1 %v5732_v44 }
 0x792   :  { %4278 = vmatpush3.bf16.msra.mxu1 %v5738_v39 }
 0x793   :  { %4279 = vmatprep.subr.bf16.mxu1 %v5744_v49 }
 0x796   :  { %4280 = vmatpush3.bf16.msra.mxu1 %v5750_v0 }
 0x797   :  { %4281 = vmatprep.subr.bf16.mxu1 %v5756_v63 }
 0x79a   :  { %4282 = vmatpush3.bf16.msra.mxu1 %v5762_v46 }
 0x79b   :  { %4319 = vmatprep.subr.bf16.mxu1 %v4763_v34 }
 0x79d   :  { %2721 = vmatmul.mubr.bf16.vlgmr.msra.gmra.mxu1 %v2581_v32 }
 0x79e   :  { %4320 = vmatpush3.bf16.msra.mxu1 %v4764_v3  ;;  %2981 = vmatprep.mubr.bf16.mxu1 %v2899_v55  ;;  %v4781_v55 = vld [vmem:[%s6294_s1 + $0x40] sm:$0xff]  }
 0x79f   :  { %4321 = vmatprep.subr.bf16.mxu1 %v4765_v27 }
 0x7a2   :  { %4322 = vmatpush3.bf16.msra.mxu1 %v4766_v7 }
 0x7a3   :  { %4323 = vmatprep.subr.bf16.mxu1 %v5544_v42  ;;  %v4265_v42 = vpop.f32.mrf.mxu0 }
 0x7a4   :  { %v4768_v42 = vld [vmem:[%s6294_s1 + $0x38] sm:$0xff]  }
 0x7a6   :  { %4324 = vmatpush3.bf16.msra.mxu1 %v5550_v47  ;;  %v4664_v47 = vld [vmem:[%s6296_s3 + $0xf0] sm:$0xff]  }
 0x7a7   :  { %4325 = vmatprep.subr.bf16.mxu1 %v5556_v50  ;;  %v2762_v50 = vpop.f32.mrf.mxu0  ;;  %4544 = vmatpush3.bf16.msra.mxu0 %v4664_v47  ;;  %v4769_v47 = vld [vmem:[%s6294_s1 + $0x70] sm:$0xff]  }
 0x7a8   :  { %4545 = vmatprep.subr.bf16.mxu0 %v6411_v62 }
 0x7aa   :  { %4326 = vmatpush3.bf16.msra.mxu1 %v5562_v53  ;;  %v4539_v53 = vpop.f32.mrf.mxu0 }
 0x7ab   :  { %4327 = vmatprep.subr.bf16.mxu1 %v6393_v4  ;;  %v4665_v4 = vld [vmem:[%s6296_s3 + $0xe8] sm:$0xff]  }
 0x7ac   :  { %4546 = vmatpush3.bf16.msra.mxu0 %v4665_v4  ;;  %v4772_v53 = vld [vmem:[%s6294_s1 + $0x28] sm:$0xff]   ;;  %v4773_v4 = vld [vmem:[%s6294_s1 + $0x60] sm:$0xff]  }
 0x7ad   :  { %4547 = vmatprep.subr.bf16.mxu0 %v6411_v62 }
 0x7ae   :  { %4328 = vmatpush3.bf16.msra.mxu1 %v6404_v56  ;;  %v2765_v56 = vpop.f32.mrf.mxu0 }
 0x7af   :  { %4329 = vmatprep.subr.bf16.mxu1 %v6405_v6  ;;  %v4774_v56 = vld [vmem:[%s6294_s1 + $0x20] sm:$0xff]  }
 0x7b0   :  { %v4540_v6 = vpop.f32.mrf.mxu0 }
 0x7b1   :  { %v4775_v6 = vld [vmem:[%s6294_s1 + $0x58] sm:$0xff]  }
 0x7b2   :  { %4330 = vmatpush3.bf16.msra.mxu1 %v6406_v58  ;;  %v4666_v58 = vld [vmem:[%s6296_s3 + $0xe0] sm:$0xff]  }
 0x7b3   :  { %4331 = vmatprep.subr.bf16.mxu1 %v6415_v8  ;;  %4548 = vmatpush3.bf16.msra.mxu0 %v4666_v58  ;;  %v4776_v58 = vld [vmem:[%s6294_s1 + $0x18] sm:$0xff]  }
 0x7b4   :  { %4297 = vmatprep.subr.bf16.mxu0 %v4767_v9  ;;  %v4777_v9 = vld [vmem:[%s6294_s1 + $0x50] sm:$0xff]  }
 0x7b6   :  { %4332 = vmatpush3.bf16.msra.mxu1 %v6416_v30 }
 0x7b7   :  { %4333 = vmatprep.subr.bf16.mxu1 %v6417_v51 }
 0x7ba   :  { %4334 = vmatpush3.bf16.msra.mxu1 %v6418_v19 }
 0x7bb   :  { %4553 = vmatprep.subr.bf16.mxu1 %v6411_v62 }
 0x7bd   :  { %2982 = vmatmul.mubr.bf16.vlgmr.msra.gmra.mxu1 %v2897_v23  ;;  %v4782_v23 = vld [vmem:[%s6294_s1] sm:$0xff]  }
 0x7be   :  { %4554 = vmatpush3.bf16.msra.mxu1 %v6419_v38  ;;  %4557 = vmatprep.mubr.msk.bf16.mxu1 %vm4785_vm0, %v6411_v62 }
 0x7bf   :  { %4555 = vmatprep.subr.bf16.mxu1 %v6411_v62 }
 0x7c2   :  { %4556 = vmatpush3.bf16.msra.mxu1 %v6420_v21 }
 0x7c3   :  { %4561 = vmatprep.subr.bf16.mxu1 %v6411_v62 }
 0x7c5   :  { %4558 = vmatmul.mubr.msk.bf16.vlgmr.msra.gmra.mxu1 %vm497_vm1, %v2898_v5 }
 0x7c6   :  { %4569 = vmatprep.mubr.msk.bf16.mxu1 %vm4785_vm0, %v6411_v62 }
 0x81d   :  { %v2540_v32 = vpop.f32.mrf.mxu1 }
 0x81e   :  { %v2546_v25 = vadd.f32 %v2540_v32, %v2469_v61 }
 0x81f   :  { %v4531_v2 = vpop.f32.mrf.mxu1 }
 0x820   :  { %2547 = vst [vmem:[#allocation2] sm:$0x3] %v2546_v25 }
 0x821   :  { %v2543_v17 = vpop.f32.mrf.mxu1 }
 0x823   :  { %v4532_v41 = vpop.f32.mrf.mxu1 }
 0x83d   :  { %v4239_v18 = vpop.f32.mrf.mxu1 }
 0x83f   :  { %v4240_v14 = vpop.f32.mrf.mxu1 }
 0x840   :  { %v4241_v34 = vadd.f32 %v4240_v14, %v4239_v18 }
 0x841   :  { %v4242_v26 = vpop.f32.mrf.mxu1 }
 0x842   :  { %v2643_v3 = vadd.f32 %v5913_v54, %v4241_v34 }
 0x843   :  { %v4243_v16 = vpop.f32.mrf.mxu1 }
 0x844   :  { %v2683_v8 = vadd.f32 %v4263_v1, %v2643_v3  ;;  %v4770_v1 = vld [vmem:[%s6294_s1 + $0x30] sm:$0xff]  }
 0x845   :  { %v4672_v3 = vld [vmem:[%s6298_s5 + $0x70] ss:$8 sps:$4 sm:$0xff]  }
 0x85d   :  { %v4283_v27 = vpop.f32.mrf.mxu1 }
 0x85f   :  { %v4284_v7 = vpop.f32.mrf.mxu1 }
 0x860   :  { %v4285_v30 = vadd.f32 %v4284_v7, %v4283_v27  ;;  %v4677_v7 = vld [vmem:[%s6298_s5 + $0x64] ss:$8 sps:$4 sm:$0xff]  }
 0x861   :  { %v4286_v51 = vpop.f32.mrf.mxu1 }
 0x862   :  { %v2723_v19 = vadd.f32 %v4285_v30, %v2683_v8  ;;  %v4680_v8 = vld [vmem:[%s6298_s5 + $0x54] ss:$8 sps:$4 sm:$0xff]   ;;  %v4678_v30 = vld [vmem:[%s6298_s5 + $0x50] ss:$8 sps:$4 sm:$0xff]   ;;  %v4683_v51 = vld [vmem:[%s6298_s5 + $0x44] ss:$8 sps:$4 sm:$0xff]  }
 0x863   :  { %v4287_v33 = vpop.f32.mrf.mxu1 }
 0x864   :  { %v2763_v37 = vadd.f32 %v2762_v50, %v2723_v19  ;;  %v4771_v50 = vld [vmem:[%s6294_s1 + $0x68] sm:$0xff]   ;;  %v4686_v33 = vld [vmem:[%s6298_s5 + $0x34] ss:$8 sps:$4 sm:$0xff]  }
 0x865   :  { %v4681_v19 = vld [vmem:[%s6298_s5 + $0x40] ss:$8 sps:$4 sm:$0xff]  }
 0x866   :  { %v2768_v48 = vmax.f32 %v2763_v37, 0.0  ;;  %v4684_v37 = vld [vmem:[%s6298_s5 + $0x30] ss:$8 sps:$4 sm:$0xff]  }
 0x868   :  { %v2769_v59 = vpack.c.bf16 %v2768_v48, %v2768_v48  ;;  %v4689_v48 = vld [vmem:[%s6298_s5 + $0x24] ss:$8 sps:$4 sm:$0xff]  }
 0x86a   :  { %4550 = vmatmul.mubr.msk.bf16.vlgmr.msra.gmra.mxu0 %vm696_vm2, %v2769_v59  ;;  %v4687_v59 = vld [vmem:[%s6298_s5 + $0x20] ss:$8 sps:$4 sm:$0xff]  }
 0x86b   :  { %4298 = vmatpush3.bf16.msra.mxu0 %v4768_v42  ;;  %2941 = vmatprep.mubr.bf16.mxu0 %v2889_v43  ;;  %v2868_v43 = vcombine.high %v2866_v15, %v2866_v15  ;;  %v4690_v42 = vld [vmem:[%s6298_s5 + $0x10] ss:$8 sps:$4 sm:$0xff]  }
 0x86c   :  { %4299 = vmatprep.subr.bf16.mxu0 %v4769_v47  ;;  %v4692_v47 = vld [vmem:[%s6298_s5 + $0x14] ss:$8 sps:$4 sm:$0xff]  }
 0x86d   :  { %v2896_v38 = vrot.slane %v2868_v43, %v5013_v35  ;;  %v4704_v43 = vld [vmem:[%s6299_s7 + $0x58] sm:$0xff]  }
 0x86f   :  { %4300 = vmatpush3.bf16.msra.mxu0 %v4770_v1  ;;  %v4695_v1 = vld [vmem:[%s6298_s5 + $0x4] ss:$8 sps:$4 sm:$0xff]  }
 0x870   :  { %4301 = vmatprep.subr.bf16.mxu0 %v4771_v50  ;;  %v4786_v50 = vmov 0  }
 0x873   :  { %4302 = vmatpush3.bf16.msra.mxu0 %v4772_v53  ;;  %v4693_v53 = vld [vmem:[%s6298_s5] ss:$8 sps:$4 sm:$0xff]  }
 0x874   :  { %4303 = vmatprep.subr.bf16.mxu0 %v4773_v4  ;;  %v4696_v4 = vld [vmem:[%s6299_s7 + $0x78] sm:$0xff]  }
 0x877   :  { %4304 = vmatpush3.bf16.msra.mxu0 %v4774_v56  ;;  %v4697_v56 = vld [vmem:[%s6299_s7 + $0x38] sm:$0xff]  }
 0x878   :  { %4305 = vmatprep.subr.bf16.mxu0 %v4775_v6  ;;  %v4698_v6 = vld [vmem:[%s6299_s7 + $0x70] sm:$0xff]  }
 0x87b   :  { %4306 = vmatpush3.bf16.msra.mxu0 %v4776_v58  ;;  %v4699_v58 = vld [vmem:[%s6299_s7 + $0x30] sm:$0xff]  }
 0x87c   :  { %4307 = vmatprep.subr.bf16.mxu0 %v4777_v9  ;;  %v4700_v9 = vld [vmem:[%s6299_s7 + $0x68] sm:$0xff]  }
 0x87d   :  { %v4335_v35 = vpop.f32.mrf.mxu1 }
 0x87f   :  { %4308 = vmatpush3.bf16.msra.mxu0 %v4778_v10  ;;  %v4701_v10 = vld [vmem:[%s6299_s7 + $0x28] sm:$0xff]  }
 0x880   :  { %4309 = vmatprep.subr.bf16.mxu0 %v4779_v13  ;;  %v4702_v13 = vld [vmem:[%s6299_s7 + $0x60] sm:$0xff]  }
 0x883   :  { %4310 = vmatpush3.bf16.msra.mxu0 %v4780_v60  ;;  %v4703_v60 = vld [vmem:[%s6299_s7 + $0x20] sm:$0xff]  }
 0x884   :  { %4311 = vmatprep.subr.bf16.mxu0 %v4781_v55  ;;  %v4705_v55 = vld [vmem:[%s6299_s7 + $0x18] sm:$0xff]  }
 0x887   :  { %4312 = vmatpush3.bf16.msra.mxu0 %v4782_v23  ;;  %v4706_v23 = vld [vmem:[%s6299_s7 + $0x50] sm:$0xff]  }
 0x888   :  { %4341 = vmatprep.subr.bf16.mxu0 %v5672_v11  ;;  %v4336_v11 = vpop.f32.mrf.mxu1 }
 0x88a   :  { %2942 = vmatmul.mubr.bf16.vlgmr.msra.gmra.mxu0 %v6082_v57 }
 0x88b   :  { %4342 = vmatpush3.bf16.msra.mxu0 %v5678_v28  ;;  %3021 = vmatprep.mubr.bf16.mxu0 %v2896_v38  ;;  %v4337_v28 = vadd.f32 %v4336_v11, %v4335_v35  ;;  %v4707_v38 = vld [vmem:[%s6299_s7 + $0x10] sm:$0xff]  }
 0x88c   :  { %4343 = vmatprep.subr.bf16.mxu0 %v5684_v31  ;;  %v4338_v31 = vpop.f32.mrf.mxu1 }
 0x88f   :  { %4344 = vmatpush3.bf16.msra.mxu0 %v5690_v36  ;;  %v4668_v36 = vld [vmem:[%s6296_s3 + $0x118] sm:$0xff]  }
 0x890   :  { %4345 = vmatprep.subr.bf16.mxu0 %v5696_v12  ;;  %v4339_v12 = vpop.f32.mrf.mxu1  ;;  %4562 = vmatpush3.bf16.msra.mxu1 %v4668_v36 }
 0x891   :  { %4563 = vmatprep.subr.bf16.mxu1 %v6411_v62 }
 0x893   :  { %4346 = vmatpush3.bf16.msra.mxu0 %v5702_v20  ;;  %v3063_v20 = vpop.f32.mrf.mxu1 }
 0x894   :  { %4347 = vmatprep.subr.bf16.mxu0 %v5708_v52  ;;  %v4669_v52 = vld [vmem:[%s6296_s3 + $0x110] sm:$0xff]  }
 0x895   :  { %4564 = vmatpush3.bf16.msra.mxu1 %v4669_v52 }
 0x896   :  { %4565 = vmatprep.subr.bf16.mxu1 %v6411_v62 }
 0x897   :  { %4348 = vmatpush3.bf16.msra.mxu0 %v5714_v40  ;;  %v4559_v40 = vpop.f32.mrf.mxu1 }
 0x898   :  { %4349 = vmatprep.subr.bf16.mxu0 %v5720_v24 }
 0x899   :  { %v3066_v24 = vpop.f32.mrf.mxu1 }
 0x89b   :  { %4350 = vmatpush3.bf16.msra.mxu0 %v5726_v29  ;;  %v4670_v29 = vld [vmem:[%s6296_s3 + $0x108] sm:$0xff]  }
 0x89c   :  { %4351 = vmatprep.subr.bf16.mxu0 %v5732_v44  ;;  %v4560_v44 = vpop.f32.mrf.mxu1  ;;  %4566 = vmatpush3.bf16.msra.mxu1 %v4670_v29 }
 0x89d   :  { %4567 = vmatprep.subr.bf16.mxu1 %v6411_v62  ;;  %v4708_v44 = vld [vmem:[%s6299_s7 + $0x48] sm:$0xff]  }
 0x89f   :  { %4352 = vmatpush3.bf16.msra.mxu0 %v5738_v39  ;;  %v4671_v39 = vld [vmem:[%s6296_s3 + $0x100] sm:$0xff]  }
 0x8a0   :  { %4353 = vmatprep.subr.bf16.mxu0 %v5744_v49  ;;  %4568 = vmatpush3.bf16.msra.mxu1 %v4671_v39  ;;  %v4674_v49 = vld [vmem:[%s6298_s5 + $0x74] ss:$8 sps:$4 sm:$0xff]   ;;  %v4709_v39 = vld [vmem:[%s6299_s7 + $0x8] sm:$0xff]  }
 0x8a1   :  { %3269 = vmatprep.subr.bf16.mxu1 %v4674_v49  ;;  %v4710_v49 = vld [vmem:[%s6299_s7 + $0x40] sm:$0xff]  }
 0x8a3   :  { %4354 = vmatpush3.bf16.msra.mxu0 %v5750_v0  ;;  %v2770_v0 = vld [vmem:[#allocation2] sm:$0x3] }
 0x8a4   :  { %4355 = vmatprep.subr.bf16.mxu0 %v5756_v63 }
 0x8a7   :  { %4356 = vmatpush3.bf16.msra.mxu0 %v5762_v46 }
 0x8a8   :  { %4371 = vmatprep.subr.bf16.mxu0 %v4696_v4 }
 0x8aa   :  { %3022 = vmatmul.mubr.bf16.vlgmr.msra.gmra.mxu0 %v6094_v22 }
 0x8ab   :  { %4372 = vmatpush3.bf16.msra.mxu0 %v4697_v56 }
 0x8ac   :  { %4373 = vmatprep.subr.bf16.mxu0 %v4698_v6 }
 0x8af   :  { %4374 = vmatpush3.bf16.msra.mxu0 %v4699_v58 }
 0x8b0   :  { %4375 = vmatprep.subr.bf16.mxu0 %v4700_v9 }
 0x8b3   :  { %4376 = vmatpush3.bf16.msra.mxu0 %v4701_v10 }
 0x8b4   :  { %4377 = vmatprep.subr.bf16.mxu0 %v4702_v13 }
 0x8b7   :  { %4378 = vmatpush3.bf16.msra.mxu0 %v4703_v60 }
 0x8b8   :  { %4379 = vmatprep.subr.bf16.mxu0 %v4704_v43 }
 0x8bb   :  { %4380 = vmatpush3.bf16.msra.mxu0 %v4705_v55 }
 0x8bc   :  { %4381 = vmatprep.subr.bf16.mxu0 %v4706_v23 }
 0x8bf   :  { %4382 = vmatpush3.bf16.msra.mxu0 %v4707_v38 }
 0x8c0   :  { %4383 = vmatprep.subr.bf16.mxu0 %v4708_v44 }
 0x8c3   :  { %4384 = vmatpush3.bf16.msra.mxu0 %v4709_v39 }
 0x8c4   :  { %4385 = vmatprep.subr.bf16.mxu0 %v4710_v49 }
 0x92a   :  { %v2841_v63 = vpop.f32.mrf.mxu0 }
 0x92b   :  { %v2847_v46 = vadd.f32 %v2841_v63, %v2770_v0  ;;  %v4711_v0 = vld [vmem:[%s6299_s7] sm:$0xff]   ;;  %v6421_v63 = vld [vmem:[#allocation8_spill] sm:$0xff] }
 0x92c   :  { %v4551_v57 = vpop.f32.mrf.mxu0  ;;  %4386 = vmatpush3.bf16.msra.mxu0 %v4711_v0 }
 0x92d   :  { %2848 = vst [vmem:[#allocation2] sm:$0x3] %v2847_v46  ;;  %v3181_v46 = vsub.s32 0, %v6421_v63  ;;  %v3177_v57 = vld [vmem:[%s6301_s6] sm:$0x3] }
 0x92e   :  { %v2844_v21 = vpop.f32.mrf.mxu0 }
 0x92f   :  { %v3185_v21 = vsub.s32 1, %v6421_v63 }
 0x930   :  { %v4552_v61 = vpop.f32.mrf.mxu0 }
 0x931   :  { %v3182_v61 = vrot.slane %v3177_v57, %v3181_v46 }
 0x934   :  { %v3071_v35 = vld [vmem:[#allocation2] sm:$0x3] }
 0x94a   :  { %v4313_v32 = vpop.f32.mrf.mxu0 }
 0x94c   :  { %v4314_v25 = vpop.f32.mrf.mxu0 }
 0x94d   :  { %v4315_v17 = vadd.f32 %v4314_v25, %v4313_v32  ;;  %v3186_v32 = vrot.slane %v3177_v57, %v3185_v21 }
 0x94e   :  { %v4316_v62 = vpop.f32.mrf.mxu0 }
 0x94f   :  { %v2944_v45 = vadd.f32 %v5913_v54, %v4315_v17  ;;  %v4675_v54 = vld [vmem:[%s6298_s5 + $0x60] ss:$8 sps:$4 sm:$0xff]  }
 0x950   :  { %v4317_v2 = vpop.f32.mrf.mxu0 }
 0x951   :  { %v2984_v22 = vadd.f32 %v4337_v28, %v2944_v45 }
 0x96a   :  { %v4357_v41 = vpop.f32.mrf.mxu0 }
 0x96c   :  { %v4358_v15 = vpop.f32.mrf.mxu0 }
 0x96d   :  { %v4359_v5 = vadd.f32 %v4358_v15, %v4357_v41 }
 0x96e   :  { %v4360_v18 = vpop.f32.mrf.mxu0 }
 0x96f   :  { %v3024_v14 = vadd.f32 %v4359_v5, %v2984_v22 }
 0x970   :  { %v4361_v26 = vpop.f32.mrf.mxu0 }
 0x971   :  { %v3064_v16 = vadd.f32 %v3063_v20, %v3024_v14  ;;  %v3671_v20 = vld [vmem:[%s6300_s4] ss:$0 sm:$0xff] }
 0x972   :  { %v3688_v26 = vld [vmem:[%s6302_s8] ss:$0 sm:$0xff] }
 0x973   :  { %v3069_v34 = vmax.f32 %v3064_v16, 0.0 }
 0x975   :  { %v3070_v27 = vpack.c.bf16 %v3069_v34, %v3069_v34 }
 0x977   :  { %4570 = vmatmul.mubr.msk.bf16.vlgmr.msra.gmra.mxu1 %vm696_vm2, %v3070_v27 }
 0x978   :  { %3270 = vmatpush1.bf16.msra.mxu1 %v4672_v3  ;;  %3301 = vmatprep.mubr.bf16.mxu1 %v4786_v50 }
 0x979   :  { %3271 = vmatprep.subr.bf16.mxu1 %v4677_v7 }
 0x97c   :  { %3272 = vmatpush1.bf16.msra.mxu1 %v4675_v54 }
 0x97d   :  { %3273 = vmatprep.subr.bf16.mxu1 %v4680_v8 }
 0x980   :  { %3274 = vmatpush1.bf16.msra.mxu1 %v4678_v30 }
 0x981   :  { %3275 = vmatprep.subr.bf16.mxu1 %v4683_v51 }
 0x984   :  { %3276 = vmatpush1.bf16.msra.mxu1 %v4681_v19 }
 0x985   :  { %3277 = vmatprep.subr.bf16.mxu1 %v4686_v33 }
 0x988   :  { %3278 = vmatpush1.bf16.msra.mxu1 %v4684_v37 }
 0x989   :  { %3279 = vmatprep.subr.bf16.mxu1 %v4689_v48 }
 0x98c   :  { %3280 = vmatpush1.bf16.msra.mxu1 %v4687_v59 }
 0x98d   :  { %3281 = vmatprep.subr.bf16.mxu1 %v4692_v47 }
 0x990   :  { %3282 = vmatpush1.bf16.msra.mxu1 %v4690_v42 }
 0x991   :  { %3283 = vmatprep.subr.bf16.mxu1 %v4695_v1 }
 0x994   :  { %3284 = vmatpush1.bf16.msra.mxu1 %v4693_v53 }
 0xa37   :  { %v3142_v11 = vpop.f32.mrf.mxu1 }
 0xa38   :  { %v3148_v28 = vadd.f32 %v3142_v11, %v3071_v35 }
 0xa39   :  { %v4571_v31 = vpop.f32.mrf.mxu1 }
 0xa3a   :  { %3149 = vst [vmem:[#allocation2] sm:$0x3] %v3148_v28 }
 0xa3b   :  { %v3145_v36 = vpop.f32.mrf.mxu1 }
 0xa3d   :  { %v4572_v12 = vpop.f32.mrf.mxu1 }
 0xa41   :  { %v3150_v52 = vld [vmem:[#allocation2] sm:$0x3] }
 0xa42   :  { %v3158_v40 = vadd.f32 %v3671_v20, %v3150_v52 }
 0xa44   :  { %v3159_v24 = vmax.f32 %v3158_v40, 0.0 }
 0xa46   :  { %v3160_v29 = vpack.c.bf16 %v3159_v24, %v3159_v24 }
 0xa48   :  { %3302 = vmatmul.mubr.bf16.vlgmr.msra.gmra.mxu1 %v3160_v29 }
 0xb08   :  { %v3303_v25 = vpop.f32.mrf.mxu1 }
 0xb09   :  { %v3304_v62 = vadd.f32 %v3303_v25, %v3182_v61 }
 0xb0a   :  { %v3305_v2 = vpop.f32.mrf.mxu1 }
 0xb0b   :  { %v3306_v17 = vadd.f32 %v3305_v2, %v3186_v32  ;;  %v3310_v45 = vmax.f32 %v3304_v62, 0.0 }
 0xb0c   :  { %v3307_v41 = vpop.f32.mrf.mxu1 }
 0xb0d   :  { %v3311_v15 = vmax.f32 %v3306_v17, 0.0  ;;  %v3312_v18 = vpack.c.bf16 %v3310_v45, %v3310_v45 }
 0xb0e   :  { %v3308_v22 = vpop.f32.mrf.mxu1 }
 0xb0f   :  { %v3313_v5 = vpack.c.bf16 %v3311_v15, %v3311_v15 }
 0xb11   :  { %3481 = vmatprep.mubr.bf16.mxu0 %v3313_v5 }
 0xb12   :  { %3482 = vmatmul.mubr.bf16.vlgmr.msra.gmra.mxu0 %v3312_v18 }
 0xbd2   :  { %v4387_v14 = vpop.f32.mrf.mxu0 }
 0xbd4   :  { %v4388_v16 = vpop.f32.mrf.mxu0 }
 0xbd5   :  { %v4389_v34 = vadd.f32 %v4388_v16, %v4387_v14 }
 0xbd6   :  { %v4390_v3 = vpop.f32.mrf.mxu0 }
 0xbd7   :  { %v3484_v27 = vadd.f32 %v4389_v34, %v3688_v26 }
 0xbd8   :  { %v4391_v7 = vpop.f32.mrf.mxu0 }
 0xbd9   :  { %3489 = vst [vmem:[%s6303_s9] sm:$0x3] %v3484_v27 }

</bundles_post_ra>
